<compile_context>
chip_gen: v7x
topology: tpu7x:2x2x1
jax: 0.10.0
libtpu: 0.0.40
codegen_flags: <defaults>
</compile_context>

<pallas_src>
import jax
import jax.numpy as jnp
from jax.experimental import pallas as pl
from jax.experimental.pallas import tpu as pltpu

EPS = 1e-5                      # nn.BatchNorm2d default eps
MXU_DTYPE = jnp.bfloat16        # native MXU input format on v5e/v6e/v7x; accumulate in f32
ACT_DTYPE = jnp.bfloat16        # c1/c2 intermediates round-tripped through HBM
VMEM_LIMIT = 48 * 1024 * 1024   # per-step working set here is <1 MiB; cap stays under v7x's 64 MiB


# --------------------------------------------------------------------------------------------
# In-kernel helpers
# --------------------------------------------------------------------------------------------
def _zero_pad1_hw(a):
    """(H, W, K) -> (H+2, W+2, K) zero pad built in-kernel (no host pad, no DMA'd mask)."""
    H, W, K = a.shape
    zc = jnp.zeros((H, 1, K), a.dtype)
    a = jnp.concatenate([zc, a, zc], axis=1)
    zr = jnp.zeros((1, W + 2, K), a.dtype)
    return jnp.concatenate([zr, a, zr], axis=0)


def _conv3x3(xp, w, H, W):
    """3x3 conv as 9 accumulated MXU matmuls (no im2col slab).

    xp: (H+2, W+2, Cin) bf16 zero-padded activations.
    w : (9, Cin, Cout) bf16 taps in (dy, dx) order.
    Returns the (H*W, Cout) f32 accumulator.
    """
    Cin = xp.shape[-1]
    Cout = w.shape[-1]
    acc = jnp.zeros((H * W, Cout), jnp.float32)
    k = 0
    for dy in range(3):
        for dx in range(3):
            a = xp[dy:dy + H, dx:dx + W, :].reshape(H * W, Cin)
            acc = acc + jnp.dot(a, w[k], preferred_element_type=jnp.float32)
            k += 1
    return acc


def _partial_stats(acc):
    """Per-channel [sum, sum-of-squares] of the f32 conv accumulator -> (2, Cout)."""
    s = jnp.sum(acc, axis=0, keepdims=True)
    q = jnp.sum(acc * acc, axis=0, keepdims=True)
    return jnp.concatenate([s, q], axis=0)


# --------------------------------------------------------------------------------------------
# Kernels (all tiled over the batch axis, grid=(N,), "parallel")
# --------------------------------------------------------------------------------------------
def conv1_stats_kernel(x_ref, w_ref, c1_ref, st_ref):
    """Pass 1 (per image): c1 = conv1(x) and per-image bn1 partial statistics."""
    _, H, W, _ = x_ref.shape
    P = w_ref.shape[-1]
    xb = x_ref[0].astype(MXU_DTYPE)                       # cast once, not per tap
    acc = _conv3x3(_zero_pad1_hw(xb), w_ref[...], H, W)   # (H*W, P) f32
    c1_ref[...] = acc.reshape(1, H, W, P).astype(c1_ref.dtype)
    st_ref[...] = _partial_stats(acc).reshape(1, 2, P)


def conv2_stats_kernel(c1_ref, sc1_ref, sh1_ref, w_ref, c2_ref, st_ref):
    """Pass 2 (per image): h1 = relu(c1*scale1+shift1); c2 = conv2(h1); bn2 partial stats."""
    _, H, W, P = c1_ref.shape
    c1 = c1_ref[0].astype(jnp.float32)                               # (H, W, P)
    h1 = jnp.maximum(c1 * sc1_ref[...] + sh1_ref[...], 0.0)          # folded bn1 + relu, f32
    acc = _conv3x3(_zero_pad1_hw(h1.astype(MXU_DTYPE)), w_ref[...], H, W)
    c2_ref[...] = acc.reshape(1, H, W, P).astype(c2_ref.dtype)
    st_ref[...] = _partial_stats(acc).reshape(1, 2, P)


def finalize_kernel(c2_ref, x_ref, sc2_ref, sh2_ref, o_ref):
    """Pass 3 (per image, lane-dense): out = relu(c2*scale2 + shift2 + x)."""
    y = c2_ref[...].astype(jnp.float32) * sc2_ref[...] + sh2_ref[...] + x_ref[...]
    o_ref[...] = jnp.maximum(y, 0.0).astype(o_ref.dtype)


# --------------------------------------------------------------------------------------------
# Host-side glue (tiny P-sized vector math between kernel passes)
# --------------------------------------------------------------------------------------------
def _fold_bn(gamma, beta, partial_stats, count):
    """Fold training-mode BN (batch stats, biased var) + affine into y = x*scale + shift."""
    s = jnp.sum(partial_stats[:, 0, :], axis=0)
    q = jnp.sum(partial_stats[:, 1, :], axis=0)
    mean = s / count
    var = q / count - mean * mean          # biased variance (PyTorch training-mode BN)
    # TODO(synk): at real batch*spatial counts use a mean-shifted / two-pass variance to avoid
    #             catastrophic cancellation in E[x^2] - E[x]^2.
    scale = gamma.astype(jnp.float32) * jax.lax.rsqrt(var + EPS)
    shift = beta.astype(jnp.float32) - mean * scale
    return scale, shift


def basic_block_forward(x_nchw, w1, w2, g1, b1, g2, b2):
    """x_nchw: (N, C, H, W) f32.  w1: (P, C, 3, 3), w2: (P, P, 3, 3) PyTorch OIHW.
    g*/b*: (P,) BatchNorm affine params.  Returns (N, P, H, W) f32."""
    N, C, H, W = x_nchw.shape
    P = w1.shape[0]
    assert C == P, "BasicBlock with downsample=None requires inplanes == planes"
    count = float(N * H * W)

    x_nhwc = jnp.transpose(x_nchw, (0, 2, 3, 1)).astype(jnp.float32)

    # OIHW -> (tap = dy*3+dx, Cin, Cout), prepacked in bf16 for the MXU.
    w1b = jnp.transpose(w1, (2, 3, 1, 0)).reshape(9, C, P).astype(MXU_DTYPE)
    w2b = jnp.transpose(w2, (2, 3, 1, 0)).reshape(9, P, P).astype(MXU_DTYPE)

    params = pltpu.CompilerParams(dimension_semantics=("parallel",),
                                  vmem_limit_bytes=VMEM_LIMIT)

    # ---- pass 1: conv1 + per-image bn1 statistics ---------------------------------------------
    c1, st1 = pl.pallas_call(
        conv1_stats_kernel,
        out_shape=(jax.ShapeDtypeStruct((N, H, W, P), ACT_DTYPE),
                   jax.ShapeDtypeStruct((N, 2, P), jnp.float32)),
        grid=(N,),
        in_specs=[pl.BlockSpec((1, H, W, C), lambda i: (i, 0, 0, 0)),
                  pl.BlockSpec((9, C, P), lambda i: (0, 0, 0))],      # VMEM-resident weights
        out_specs=(pl.BlockSpec((1, H, W, P), lambda i: (i, 0, 0, 0)),
                   pl.BlockSpec((1, 2, P), lambda i: (i, 0, 0))),
        compiler_params=params,
    )(x_nhwc, w1b)

    scale1, shift1 = _fold_bn(g1, b1, st1, count)

    # ---- pass 2: bn1 + relu + conv2 + per-image bn2 statistics --------------------------------
    c2, st2 = pl.pallas_call(
        conv2_stats_kernel,
        out_shape=(jax.ShapeDtypeStruct((N, H, W, P), ACT_DTYPE),
                   jax.ShapeDtypeStruct((N, 2, P), jnp.float32)),
        grid=(N,),
        in_specs=[pl.BlockSpec((1, H, W, P), lambda i: (i, 0, 0, 0)),
                  pl.BlockSpec((1, P), lambda i: (0, 0)),
                  pl.BlockSpec((1, P), lambda i: (0, 0)),
                  pl.BlockSpec((9, P, P), lambda i: (0, 0, 0))],
        out_specs=(pl.BlockSpec((1, H, W, P), lambda i: (i, 0, 0, 0)),
                   pl.BlockSpec((1, 2, P), lambda i: (i, 0, 0))),
        compiler_params=params,
    )(c1, scale1.reshape(1, P), shift1.reshape(1, P), w2b)

    scale2, shift2 = _fold_bn(g2, b2, st2, count)

    # ---- pass 3: bn2 + residual + relu; lane-dense layout chosen STATICALLY at trace time -----
    per_img = H * W * P
    if per_img % 128 == 0 and 128 % P == 0:
        rows, cols = per_img // 128, 128                  # full-lane unmasked vld/vst
        sc2 = jnp.tile(scale2, 128 // P).reshape(1, cols)  # lane l <-> channel l % P
        sh2 = jnp.tile(shift2, 128 // P).reshape(1, cols)
    else:
        rows, cols = H * W, P                             # natural (pixels, channels) fallback
        sc2 = scale2.reshape(1, P)
        sh2 = shift2.reshape(1, P)

    out_flat = pl.pallas_call(
        finalize_kernel,
        out_shape=jax.ShapeDtypeStruct((N, rows, cols), jnp.float32),
        grid=(N,),
        in_specs=[pl.BlockSpec((1, rows, cols), lambda i: (i, 0, 0)),
                  pl.BlockSpec((1, rows, cols), lambda i: (i, 0, 0)),
                  pl.BlockSpec((1, cols), lambda i: (0, 0)),
                  pl.BlockSpec((1, cols), lambda i: (0, 0))],
        out_specs=pl.BlockSpec((1, rows, cols), lambda i: (i, 0, 0)),
        compiler_params=params,
    )(c2.reshape(N, rows, cols), x_nhwc.reshape(N, rows, cols), sc2, sh2)

    out_nhwc = out_flat.reshape(N, H, W, P)
    return jnp.transpose(out_nhwc, (0, 3, 1, 2))


# --------------------------------------------------------------------------------------------
# Pure-JAX reference (PyTorch BasicBlock, training-mode BN) and self-check
# --------------------------------------------------------------------------------------------
def _reference(x, w1, w2, g1, b1, g2, b2):
    def conv(x, w):
        return jax.lax.conv_general_dilated(
            x, w, window_strides=(1, 1), padding=((1, 1), (1, 1)),
            dimension_numbers=('NCHW', 'OIHW', 'NCHW'))

    def bn(x, g, b):
        m = jnp.mean(x, axis=(0, 2, 3), keepdims=True)
        v = jnp.mean((x - m) ** 2, axis=(0, 2, 3), keepdims=True)
        return (x - m) / jnp.sqrt(v + EPS) * g.reshape(1, -1, 1, 1) + b.reshape(1, -1, 1, 1)

    h = jnp.maximum(bn(conv(x, w1), g1, b1), 0.0)
    h = bn(conv(h, w2), g2, b2)
    return jnp.maximum(h + x, 0.0)


if __name__ == "__main__":
    N, C, H, W = 2, 4, 16, 16   # inplanes == planes == 4 (downsample=None)
    P = 4

    key = jax.random.PRNGKey(0)
    ks = jax.random.split(key, 7)
    x = jax.random.normal(ks[0], (N, C, H, W), jnp.float32)
    w1 = jax.random.normal(ks[1], (P, C, 3, 3), jnp.float32) * 0.1
    w2 = jax.random.normal(ks[2], (P, P, 3, 3), jnp.float32) * 0.1
    g1 = 1.0 + 0.1 * jax.random.normal(ks[3], (P,), jnp.float32)
    b1 = 0.1 * jax.random.normal(ks[4], (P,), jnp.float32)
    g2 = 1.0 + 0.1 * jax.random.normal(ks[5], (P,), jnp.float32)
    b2 = 0.1 * jax.random.normal(ks[6], (P,), jnp.float32)

    fwd = jax.jit(basic_block_forward)   # wrapper is now cleanly jittable (no runtime probes)
    y = fwd(x, w1, w2, g1, b1, g2, b2)
    jax.block_until_ready(y)

    y_ref = _reference(x, w1, w2, g1, b1, g2, b2)
    max_err = float(jnp.max(jnp.abs(y - y_ref)))
    # bf16 MXU operands + bf16 c1/c2 intermediates bound the error far below this tolerance;
    # a functionally wrong kernel would be off by O(1).
    assert jnp.allclose(y, y_ref, atol=2e-2, rtol=2e-2), f"max_err={max_err}"
    print("KERNEL_OK")
</pallas_src>

<mosaic_0001>
module attributes {stable_mosaic.version = 11 : i64} {
  func.func @conv1_stats_kernel(%arg0: i32, %arg1: memref<1x16x16x4xf32, #tpu.memory_space<vmem>>, %arg2: memref<9x4x4xbf16, #tpu.memory_space<vmem>>, %arg3: memref<1x16x16x4xbf16, #tpu.memory_space<vmem>>, %arg4: memref<1x2x4xf32, #tpu.memory_space<vmem>>) attributes {dimension_semantics = [#tpu.dimension_semantics<parallel>], iteration_bounds = array<i64: 2>, scalar_prefetch = 0 : i64, scratch_operands = 0 : i64, tpu.core_type = #tpu.core_type<tc>, window_params = [{transform_indices = @transform_0, window_bounds = array<i64: 1, 16, 16, 4>}, {pipeline_mode = #tpu.pipeline_mode<synchronous>, transform_indices = @transform_1, window_bounds = array<i64: 9, 4, 4>}, {transform_indices = @transform_2, window_bounds = array<i64: 1, 16, 16, 4>}, {transform_indices = @transform_3, window_bounds = array<i64: 1, 2, 4>}]} {
    %c0 = arith.constant 0 : index
    %c0_0 = arith.constant 0 : index
    %c0_1 = arith.constant 0 : index
    %c0_2 = arith.constant 0 : index
    %0 = vector.load %arg1[%c0, %c0_0, %c0_1, %c0_2] : memref<1x16x16x4xf32, #tpu.memory_space<vmem>>, vector<1x16x16x4xf32>
    %1 = vector.shape_cast %0 : vector<1x16x16x4xf32> to vector<16x16x4xf32>
    %2 = arith.truncf %1 : vector<16x16x4xf32> to vector<16x16x4xbf16>
    %cst = arith.constant 0.000000e+00 : bf16
    %3 = vector.broadcast %cst : bf16 to vector<16x1x4xbf16>
    %4 = tpu.concatenate %3, %2, %3 in 1 : vector<16x1x4xbf16>, vector<16x16x4xbf16>, vector<16x1x4xbf16> -> vector<16x18x4xbf16>
    %cst_3 = arith.constant 0.000000e+00 : bf16
    %5 = vector.broadcast %cst_3 : bf16 to vector<1x18x4xbf16>
    %6 = tpu.concatenate %5, %4, %5 in 0 : vector<1x18x4xbf16>, vector<16x18x4xbf16>, vector<1x18x4xbf16> -> vector<18x18x4xbf16>
    %c0_4 = arith.constant 0 : index
    %c0_5 = arith.constant 0 : index
    %c0_6 = arith.constant 0 : index
    %7 = vector.load %arg2[%c0_4, %c0_5, %c0_6] : memref<9x4x4xbf16, #tpu.memory_space<vmem>>, vector<9x4x4xbf16>
    %cst_7 = arith.constant 0.000000e+00 : f32
    %8 = vector.broadcast %cst_7 : f32 to vector<256x4xf32>
    %9 = vector.extract_strided_slice %6 {offsets = [0, 0, 0], sizes = [16, 16, 4], strides = [1, 1, 1]} : vector<18x18x4xbf16> to vector<16x16x4xbf16>
    %10 = vector.shape_cast %9 : vector<16x16x4xbf16> to vector<256x4xbf16>
    %11 = vector.extract_strided_slice %7 {offsets = [0, 0, 0], sizes = [1, 4, 4], strides = [1, 1, 1]} : vector<9x4x4xbf16> to vector<1x4x4xbf16>
    %12 = vector.shape_cast %11 : vector<1x4x4xbf16> to vector<4x4xbf16>
    %cst_8 = arith.constant dense<0.000000e+00> : vector<256x4xf32>
    %13 = tpu.matmul %10, %12, %cst_8 {dimension_numbers = #tpu.dot_dimension_numbers<[1], [0], [0], [1], [0, 0, 1, 1], [], []>} : vector<256x4xbf16>, vector<4x4xbf16>, vector<256x4xf32> -> vector<256x4xf32>
    %14 = arith.addf %8, %13 : vector<256x4xf32>
    %15 = vector.extract_strided_slice %6 {offsets = [0, 1, 0], sizes = [16, 16, 4], strides = [1, 1, 1]} : vector<18x18x4xbf16> to vector<16x16x4xbf16>
    %16 = vector.shape_cast %15 : vector<16x16x4xbf16> to vector<256x4xbf16>
    %17 = vector.extract_strided_slice %7 {offsets = [1, 0, 0], sizes = [1, 4, 4], strides = [1, 1, 1]} : vector<9x4x4xbf16> to vector<1x4x4xbf16>
    %18 = vector.shape_cast %17 : vector<1x4x4xbf16> to vector<4x4xbf16>
    %cst_9 = arith.constant dense<0.000000e+00> : vector<256x4xf32>
    %19 = tpu.matmul %16, %18, %cst_9 {dimension_numbers = #tpu.dot_dimension_numbers<[1], [0], [0], [1], [0, 0, 1, 1], [], []>} : vector<256x4xbf16>, vector<4x4xbf16>, vector<256x4xf32> -> vector<256x4xf32>
    %20 = arith.addf %14, %19 : vector<256x4xf32>
    %21 = vector.extract_strided_slice %6 {offsets = [0, 2, 0], sizes = [16, 16, 4], strides = [1, 1, 1]} : vector<18x18x4xbf16> to vector<16x16x4xbf16>
    %22 = vector.shape_cast %21 : vector<16x16x4xbf16> to vector<256x4xbf16>
    %23 = vector.extract_strided_slice %7 {offsets = [2, 0, 0], sizes = [1, 4, 4], strides = [1, 1, 1]} : vector<9x4x4xbf16> to vector<1x4x4xbf16>
    %24 = vector.shape_cast %23 : vector<1x4x4xbf16> to vector<4x4xbf16>
    %cst_10 = arith.constant dense<0.000000e+00> : vector<256x4xf32>
    %25 = tpu.matmul %22, %24, %cst_10 {dimension_numbers = #tpu.dot_dimension_numbers<[1], [0], [0], [1], [0, 0, 1, 1], [], []>} : vector<256x4xbf16>, vector<4x4xbf16>, vector<256x4xf32> -> vector<256x4xf32>
    %26 = arith.addf %20, %25 : vector<256x4xf32>
    %27 = vector.extract_strided_slice %6 {offsets = [1, 0, 0], sizes = [16, 16, 4], strides = [1, 1, 1]} : vector<18x18x4xbf16> to vector<16x16x4xbf16>
    %28 = vector.shape_cast %27 : vector<16x16x4xbf16> to vector<256x4xbf16>
    %29 = vector.extract_strided_slice %7 {offsets = [3, 0, 0], sizes = [1, 4, 4], strides = [1, 1, 1]} : vector<9x4x4xbf16> to vector<1x4x4xbf16>
    %30 = vector.shape_cast %29 : vector<1x4x4xbf16> to vector<4x4xbf16>
    %cst_11 = arith.constant dense<0.000000e+00> : vector<256x4xf32>
    %31 = tpu.matmul %28, %30, %cst_11 {dimension_numbers = #tpu.dot_dimension_numbers<[1], [0], [0], [1], [0, 0, 1, 1], [], []>} : vector<256x4xbf16>, vector<4x4xbf16>, vector<256x4xf32> -> vector<256x4xf32>
    %32 = arith.addf %26, %31 : vector<256x4xf32>
    %33 = vector.extract_strided_slice %6 {offsets = [1, 1, 0], sizes = [16, 16, 4], strides = [1, 1, 1]} : vector<18x18x4xbf16> to vector<16x16x4xbf16>
    %34 = vector.shape_cast %33 : vector<16x16x4xbf16> to vector<256x4xbf16>
    %35 = vector.extract_strided_slice %7 {offsets = [4, 0, 0], sizes = [1, 4, 4], strides = [1, 1, 1]} : vector<9x4x4xbf16> to vector<1x4x4xbf16>
    %36 = vector.shape_cast %35 : vector<1x4x4xbf16> to vector<4x4xbf16>
    %cst_12 = arith.constant dense<0.000000e+00> : vector<256x4xf32>
    %37 = tpu.matmul %34, %36, %cst_12 {dimension_numbers = #tpu.dot_dimension_numbers<[1], [0], [0], [1], [0, 0, 1, 1], [], []>} : vector<256x4xbf16>, vector<4x4xbf16>, vector<256x4xf32> -> vector<256x4xf32>
    %38 = arith.addf %32, %37 : vector<256x4xf32>
    %39 = vector.extract_strided_slice %6 {offsets = [1, 2, 0], sizes = [16, 16, 4], strides = [1, 1, 1]} : vector<18x18x4xbf16> to vector<16x16x4xbf16>
    %40 = vector.shape_cast %39 : vector<16x16x4xbf16> to vector<256x4xbf16>
    %41 = vector.extract_strided_slice %7 {offsets = [5, 0, 0], sizes = [1, 4, 4], strides = [1, 1, 1]} : vector<9x4x4xbf16> to vector<1x4x4xbf16>
    %42 = vector.shape_cast %41 : vector<1x4x4xbf16> to vector<4x4xbf16>
    %cst_13 = arith.constant dense<0.000000e+00> : vector<256x4xf32>
    %43 = tpu.matmul %40, %42, %cst_13 {dimension_numbers = #tpu.dot_dimension_numbers<[1], [0], [0], [1], [0, 0, 1, 1], [], []>} : vector<256x4xbf16>, vector<4x4xbf16>, vector<256x4xf32> -> vector<256x4xf32>
    %44 = arith.addf %38, %43 : vector<256x4xf32>
    %45 = vector.extract_strided_slice %6 {offsets = [2, 0, 0], sizes = [16, 16, 4], strides = [1, 1, 1]} : vector<18x18x4xbf16> to vector<16x16x4xbf16>
    %46 = vector.shape_cast %45 : vector<16x16x4xbf16> to vector<256x4xbf16>
    %47 = vector.extract_strided_slice %7 {offsets = [6, 0, 0], sizes = [1, 4, 4], strides = [1, 1, 1]} : vector<9x4x4xbf16> to vector<1x4x4xbf16>
    %48 = vector.shape_cast %47 : vector<1x4x4xbf16> to vector<4x4xbf16>
    %cst_14 = arith.constant dense<0.000000e+00> : vector<256x4xf32>
    %49 = tpu.matmul %46, %48, %cst_14 {dimension_numbers = #tpu.dot_dimension_numbers<[1], [0], [0], [1], [0, 0, 1, 1], [], []>} : vector<256x4xbf16>, vector<4x4xbf16>, vector<256x4xf32> -> vector<256x4xf32>
    %50 = arith.addf %44, %49 : vector<256x4xf32>
    %51 = vector.extract_strided_slice %6 {offsets = [2, 1, 0], sizes = [16, 16, 4], strides = [1, 1, 1]} : vector<18x18x4xbf16> to vector<16x16x4xbf16>
    %52 = vector.shape_cast %51 : vector<16x16x4xbf16> to vector<256x4xbf16>
    %53 = vector.extract_strided_slice %7 {offsets = [7, 0, 0], sizes = [1, 4, 4], strides = [1, 1, 1]} : vector<9x4x4xbf16> to vector<1x4x4xbf16>
    %54 = vector.shape_cast %53 : vector<1x4x4xbf16> to vector<4x4xbf16>
    %cst_15 = arith.constant dense<0.000000e+00> : vector<256x4xf32>
    %55 = tpu.matmul %52, %54, %cst_15 {dimension_numbers = #tpu.dot_dimension_numbers<[1], [0], [0], [1], [0, 0, 1, 1], [], []>} : vector<256x4xbf16>, vector<4x4xbf16>, vector<256x4xf32> -> vector<256x4xf32>
    %56 = arith.addf %50, %55 : vector<256x4xf32>
    %57 = vector.extract_strided_slice %6 {offsets = [2, 2, 0], sizes = [16, 16, 4], strides = [1, 1, 1]} : vector<18x18x4xbf16> to vector<16x16x4xbf16>
    %58 = vector.shape_cast %57 : vector<16x16x4xbf16> to vector<256x4xbf16>
    %59 = vector.extract_strided_slice %7 {offsets = [8, 0, 0], sizes = [1, 4, 4], strides = [1, 1, 1]} : vector<9x4x4xbf16> to vector<1x4x4xbf16>
    %60 = vector.shape_cast %59 : vector<1x4x4xbf16> to vector<4x4xbf16>
    %cst_16 = arith.constant dense<0.000000e+00> : vector<256x4xf32>
    %61 = tpu.matmul %58, %60, %cst_16 {dimension_numbers = #tpu.dot_dimension_numbers<[1], [0], [0], [1], [0, 0, 1, 1], [], []>} : vector<256x4xbf16>, vector<4x4xbf16>, vector<256x4xf32> -> vector<256x4xf32>
    %62 = arith.addf %56, %61 : vector<256x4xf32>
    %63 = vector.shape_cast %62 : vector<256x4xf32> to vector<1x16x16x4xf32>
    %64 = arith.truncf %63 : vector<1x16x16x4xf32> to vector<1x16x16x4xbf16>
    %c0_17 = arith.constant 0 : index
    %c0_18 = arith.constant 0 : index
    %c0_19 = arith.constant 0 : index
    %c0_20 = arith.constant 0 : index
    %65 = vector.load %arg3[%c0_17, %c0_18, %c0_19, %c0_20] : memref<1x16x16x4xbf16, #tpu.memory_space<vmem>>, vector<1x16x16x4xbf16>
    tpu.vector_store %arg3[%c0_17, %c0_18, %c0_19, %c0_20], %64 {strides = array<i32>} : memref<1x16x16x4xbf16, #tpu.memory_space<vmem>>, vector<1x16x16x4xbf16>,
    %cst_21 = arith.constant dense<0.000000e+00> : vector<4xf32>
    %66 = vector.multi_reduction <add>, %62, %cst_21 [0] : vector<256x4xf32> to vector<4xf32>
    %67 = vector.shape_cast %66 : vector<4xf32> to vector<1x4xf32>
    %68 = arith.mulf %62, %62 : vector<256x4xf32>
    %cst_22 = arith.constant dense<0.000000e+00> : vector<4xf32>
    %69 = vector.multi_reduction <add>, %68, %cst_22 [0] : vector<256x4xf32> to vector<4xf32>
    %70 = vector.shape_cast %69 : vector<4xf32> to vector<1x4xf32>
    %71 = tpu.concatenate %67, %70 in 0 : vector<1x4xf32>, vector<1x4xf32> -> vector<2x4xf32>
    %72 = vector.shape_cast %71 : vector<2x4xf32> to vector<1x2x4xf32>
    %c0_23 = arith.constant 0 : index
    %c0_24 = arith.constant 0 : index
    %c0_25 = arith.constant 0 : index
    %73 = vector.load %arg4[%c0_23, %c0_24, %c0_25] : memref<1x2x4xf32, #tpu.memory_space<vmem>>, vector<1x2x4xf32>
    tpu.vector_store %arg4[%c0_23, %c0_24, %c0_25], %72 {strides = array<i32>} : memref<1x2x4xf32, #tpu.memory_space<vmem>>, vector<1x2x4xf32>,
    return
  }
  func.func @transform_0(%arg0: i32) -> (i32, i32, i32, i32) {
    %c0_i32 = arith.constant 0 : i32
    %c0_i32_0 = arith.constant 0 : i32
    %c0_i32_1 = arith.constant 0 : i32
    %c0_i32_2 = arith.constant 0 : i32
    return %arg0, %c0_i32, %c0_i32_0, %c0_i32_1 : i32, i32, i32, i32
  }
  func.func @transform_1(%arg0: i32) -> (i32, i32, i32) {
    %c0_i32 = arith.constant 0 : i32
    %c0_i32_0 = arith.constant 0 : i32
    %c0_i32_1 = arith.constant 0 : i32
    %c0_i32_2 = arith.constant 0 : i32
    return %c0_i32, %c0_i32_0, %c0_i32_1 : i32, i32, i32
  }
  func.func @transform_2(%arg0: i32) -> (i32, i32, i32, i32) {
    %c0_i32 = arith.constant 0 : i32
    %c0_i32_0 = arith.constant 0 : i32
    %c0_i32_1 = arith.constant 0 : i32
    %c0_i32_2 = arith.constant 0 : i32
    return %arg0, %c0_i32, %c0_i32_0, %c0_i32_1 : i32, i32, i32, i32
  }
  func.func @transform_3(%arg0: i32) -> (i32, i32, i32) {
    %c0_i32 = arith.constant 0 : i32
    %c0_i32_0 = arith.constant 0 : i32
    %c0_i32_1 = arith.constant 0 : i32
    return %arg0, %c0_i32, %c0_i32_0 : i32, i32, i32
  }
}

module attributes {stable_mosaic.version = 11 : i64} {
  func.func @conv2_stats_kernel(%arg0: i32, %arg1: memref<1x16x16x4xbf16, #tpu.memory_space<vmem>>, %arg2: memref<1x4xf32, #tpu.memory_space<vmem>>, %arg3: memref<1x4xf32, #tpu.memory_space<vmem>>, %arg4: memref<9x4x4xbf16, #tpu.memory_space<vmem>>, %arg5: memref<1x16x16x4xbf16, #tpu.memory_space<vmem>>, %arg6: memref<1x2x4xf32, #tpu.memory_space<vmem>>) attributes {dimension_semantics = [#tpu.dimension_semantics<parallel>], iteration_bounds = array<i64: 2>, scalar_prefetch = 0 : i64, scratch_operands = 0 : i64, tpu.core_type = #tpu.core_type<tc>, window_params = [{transform_indices = @transform_0, window_bounds = array<i64: 1, 16, 16, 4>}, {pipeline_mode = #tpu.pipeline_mode<synchronous>, transform_indices = @transform_1, window_bounds = array<i64: 1, 4>}, {pipeline_mode = #tpu.pipeline_mode<synchronous>, transform_indices = @transform_2, window_bounds = array<i64: 1, 4>}, {pipeline_mode = #tpu.pipeline_mode<synchronous>, transform_indices = @transform_3, window_bounds = array<i64: 9, 4, 4>}, {transform_indices = @transform_4, window_bounds = array<i64: 1, 16, 16, 4>}, {transform_indices = @transform_5, window_bounds = array<i64: 1, 2, 4>}]} {
    %c0 = arith.constant 0 : index
    %c0_0 = arith.constant 0 : index
    %c0_1 = arith.constant 0 : index
    %c0_2 = arith.constant 0 : index
    %0 = vector.load %arg1[%c0, %c0_0, %c0_1, %c0_2] : memref<1x16x16x4xbf16, #tpu.memory_space<vmem>>, vector<1x16x16x4xbf16>
    %1 = vector.shape_cast %0 : vector<1x16x16x4xbf16> to vector<16x16x4xbf16>
    %2 = arith.extf %1 : vector<16x16x4xbf16> to vector<16x16x4xf32>
    %c0_3 = arith.constant 0 : index
    %c0_4 = arith.constant 0 : index
    %3 = vector.load %arg2[%c0_3, %c0_4] : memref<1x4xf32, #tpu.memory_space<vmem>>, vector<1x4xf32>
    %4 = vector.shape_cast %3 : vector<1x4xf32> to vector<1x1x4xf32>
    %5 = vector.broadcast %4 : vector<1x1x4xf32> to vector<16x16x4xf32>
    %6 = arith.mulf %2, %5 : vector<16x16x4xf32>
    %c0_5 = arith.constant 0 : index
    %c0_6 = arith.constant 0 : index
    %7 = vector.load %arg3[%c0_5, %c0_6] : memref<1x4xf32, #tpu.memory_space<vmem>>, vector<1x4xf32>
    %8 = vector.shape_cast %7 : vector<1x4xf32> to vector<1x1x4xf32>
    %9 = vector.broadcast %8 : vector<1x1x4xf32> to vector<16x16x4xf32>
    %10 = arith.addf %6, %9 : vector<16x16x4xf32>
    %cst = arith.constant 0.000000e+00 : f32
    %11 = vector.broadcast %cst : f32 to vector<16x16x4xf32>
    %12 = arith.maximumf %10, %11 : vector<16x16x4xf32>
    %13 = arith.truncf %12 : vector<16x16x4xf32> to vector<16x16x4xbf16>
    %cst_7 = arith.constant 0.000000e+00 : bf16
    %14 = vector.broadcast %cst_7 : bf16 to vector<16x1x4xbf16>
    %15 = tpu.concatenate %14, %13, %14 in 1 : vector<16x1x4xbf16>, vector<16x16x4xbf16>, vector<16x1x4xbf16> -> vector<16x18x4xbf16>
    %cst_8 = arith.constant 0.000000e+00 : bf16
    %16 = vector.broadcast %cst_8 : bf16 to vector<1x18x4xbf16>
    %17 = tpu.concatenate %16, %15, %16 in 0 : vector<1x18x4xbf16>, vector<16x18x4xbf16>, vector<1x18x4xbf16> -> vector<18x18x4xbf16>
    %c0_9 = arith.constant 0 : index
    %c0_10 = arith.constant 0 : index
    %c0_11 = arith.constant 0 : index
    %18 = vector.load %arg4[%c0_9, %c0_10, %c0_11] : memref<9x4x4xbf16, #tpu.memory_space<vmem>>, vector<9x4x4xbf16>
    %cst_12 = arith.constant 0.000000e+00 : f32
    %19 = vector.broadcast %cst_12 : f32 to vector<256x4xf32>
    %20 = vector.extract_strided_slice %17 {offsets = [0, 0, 0], sizes = [16, 16, 4], strides = [1, 1, 1]} : vector<18x18x4xbf16> to vector<16x16x4xbf16>
    %21 = vector.shape_cast %20 : vector<16x16x4xbf16> to vector<256x4xbf16>
    %22 = vector.extract_strided_slice %18 {offsets = [0, 0, 0], sizes = [1, 4, 4], strides = [1, 1, 1]} : vector<9x4x4xbf16> to vector<1x4x4xbf16>
    %23 = vector.shape_cast %22 : vector<1x4x4xbf16> to vector<4x4xbf16>
    %cst_13 = arith.constant dense<0.000000e+00> : vector<256x4xf32>
    %24 = tpu.matmul %21, %23, %cst_13 {dimension_numbers = #tpu.dot_dimension_numbers<[1], [0], [0], [1], [0, 0, 1, 1], [], []>} : vector<256x4xbf16>, vector<4x4xbf16>, vector<256x4xf32> -> vector<256x4xf32>
    %25 = arith.addf %19, %24 : vector<256x4xf32>
    %26 = vector.extract_strided_slice %17 {offsets = [0, 1, 0], sizes = [16, 16, 4], strides = [1, 1, 1]} : vector<18x18x4xbf16> to vector<16x16x4xbf16>
    %27 = vector.shape_cast %26 : vector<16x16x4xbf16> to vector<256x4xbf16>
    %28 = vector.extract_strided_slice %18 {offsets = [1, 0, 0], sizes = [1, 4, 4], strides = [1, 1, 1]} : vector<9x4x4xbf16> to vector<1x4x4xbf16>
    %29 = vector.shape_cast %28 : vector<1x4x4xbf16> to vector<4x4xbf16>
    %cst_14 = arith.constant dense<0.000000e+00> : vector<256x4xf32>
    %30 = tpu.matmul %27, %29, %cst_14 {dimension_numbers = #tpu.dot_dimension_numbers<[1], [0], [0], [1], [0, 0, 1, 1], [], []>} : vector<256x4xbf16>, vector<4x4xbf16>, vector<256x4xf32> -> vector<256x4xf32>
    %31 = arith.addf %25, %30 : vector<256x4xf32>
    %32 = vector.extract_strided_slice %17 {offsets = [0, 2, 0], sizes = [16, 16, 4], strides = [1, 1, 1]} : vector<18x18x4xbf16> to vector<16x16x4xbf16>
    %33 = vector.shape_cast %32 : vector<16x16x4xbf16> to vector<256x4xbf16>
    %34 = vector.extract_strided_slice %18 {offsets = [2, 0, 0], sizes = [1, 4, 4], strides = [1, 1, 1]} : vector<9x4x4xbf16> to vector<1x4x4xbf16>
    %35 = vector.shape_cast %34 : vector<1x4x4xbf16> to vector<4x4xbf16>
    %cst_15 = arith.constant dense<0.000000e+00> : vector<256x4xf32>
    %36 = tpu.matmul %33, %35, %cst_15 {dimension_numbers = #tpu.dot_dimension_numbers<[1], [0], [0], [1], [0, 0, 1, 1], [], []>} : vector<256x4xbf16>, vector<4x4xbf16>, vector<256x4xf32> -> vector<256x4xf32>
    %37 = arith.addf %31, %36 : vector<256x4xf32>
    %38 = vector.extract_strided_slice %17 {offsets = [1, 0, 0], sizes = [16, 16, 4], strides = [1, 1, 1]} : vector<18x18x4xbf16> to vector<16x16x4xbf16>
    %39 = vector.shape_cast %38 : vector<16x16x4xbf16> to vector<256x4xbf16>
    %40 = vector.extract_strided_slice %18 {offsets = [3, 0, 0], sizes = [1, 4, 4], strides = [1, 1, 1]} : vector<9x4x4xbf16> to vector<1x4x4xbf16>
    %41 = vector.shape_cast %40 : vector<1x4x4xbf16> to vector<4x4xbf16>
    %cst_16 = arith.constant dense<0.000000e+00> : vector<256x4xf32>
    %42 = tpu.matmul %39, %41, %cst_16 {dimension_numbers = #tpu.dot_dimension_numbers<[1], [0], [0], [1], [0, 0, 1, 1], [], []>} : vector<256x4xbf16>, vector<4x4xbf16>, vector<256x4xf32> -> vector<256x4xf32>
    %43 = arith.addf %37, %42 : vector<256x4xf32>
    %44 = vector.extract_strided_slice %17 {offsets = [1, 1, 0], sizes = [16, 16, 4], strides = [1, 1, 1]} : vector<18x18x4xbf16> to vector<16x16x4xbf16>
    %45 = vector.shape_cast %44 : vector<16x16x4xbf16> to vector<256x4xbf16>
    %46 = vector.extract_strided_slice %18 {offsets = [4, 0, 0], sizes = [1, 4, 4], strides = [1, 1, 1]} : vector<9x4x4xbf16> to vector<1x4x4xbf16>
    %47 = vector.shape_cast %46 : vector<1x4x4xbf16> to vector<4x4xbf16>
    %cst_17 = arith.constant dense<0.000000e+00> : vector<256x4xf32>
    %48 = tpu.matmul %45, %47, %cst_17 {dimension_numbers = #tpu.dot_dimension_numbers<[1], [0], [0], [1], [0, 0, 1, 1], [], []>} : vector<256x4xbf16>, vector<4x4xbf16>, vector<256x4xf32> -> vector<256x4xf32>
    %49 = arith.addf %43, %48 : vector<256x4xf32>
    %50 = vector.extract_strided_slice %17 {offsets = [1, 2, 0], sizes = [16, 16, 4], strides = [1, 1, 1]} : vector<18x18x4xbf16> to vector<16x16x4xbf16>
    %51 = vector.shape_cast %50 : vector<16x16x4xbf16> to vector<256x4xbf16>
    %52 = vector.extract_strided_slice %18 {offsets = [5, 0, 0], sizes = [1, 4, 4], strides = [1, 1, 1]} : vector<9x4x4xbf16> to vector<1x4x4xbf16>
    %53 = vector.shape_cast %52 : vector<1x4x4xbf16> to vector<4x4xbf16>
    %cst_18 = arith.constant dense<0.000000e+00> : vector<256x4xf32>
    %54 = tpu.matmul %51, %53, %cst_18 {dimension_numbers = #tpu.dot_dimension_numbers<[1], [0], [0], [1], [0, 0, 1, 1], [], []>} : vector<256x4xbf16>, vector<4x4xbf16>, vector<256x4xf32> -> vector<256x4xf32>
    %55 = arith.addf %49, %54 : vector<256x4xf32>
    %56 = vector.extract_strided_slice %17 {offsets = [2, 0, 0], sizes = [16, 16, 4], strides = [1, 1, 1]} : vector<18x18x4xbf16> to vector<16x16x4xbf16>
    %57 = vector.shape_cast %56 : vector<16x16x4xbf16> to vector<256x4xbf16>
    %58 = vector.extract_strided_slice %18 {offsets = [6, 0, 0], sizes = [1, 4, 4], strides = [1, 1, 1]} : vector<9x4x4xbf16> to vector<1x4x4xbf16>
    %59 = vector.shape_cast %58 : vector<1x4x4xbf16> to vector<4x4xbf16>
    %cst_19 = arith.constant dense<0.000000e+00> : vector<256x4xf32>
    %60 = tpu.matmul %57, %59, %cst_19 {dimension_numbers = #tpu.dot_dimension_numbers<[1], [0], [0], [1], [0, 0, 1, 1], [], []>} : vector<256x4xbf16>, vector<4x4xbf16>, vector<256x4xf32> -> vector<256x4xf32>
    %61 = arith.addf %55, %60 : vector<256x4xf32>
    %62 = vector.extract_strided_slice %17 {offsets = [2, 1, 0], sizes = [16, 16, 4], strides = [1, 1, 1]} : vector<18x18x4xbf16> to vector<16x16x4xbf16>
    %63 = vector.shape_cast %62 : vector<16x16x4xbf16> to vector<256x4xbf16>
    %64 = vector.extract_strided_slice %18 {offsets = [7, 0, 0], sizes = [1, 4, 4], strides = [1, 1, 1]} : vector<9x4x4xbf16> to vector<1x4x4xbf16>
    %65 = vector.shape_cast %64 : vector<1x4x4xbf16> to vector<4x4xbf16>
    %cst_20 = arith.constant dense<0.000000e+00> : vector<256x4xf32>
    %66 = tpu.matmul %63, %65, %cst_20 {dimension_numbers = #tpu.dot_dimension_numbers<[1], [0], [0], [1], [0, 0, 1, 1], [], []>} : vector<256x4xbf16>, vector<4x4xbf16>, vector<256x4xf32> -> vector<256x4xf32>
    %67 = arith.addf %61, %66 : vector<256x4xf32>
    %68 = vector.extract_strided_slice %17 {offsets = [2, 2, 0], sizes = [16, 16, 4], strides = [1, 1, 1]} : vector<18x18x4xbf16> to vector<16x16x4xbf16>
    %69 = vector.shape_cast %68 : vector<16x16x4xbf16> to vector<256x4xbf16>
    %70 = vector.extract_strided_slice %18 {offsets = [8, 0, 0], sizes = [1, 4, 4], strides = [1, 1, 1]} : vector<9x4x4xbf16> to vector<1x4x4xbf16>
    %71 = vector.shape_cast %70 : vector<1x4x4xbf16> to vector<4x4xbf16>
    %cst_21 = arith.constant dense<0.000000e+00> : vector<256x4xf32>
    %72 = tpu.matmul %69, %71, %cst_21 {dimension_numbers = #tpu.dot_dimension_numbers<[1], [0], [0], [1], [0, 0, 1, 1], [], []>} : vector<256x4xbf16>, vector<4x4xbf16>, vector<256x4xf32> -> vector<256x4xf32>
    %73 = arith.addf %67, %72 : vector<256x4xf32>
    %74 = vector.shape_cast %73 : vector<256x4xf32> to vector<1x16x16x4xf32>
    %75 = arith.truncf %74 : vector<1x16x16x4xf32> to vector<1x16x16x4xbf16>
    %c0_22 = arith.constant 0 : index
    %c0_23 = arith.constant 0 : index
    %c0_24 = arith.constant 0 : index
    %c0_25 = arith.constant 0 : index
    %76 = vector.load %arg5[%c0_22, %c0_23, %c0_24, %c0_25] : memref<1x16x16x4xbf16, #tpu.memory_space<vmem>>, vector<1x16x16x4xbf16>
    tpu.vector_store %arg5[%c0_22, %c0_23, %c0_24, %c0_25], %75 {strides = array<i32>} : memref<1x16x16x4xbf16, #tpu.memory_space<vmem>>, vector<1x16x16x4xbf16>,
    %cst_26 = arith.constant dense<0.000000e+00> : vector<4xf32>
    %77 = vector.multi_reduction <add>, %73, %cst_26 [0] : vector<256x4xf32> to vector<4xf32>
    %78 = vector.shape_cast %77 : vector<4xf32> to vector<1x4xf32>
    %79 = arith.mulf %73, %73 : vector<256x4xf32>
    %cst_27 = arith.constant dense<0.000000e+00> : vector<4xf32>
    %80 = vector.multi_reduction <add>, %79, %cst_27 [0] : vector<256x4xf32> to vector<4xf32>
    %81 = vector.shape_cast %80 : vector<4xf32> to vector<1x4xf32>
    %82 = tpu.concatenate %78, %81 in 0 : vector<1x4xf32>, vector<1x4xf32> -> vector<2x4xf32>
    %83 = vector.shape_cast %82 : vector<2x4xf32> to vector<1x2x4xf32>
    %c0_28 = arith.constant 0 : index
    %c0_29 = arith.constant 0 : index
    %c0_30 = arith.constant 0 : index
    %84 = vector.load %arg6[%c0_28, %c0_29, %c0_30] : memref<1x2x4xf32, #tpu.memory_space<vmem>>, vector<1x2x4xf32>
    tpu.vector_store %arg6[%c0_28, %c0_29, %c0_30], %83 {strides = array<i32>} : memref<1x2x4xf32, #tpu.memory_space<vmem>>, vector<1x2x4xf32>,
    return
  }
  func.func @transform_0(%arg0: i32) -> (i32, i32, i32, i32) {
    %c0_i32 = arith.constant 0 : i32
    %c0_i32_0 = arith.constant 0 : i32
    %c0_i32_1 = arith.constant 0 : i32
    %c0_i32_2 = arith.constant 0 : i32
    return %arg0, %c0_i32, %c0_i32_0, %c0_i32_1 : i32, i32, i32, i32
  }
  func.func @transform_1(%arg0: i32) -> (i32, i32) {
    %c0_i32 = arith.constant 0 : i32
    %c0_i32_0 = arith.constant 0 : i32
    %c0_i32_1 = arith.constant 0 : i32
    return %c0_i32, %c0_i32_0 : i32, i32
  }
  func.func @transform_2(%arg0: i32) -> (i32, i32) {
    %c0_i32 = arith.constant 0 : i32
    %c0_i32_0 = arith.constant 0 : i32
    %c0_i32_1 = arith.constant 0 : i32
    return %c0_i32, %c0_i32_0 : i32, i32
  }
  func.func @transform_3(%arg0: i32) -> (i32, i32, i32) {
    %c0_i32 = arith.constant 0 : i32
    %c0_i32_0 = arith.constant 0 : i32
    %c0_i32_1 = arith.constant 0 : i32
    %c0_i32_2 = arith.constant 0 : i32
    return %c0_i32, %c0_i32_0, %c0_i32_1 : i32, i32, i32
  }
  func.func @transform_4(%arg0: i32) -> (i32, i32, i32, i32) {
    %c0_i32 = arith.constant 0 : i32
    %c0_i32_0 = arith.constant 0 : i32
    %c0_i32_1 = arith.constant 0 : i32
    %c0_i32_2 = arith.constant 0 : i32
    return %arg0, %c0_i32, %c0_i32_0, %c0_i32_1 : i32, i32, i32, i32
  }
  func.func @transform_5(%arg0: i32) -> (i32, i32, i32) {
    %c0_i32 = arith.constant 0 : i32
    %c0_i32_0 = arith.constant 0 : i32
    %c0_i32_1 = arith.constant 0 : i32
    return %arg0, %c0_i32, %c0_i32_0 : i32, i32, i32
  }
}

module attributes {stable_mosaic.version = 11 : i64} {
  func.func @finalize_kernel(%arg0: i32, %arg1: memref<1x8x128xbf16, #tpu.memory_space<vmem>>, %arg2: memref<1x8x128xf32, #tpu.memory_space<vmem>>, %arg3: memref<1x128xf32, #tpu.memory_space<vmem>>, %arg4: memref<1x128xf32, #tpu.memory_space<vmem>>, %arg5: memref<1x8x128xf32, #tpu.memory_space<vmem>>) attributes {dimension_semantics = [#tpu.dimension_semantics<parallel>], iteration_bounds = array<i64: 2>, scalar_prefetch = 0 : i64, scratch_operands = 0 : i64, tpu.core_type = #tpu.core_type<tc>, window_params = [{transform_indices = @transform_0, window_bounds = array<i64: 1, 8, 128>}, {transform_indices = @transform_1, window_bounds = array<i64: 1, 8, 128>}, {pipeline_mode = #tpu.pipeline_mode<synchronous>, transform_indices = @transform_2, window_bounds = array<i64: 1, 128>}, {pipeline_mode = #tpu.pipeline_mode<synchronous>, transform_indices = @transform_3, window_bounds = array<i64: 1, 128>}, {transform_indices = @transform_4, window_bounds = array<i64: 1, 8, 128>}]} {
    %c0 = arith.constant 0 : index
    %c0_0 = arith.constant 0 : index
    %c0_1 = arith.constant 0 : index
    %0 = vector.load %arg1[%c0, %c0_0, %c0_1] : memref<1x8x128xbf16, #tpu.memory_space<vmem>>, vector<1x8x128xbf16>
    %1 = arith.extf %0 : vector<1x8x128xbf16> to vector<1x8x128xf32>
    %c0_2 = arith.constant 0 : index
    %c0_3 = arith.constant 0 : index
    %2 = vector.load %arg3[%c0_2, %c0_3] : memref<1x128xf32, #tpu.memory_space<vmem>>, vector<1x128xf32>
    %3 = vector.shape_cast %2 : vector<1x128xf32> to vector<1x1x128xf32>
    %4 = vector.broadcast %3 : vector<1x1x128xf32> to vector<1x8x128xf32>
    %5 = arith.mulf %1, %4 : vector<1x8x128xf32>
    %c0_4 = arith.constant 0 : index
    %c0_5 = arith.constant 0 : index
    %6 = vector.load %arg4[%c0_4, %c0_5] : memref<1x128xf32, #tpu.memory_space<vmem>>, vector<1x128xf32>
    %7 = vector.shape_cast %6 : vector<1x128xf32> to vector<1x1x128xf32>
    %8 = vector.broadcast %7 : vector<1x1x128xf32> to vector<1x8x128xf32>
    %9 = arith.addf %5, %8 : vector<1x8x128xf32>
    %c0_6 = arith.constant 0 : index
    %c0_7 = arith.constant 0 : index
    %c0_8 = arith.constant 0 : index
    %10 = vector.load %arg2[%c0_6, %c0_7, %c0_8] : memref<1x8x128xf32, #tpu.memory_space<vmem>>, vector<1x8x128xf32>
    %11 = arith.addf %9, %10 : vector<1x8x128xf32>
    %cst = arith.constant 0.000000e+00 : f32
    %12 = vector.broadcast %cst : f32 to vector<1x8x128xf32>
    %13 = arith.maximumf %11, %12 : vector<1x8x128xf32>
    %c0_9 = arith.constant 0 : index
    %c0_10 = arith.constant 0 : index
    %c0_11 = arith.constant 0 : index
    %14 = vector.load %arg5[%c0_9, %c0_10, %c0_11] : memref<1x8x128xf32, #tpu.memory_space<vmem>>, vector<1x8x128xf32>
    tpu.vector_store %arg5[%c0_9, %c0_10, %c0_11], %13 {strides = array<i32>} : memref<1x8x128xf32, #tpu.memory_space<vmem>>, vector<1x8x128xf32>,
    return
  }
  func.func @transform_0(%arg0: i32) -> (i32, i32, i32) {
    %c0_i32 = arith.constant 0 : i32
    %c0_i32_0 = arith.constant 0 : i32
    %c0_i32_1 = arith.constant 0 : i32
    return %arg0, %c0_i32, %c0_i32_0 : i32, i32, i32
  }
  func.func @transform_1(%arg0: i32) -> (i32, i32, i32) {
    %c0_i32 = arith.constant 0 : i32
    %c0_i32_0 = arith.constant 0 : i32
    %c0_i32_1 = arith.constant 0 : i32
    return %arg0, %c0_i32, %c0_i32_0 : i32, i32, i32
  }
  func.func @transform_2(%arg0: i32) -> (i32, i32) {
    %c0_i32 = arith.constant 0 : i32
    %c0_i32_0 = arith.constant 0 : i32
    %c0_i32_1 = arith.constant 0 : i32
    return %c0_i32, %c0_i32_0 : i32, i32
  }
  func.func @transform_3(%arg0: i32) -> (i32, i32) {
    %c0_i32 = arith.constant 0 : i32
    %c0_i32_0 = arith.constant 0 : i32
    %c0_i32_1 = arith.constant 0 : i32
    return %c0_i32, %c0_i32_0 : i32, i32
  }
  func.func @transform_4(%arg0: i32) -> (i32, i32, i32) {
    %c0_i32 = arith.constant 0 : i32
    %c0_i32_0 = arith.constant 0 : i32
    %c0_i32_1 = arith.constant 0 : i32
    return %arg0, %c0_i32, %c0_i32_0 : i32, i32, i32
  }
}

</mosaic_0001>

<bundles_post_ra>
// kernel: tile.18
= control target key start
LH: loop header
LB: loop body
LE: loop exit
PB: predicated region body
PF: predicated region fallthrough
CT: control target
= control target key end

     0   :  { %s40_s0 = inlined_call_operand.vmem [shape: f32[4], index: 0, kind: input, shape index: {}]   ;;  %s41_s1 = inlined_call_operand.vmem [shape: f32[32,4], index: 1, kind: output, shape index: {}]  }
   0x1   :  { %v4_v0 = vld [vmem:[%s40_s0] ss:$0 sm:$0xff] }
   0x2   :  { %5 = vst [vmem:[%s41_s1] sm:$0xff] %v4_v0  ;;  %12 = vst [vmem:[%s41_s1 + $0x8] sm:$0xff] %v4_v0 }
   0x3   :  { %13 = vst [vmem:[%s41_s1 + $0x10] sm:$0xff] %v4_v0  ;;  %14 = vst [vmem:[%s41_s1 + $0x18] sm:$0xff] %v4_v0 }

// kernel: tile.19
= control target key start
LH: loop header
LB: loop body
LE: loop exit
PB: predicated region body
PF: predicated region fallthrough
CT: control target
= control target key end

     0   :  { %s259_s10 = smov 124   ;;  %s260_s11 = smov 116   ;;  %vm3_vm0 = vcmask 31744   ;;  %vm9_vm1 = vcmask 1048544   ;;  %vm15_vm2 = vcmask 1015744   ;;  %vm21_vm3 = vcmask 982944   ;;  %s399_s0 = inlined_call_operand.vmem [shape: f32[32,4], index: 0, kind: input, shape index: {}]   ;;  %s400_s1 = inlined_call_operand.vmem [shape: f32[1,128], index: 1, kind: output, shape index: {}]  }
   0x1   :  { %v197_v0 = vld [vmem:[%s399_s0 + $0x1f] sm:$0x1]   ;;  %v199_v1 = vld [vmem:[%s399_s0 + $0x1d] sm:$0x1]   ;;  %v198_v2 = vld [vmem:[%s399_s0 + $0x1e] sm:$0x1]  }
   0x2   :  { %7 = vrot.lane.b32.xlu0 %v197_v0, %s259_s10  ;;  %19 = vrot.lane.b32.xlu1 %v199_v1, %s260_s11  ;;  %v200_v3 = vld [vmem:[%s399_s0 + $0x1c] sm:$0x1]   ;;  %s261_s16 = smov 120   ;;  %s262_s17 = smov 112   ;;  %v201_v4 = vld [vmem:[%s399_s0 + $0x1b] sm:$0x1]  }
   0x3   :  { %v202_v5 = vld [vmem:[%s399_s0 + $0x1a] sm:$0x1]   ;;  %s263_s22 = smov 108   ;;  %s264_s23 = smov 104   ;;  %v203_v6 = vld [vmem:[%s399_s0 + $0x19] sm:$0x1]  }
   0x4   :  { %v204_v7 = vld [vmem:[%s399_s0 + $0x18] sm:$0x1]   ;;  %s265_s28 = smov 100   ;;  %s266_s29 = smov 96   ;;  %v205_v8 = vld [vmem:[%s399_s0 + $0x17] sm:$0x1]  }
   0x5   :  { %v206_v9 = vld [vmem:[%s399_s0 + $0x16] sm:$0x1]   ;;  %v2_v10 = vld [vmem:[%s399_s0] sm:$0x1]   ;;  %s267_s7 = smov 92   ;;  %s268_s8 = smov 88  }
   0x6   :  { %13 = vrot.lane.b32.xlu0 %v198_v2, %s261_s16  ;;  %25 = vrot.lane.b32.xlu1 %v200_v3, %s262_s17  ;;  %4 = vst.msk [vmem:[#allocation0] sm:$0x1] %vm3_vm0, %v2_v10   ;;  %v207_v11 = vld [vmem:[%s399_s0 + $0x15] sm:$0x1]   ;;  %v208_v12 = vld [vmem:[%s399_s0 + $0x14] sm:$0x1]  }
   0x7   :  { %s269_s13 = smov 84   ;;  %s270_s14 = smov 80   ;;  %v209_v13 = vld [vmem:[%s399_s0 + $0x13] sm:$0x1]   ;;  %v210_v14 = vld [vmem:[%s399_s0 + $0x12] sm:$0x1]  }
   0x8   :  { %s271_s19 = smov 76   ;;  %s272_s20 = smov 72   ;;  %v211_v15 = vld [vmem:[%s399_s0 + $0x11] sm:$0x1]   ;;  %v212_v16 = vld [vmem:[%s399_s0 + $0x10] sm:$0x1]  }
   0x9   :  { %s273_s25 = smov 68   ;;  %s274_s26 = smov 64   ;;  %v213_v17 = vld [vmem:[%s399_s0 + $0xf] sm:$0x1]   ;;  %v214_v18 = vld [vmem:[%s399_s0 + $0xe] sm:$0x1]  }
   0xa   :  { %31 = vrot.lane.b32.xlu0 %v201_v4, %s263_s22  ;;  %37 = vrot.lane.b32.xlu1 %v202_v5, %s264_s23  ;;  %s275_s2 = smov 60   ;;  %s276_s3 = smov 56   ;;  %v215_v19 = vld [vmem:[%s399_s0 + $0xd] sm:$0x1]   ;;  %v216_v20 = vld [vmem:[%s399_s0 + $0xc] sm:$0x1]  }
   0xb   :  { %s278_s9 = smov 48   ;;  %v217_v21 = vld [vmem:[%s399_s0 + $0xb] sm:$0x1]   ;;  %v218_v22 = vld [vmem:[%s399_s0 + $0xa] sm:$0x1]   ;;  %s280_s15 = smov 40  }
   0xc   :  { %v219_v23 = vld [vmem:[%s399_s0 + $0x9] sm:$0x1]   ;;  %v220_v24 = vld [vmem:[%s399_s0 + $0x8] sm:$0x1]   ;;  %s282_s21 = smov 32   ;;  %s284_s27 = smov 24  }
   0xd   :  { %v221_v25 = vld [vmem:[%s399_s0 + $0x7] sm:$0x1]   ;;  %v222_v26 = vld [vmem:[%s399_s0 + $0x6] sm:$0x1]   ;;  %v223_v27 = vld [vmem:[%s399_s0 + $0x5] sm:$0x1]  }
   0xe   :  { %43 = vrot.lane.b32.xlu0 %v203_v6, %s265_s28  ;;  %49 = vrot.lane.b32.xlu1 %v204_v7, %s266_s29  ;;  %v224_v28 = vld [vmem:[%s399_s0 + $0x4] sm:$0x1]   ;;  %s286_s4 = smov 16   ;;  %v225_v29 = vld [vmem:[%s399_s0 + $0x3] sm:$0x1]   ;;  %s288_s10 = smov 8  }
   0xf   :  { %v226_v30 = vld [vmem:[%s399_s0 + $0x2] sm:$0x1]   ;;  %v227_v31 = vld [vmem:[%s399_s0 + $0x1] sm:$0x1]   ;;  %s289_s0 = smov 4   ;;  %vm27_vm4 = vcmask 950144  }
  0x10   :  { %vm33_vm5 = vcmask 917344   ;;  %vm39_vm6 = vcmask 884544   ;;  %vm45_vm7 = vcmask 851744   ;;  %vm51_vm8 = vcmask 818944  }
  0x11   :  { %vm57_vm9 = vcmask 786144   ;;  %vm63_vm10 = vcmask 753344   ;;  %vm69_vm11 = vcmask 720544   ;;  %vm75_vm12 = vcmask 687744  }
  0x12   :  { %55 = vrot.lane.b32.xlu0 %v205_v8, %s267_s7  ;;  %61 = vrot.lane.b32.xlu1 %v206_v9, %s268_s8  ;;  %s277_s8 = smov 52   ;;  %vm81_vm13 = vcmask 654944   ;;  %vm87_vm14 = vcmask 622144   ;;  %vm93_vm15 = vcmask 589344   ;;  %vm99_vm0 = vcmask 556544  }
  0x16   :  { %67 = vrot.lane.b32.xlu0 %v207_v11, %s269_s13  ;;  %73 = vrot.lane.b32.xlu1 %v208_v12, %s270_s14  ;;  %s279_s14 = smov 44  }
  0x1a   :  { %79 = vrot.lane.b32.xlu0 %v209_v13, %s271_s19  ;;  %85 = vrot.lane.b32.xlu1 %v210_v14, %s272_s20  ;;  %s281_s20 = smov 36  }
  0x1e   :  { %91 = vrot.lane.b32.xlu0 %v211_v15, %s273_s25  ;;  %97 = vrot.lane.b32.xlu1 %v212_v16, %s274_s26  ;;  %s283_s26 = smov 28  }
  0x22   :  { %103 = vrot.lane.b32.xlu0 %v213_v17, %s275_s2  ;;  %109 = vrot.lane.b32.xlu1 %v214_v18, %s276_s3  ;;  %s285_s3 = smov 20  }
  0x26   :  { %115 = vrot.lane.b32.xlu0 %v215_v19, %s277_s8  ;;  %121 = vrot.lane.b32.xlu1 %v216_v20, %s278_s9  ;;  %s287_s9 = smov 12  }
  0x2a   :  { %127 = vrot.lane.b32.xlu0 %v217_v21, %s279_s14  ;;  %133 = vrot.lane.b32.xlu1 %v218_v22, %s280_s15 }
  0x2e   :  { %139 = vrot.lane.b32.xlu0 %v219_v23, %s281_s20  ;;  %145 = vrot.lane.b32.xlu1 %v220_v24, %s282_s21 }
  0x32   :  { %151 = vrot.lane.b32.xlu0 %v221_v25, %s283_s26  ;;  %157 = vrot.lane.b32.xlu1 %v222_v26, %s284_s27 }
  0x36   :  { %163 = vrot.lane.b32.xlu0 %v223_v27, %s285_s3  ;;  %169 = vrot.lane.b32.xlu1 %v224_v28, %s286_s4 }
  0x3a   :  { %175 = vrot.lane.b32.xlu0 %v225_v29, %s287_s9  ;;  %181 = vrot.lane.b32.xlu1 %v226_v30, %s288_s10 }
  0x3e   :  { %187 = vrot.lane.b32.xlu0 %v227_v31, %s289_s0 }
  0x74   :  { %v8_v32 = vpop.permute.xlu0 %7   ;;  %v20_v33 = vpop.permute.xlu1 %19  }
  0x75   :  { %10 = vst.msk [vmem:[#allocation0] sm:$0x1] %vm9_vm1, %v8_v32   ;;  %vm105_vm1 = vcmask 523744  }
  0x78   :  { %v14_v34 = vpop.permute.xlu0 %13   ;;  %v26_v35 = vpop.permute.xlu1 %25  }
  0x79   :  { %16 = vst.msk [vmem:[#allocation0] sm:$0x1] %vm15_vm2, %v14_v34   ;;  %vm111_vm2 = vcmask 490944  }
  0x7a   :  { %22 = vst.msk [vmem:[#allocation0] sm:$0x1] %vm21_vm3, %v20_v33   ;;  %vm117_vm3 = vcmask 458144  }
  0x7b   :  { %28 = vst.msk [vmem:[#allocation0] sm:$0x1] %vm27_vm4, %v26_v35   ;;  %vm123_vm4 = vcmask 425344  }
  0x7c   :  { %v32_v36 = vpop.permute.xlu0 %31   ;;  %v38_v37 = vpop.permute.xlu1 %37  }
  0x7d   :  { %34 = vst.msk [vmem:[#allocation0] sm:$0x1] %vm33_vm5, %v32_v36   ;;  %vm129_vm5 = vcmask 392544  }
  0x7e   :  { %40 = vst.msk [vmem:[#allocation0] sm:$0x1] %vm39_vm6, %v38_v37   ;;  %vm135_vm6 = vcmask 359744  }
  0x80   :  { %v44_v38 = vpop.permute.xlu0 %43   ;;  %v50_v39 = vpop.permute.xlu1 %49  }
  0x81   :  { %46 = vst.msk [vmem:[#allocation0] sm:$0x1] %vm45_vm7, %v44_v38   ;;  %vm141_vm7 = vcmask 326944  }
  0x82   :  { %52 = vst.msk [vmem:[#allocation0] sm:$0x1] %vm51_vm8, %v50_v39   ;;  %vm147_vm8 = vcmask 294144  }
  0x84   :  { %v56_v40 = vpop.permute.xlu0 %55   ;;  %v62_v41 = vpop.permute.xlu1 %61  }
  0x85   :  { %58 = vst.msk [vmem:[#allocation0] sm:$0x1] %vm57_vm9, %v56_v40   ;;  %vm153_vm9 = vcmask 261344  }
  0x86   :  { %64 = vst.msk [vmem:[#allocation0] sm:$0x1] %vm63_vm10, %v62_v41   ;;  %vm159_vm10 = vcmask 228544  }
  0x88   :  { %v68_v42 = vpop.permute.xlu0 %67   ;;  %v74_v43 = vpop.permute.xlu1 %73  }
  0x89   :  { %70 = vst.msk [vmem:[#allocation0] sm:$0x1] %vm69_vm11, %v68_v42   ;;  %vm165_vm11 = vcmask 195744  }
  0x8a   :  { %76 = vst.msk [vmem:[#allocation0] sm:$0x1] %vm75_vm12, %v74_v43   ;;  %vm171_vm12 = vcmask 162944  }
  0x8c   :  { %v80_v44 = vpop.permute.xlu0 %79   ;;  %v86_v45 = vpop.permute.xlu1 %85  }
  0x8d   :  { %82 = vst.msk [vmem:[#allocation0] sm:$0x1] %vm81_vm13, %v80_v44   ;;  %vm177_vm13 = vcmask 130144  }
  0x8e   :  { %88 = vst.msk [vmem:[#allocation0] sm:$0x1] %vm87_vm14, %v86_v45   ;;  %vm183_vm14 = vcmask 97344  }
  0x90   :  { %v92_v46 = vpop.permute.xlu0 %91   ;;  %v98_v47 = vpop.permute.xlu1 %97  }
  0x91   :  { %94 = vst.msk [vmem:[#allocation0] sm:$0x1] %vm93_vm15, %v92_v46   ;;  %vm189_vm15 = vcmask 64544  }
  0x92   :  { %100 = vst.msk [vmem:[#allocation0] sm:$0x1] %vm99_vm0, %v98_v47  }
  0x94   :  { %v104_v48 = vpop.permute.xlu0 %103   ;;  %v110_v49 = vpop.permute.xlu1 %109  }
  0x95   :  { %106 = vst.msk [vmem:[#allocation0] sm:$0x1] %vm105_vm1, %v104_v48  }
  0x96   :  { %112 = vst.msk [vmem:[#allocation0] sm:$0x1] %vm111_vm2, %v110_v49  }
  0x98   :  { %v116_v50 = vpop.permute.xlu0 %115   ;;  %v122_v51 = vpop.permute.xlu1 %121  }
  0x99   :  { %118 = vst.msk [vmem:[#allocation0] sm:$0x1] %vm117_vm3, %v116_v50  }
  0x9a   :  { %124 = vst.msk [vmem:[#allocation0] sm:$0x1] %vm123_vm4, %v122_v51  }
  0x9c   :  { %v128_v52 = vpop.permute.xlu0 %127   ;;  %v134_v53 = vpop.permute.xlu1 %133  }
  0x9d   :  { %130 = vst.msk [vmem:[#allocation0] sm:$0x1] %vm129_vm5, %v128_v52  }
  0x9e   :  { %136 = vst.msk [vmem:[#allocation0] sm:$0x1] %vm135_vm6, %v134_v53  }
  0xa0   :  { %v140_v54 = vpop.permute.xlu0 %139   ;;  %v146_v55 = vpop.permute.xlu1 %145  }
  0xa1   :  { %142 = vst.msk [vmem:[#allocation0] sm:$0x1] %vm141_vm7, %v140_v54  }
  0xa2   :  { %148 = vst.msk [vmem:[#allocation0] sm:$0x1] %vm147_vm8, %v146_v55  }
  0xa4   :  { %v152_v56 = vpop.permute.xlu0 %151   ;;  %v158_v57 = vpop.permute.xlu1 %157  }
  0xa5   :  { %154 = vst.msk [vmem:[#allocation0] sm:$0x1] %vm153_vm9, %v152_v56  }
  0xa6   :  { %160 = vst.msk [vmem:[#allocation0] sm:$0x1] %vm159_vm10, %v158_v57  }
  0xa8   :  { %v164_v58 = vpop.permute.xlu0 %163   ;;  %v170_v59 = vpop.permute.xlu1 %169  }
  0xa9   :  { %166 = vst.msk [vmem:[#allocation0] sm:$0x1] %vm165_vm11, %v164_v58  }
  0xaa   :  { %172 = vst.msk [vmem:[#allocation0] sm:$0x1] %vm171_vm12, %v170_v59  }
  0xac   :  { %v176_v60 = vpop.permute.xlu0 %175   ;;  %v182_v61 = vpop.permute.xlu1 %181  }
  0xad   :  { %178 = vst.msk [vmem:[#allocation0] sm:$0x1] %vm177_vm13, %v176_v60  }
  0xae   :  { %184 = vst.msk [vmem:[#allocation0] sm:$0x1] %vm183_vm14, %v182_v61  }
  0xb0   :  { %v188_v62 = vpop.permute.xlu0 %187  }
  0xb1   :  { %190 = vst.msk [vmem:[#allocation0] sm:$0x1] %vm189_vm15, %v188_v62  }
  0xb8   :  { %v194_v63 = vld [vmem:[#allocation0] sm:$0x1] }
  0xb9   :  { %196 = vst [vmem:[%s400_s1] sm:$0x1] %v194_v63 }

// kernel: basic_block_forward.3
= control target key start
LH: loop header
LB: loop body
LE: loop exit
PB: predicated region body
PF: predicated region fallthrough
CT: control target
= control target key end

     0   :  { %s3948_s12 = smov 0   ;;  %s4834_s0 = inlined_call_operand.vmem [shape: f32[2,16,16,4], index: 0, kind: input, shape index: {}]   ;;  %s4835_s1 = inlined_call_operand.vmem [shape: bf16[9,4,4], index: 1, kind: input, shape index: {}]   ;;  %s4836_s2 = inlined_call_operand.vmem [shape: bf16[2,16,16,4], index: 2, kind: output, shape index: {0}]   ;;  %s4837_s3 = inlined_call_operand.vmem [shape: f32[2,2,4], index: 3, kind: output, shape index: {1}]  }
   0x1 LB: > { %s2963_s13 = sadd.s32 4294967295, %s3925_s12   ;;  %p2967_p0 = scmp.ge.s32.totalorder %s3925_s12, 1  ;;  %s3925_s12 = sphi %s3948_s12, %s14_s12  }
   0x2   : > { %p140_p1 = scmp.lt.s32.totalorder %s3925_s12, 3 }
   0x4   : > { %p141_p2 = pnand %p2967_p0, %p140_p1 }
   0x5   : > { %v411_v0 = vld [vmem:[%s4835_s1 + $0x2] sm:$0x3] (!%p141_p2)  ;;  %vm657_vm0 = vcmask (!%p141_p2), 1041408   ;;  %v3962_v1 = vld [vmem:[%s4835_s1 + $0x8] sm:$0x3] (!%p141_p2)  ;;  %v4838_v4 = vmov (!%p141_p2), 0  }
   0x6   : > { %144 = sbr.rel (%p141_p2) target bundleno = 554 (0x22a), region = 28  ;;  %3900 = vmatprep.subr.msk.bf16.mxu1 (!%p141_p2), %vm657_vm0, %v411_v0  ;;  %3904 = vmatprep.subr.msk.bf16.mxu0 (!%p141_p2), %vm657_vm0, %v3962_v1  ;;  %v659_v2 = vsel (!%p141_p2), %vm657_vm0, %v411_v0, 0  ;;  %v3970_v3 = vsel (!%p141_p2), %vm657_vm0, %v3962_v1, 0  ;;  %v3973_v5 = vrot.slane (!%p141_p2), %v4838_v4, 1  ;;  %vm608_vm1 = vcmask (!%p141_p2), 31744   ;;  %p168_p3 = scmp.lt.s32.totalorder (!%p141_p2), %s2963_s13, 1 }
   0x7   : > { %3337 = vmatpush3.bf16.msra.mxu1 (!%p141_p2), %v659_v2  ;;  %3473 = vmatpush3.bf16.msra.mxu0 (!%p141_p2), %v3970_v3  ;;  %v410_v6 = vld [vmem:[%s4835_s1] sm:$0x3] (!%p141_p2)  ;;  %v415_v7 = vld [vmem:[%s4835_s1 + $0xa] sm:$0x3] (!%p141_p2)  ;;  %vm375_vm2 = vcmask (!%p141_p2), 1040384   ;;  %vm1049_vm6 = vcmask (!%p141_p2), 1046528  }
   0x8   : > { %3338 = vmatprep.mubr.msk.bf16.mxu1 (!%p141_p2), %vm608_vm1, %v3973_v5  ;;  %3901 = vmatprep.subr.msk.bf16.mxu1 (!%p141_p2), %vm657_vm0, %v410_v6  ;;  %vm376_vm3 = vsmask.f32 (!%p141_p2), 256  ;;  %v4004_v22 = vsel (!%p141_p2), %vm657_vm0, %v410_v6, 0  ;;  %vm419_vm4 = vsmask.f32 (!%p141_p2), 7424  ;;  %v4012_v34 = vsel (!%p141_p2), %vm657_vm0, %v415_v7, 0 }
   0x9   : > { %3906 = vmatprep.subr.msk.bf16.mxu0 (!%p141_p2), %vm657_vm0, %v415_v7  ;;  %vm4016_vm5 = vmand (!%p141_p2), %vm375_vm2, %vm376_vm3  ;;  %vm2670_vm7 = vcmask (!%p141_p2), 27648   ;;  %vm2875_vm8 = vcmask (!%p141_p2), 25600  }
   0xd   : > { %s4844_s13 = smov (!%p168_p3, %s2963_s13), 1 }
   0xe   : > { %s3149_s22 = sshll.u32 %s4844_s13, 8  ;;  %s3150_s9 = sshll.u32 %s4844_s13, 7 }
   0xf   : > { %s3992_s25 = scalar_lea.vmem %s4834_s0, %s3149_s22  ;;  %s4688_s14 = scalar_lea.vmem %s4836_s2, %s3150_s9 }
  0x10   : > { %v183_v8 = vld [vmem:[%s3992_s25] sm:$0xff]  ;;  %v184_v9 = vld [vmem:[%s3992_s25 + $0x8] sm:$0xff]  ;;  %v185_v10 = vld [vmem:[%s3992_s25 + $0x10] sm:$0xff]  ;;  %s2972_s15 = sshll.u32 %s4844_s13, 1 }
  0x11   : > { %v215_v11 = vpack.c.bf16 %v184_v9, %v183_v8  ;;  %v186_v12 = vld [vmem:[%s3992_s25 + $0x18] sm:$0xff]  ;;  %v187_v13 = vld [vmem:[%s3992_s25 + $0x20] sm:$0xff]  ;;  %v188_v14 = vld [vmem:[%s3992_s25 + $0x28] sm:$0xff]  ;;  %s181_s18 = scalar_lea.vmem %s4837_s3, %s2972_s15 }
  0x12   : > { %v216_v15 = vpack.c.bf16 %v186_v12, %v185_v10  ;;  %v217_v16 = vpack.c.bf16 %v188_v14, %v187_v13  ;;  %v189_v17 = vld [vmem:[%s3992_s25 + $0x30] sm:$0xff]  ;;  %v190_v18 = vld [vmem:[%s3992_s25 + $0x38] sm:$0xff]  ;;  %v191_v19 = vld [vmem:[%s3992_s25 + $0x40] sm:$0xff] }
  0x13   : > { %v232_v20 = vshrl.u32 %v215_v11, 16  ;;  %v235_v21 = vshll.u32 %v215_v11, 16  ;;  %v218_v23 = vpack.c.bf16 %v190_v18, %v189_v17  ;;  %v192_v24 = vld [vmem:[%s3992_s25 + $0x48] sm:$0xff]  ;;  %v193_v25 = vld [vmem:[%s3992_s25 + $0x50] sm:$0xff]  ;;  %v194_v26 = vld [vmem:[%s3992_s25 + $0x58] sm:$0xff] }
  0x14   : > { %v239_v27 = vshrl.u32 %v216_v15, 16  ;;  %v242_v28 = vshll.u32 %v216_v15, 16  ;;  %v246_v29 = vshrl.u32 %v217_v16, 16  ;;  %v249_v30 = vshll.u32 %v217_v16, 16  ;;  %v195_v31 = vld [vmem:[%s3992_s25 + $0x60] sm:$0xff]  ;;  %v196_v32 = vld [vmem:[%s3992_s25 + $0x68] sm:$0xff] }
  0x15   : > { %v234_v33 = vrot.slane %v232_v20, 7  ;;  %v253_v35 = vshrl.u32 %v218_v23, 16  ;;  %v219_v36 = vpack.c.bf16 %v192_v24, %v191_v19  ;;  %v256_v40 = vshll.u32 %v218_v23, 16  ;;  %v4076_v23 = vld [vmem:[%s4835_s1 + $0xc] sm:$0x3] }
  0x16   : > { %v241_v38 = vrot.slane %v239_v27, 7  ;;  %v248_v39 = vrot.slane %v246_v29, 7  ;;  %v4020_v41 = vpack.c.bf16 %v194_v26, %v193_v25  ;;  %v4026_v45 = vpack.c.bf16 %v196_v32, %v195_v31  ;;  %v4088_v29 = vld [vmem:[%s4835_s1 + $0x4] sm:$0x3] }
  0x17   : > { %v237_v42 = vor.u32 %v235_v21, %v234_v33  ;;  %v4024_v43 = vsel %vm4016_vm5, %v234_v33, 0  ;;  %v255_v44 = vrot.slane %v253_v35, 7  ;;  %v260_v53 = vshrl.u32 %v219_v36, 16  ;;  %v198_v35 = vld [vmem:[%s3992_s25 + $0x78] sm:$0xff] }
  0x18   : > { %v436_v46 = vshll.u32 %v4024_v43, 16  ;;  %v244_v47 = vor.u32 %v242_v28, %v241_v38  ;;  %v4031_v48 = vsel %vm4016_vm5, %v241_v38, 0  ;;  %v251_v49 = vor.u32 %v249_v30, %v248_v39  ;;  %v197_v28 = vld [vmem:[%s3992_s25 + $0x70] sm:$0xff]  ;;  %v200_v38 = vld [vmem:[%s3992_s25 + $0x88] sm:$0xff] }
  0x19   : > { %v4035_v50 = vsel %vm4016_vm5, 0, %v237_v42  ;;  %v448_v51 = vshll.u32 %v4031_v48, 16  ;;  %v4040_v52 = vsel %vm4016_vm5, %v248_v39, 0  ;;  %v258_v7 = vor.u32 %v256_v40, %v255_v44 }
  0x1a   : > { %v429_v54 = vshrl.u32 %v4035_v50, 16  ;;  %v431_v55 = vshll.u32 %v4035_v50, 16  ;;  %v438_v56 = vrot.slane %v436_v46, 1  ;;  %v4046_v57 = vsel %vm4016_vm5, 0, %v244_v47 }
  0x1b   : > { %v441_v58 = vshrl.u32 %v4046_v57, 16  ;;  %v443_v59 = vshll.u32 %v4046_v57, 16  ;;  %v450_v60 = vrot.slane %v448_v51, 1  ;;  %v4052_v61 = vsel %vm4016_vm5, 0, %v251_v49 }
  0x1c   : > { %v433_v62 = vrot.slane %v431_v55, 1  ;;  %v453_v63 = vshrl.u32 %v4052_v61, 16  ;;  %v455_v0 = vshll.u32 %v4052_v61, 16  ;;  %v460_v2 = vshll.u32 %v4040_v52, 16 }
  0x1d   : > { %v445_v6 = vrot.slane %v443_v59, 1  ;;  %v4059_v8 = vsel %vm4016_vm5, %v255_v44, 0  ;;  %v262_v9 = vrot.slane %v260_v53, 7  ;;  %v4064_v15 = vsel %vm4016_vm5, 0, %v258_v7 }
  0x1e   : > { %v434_v10 = vor.u32 %v433_v62, %v429_v54  ;;  %v457_v11 = vrot.slane %v455_v0, 1  ;;  %v462_v12 = vrot.slane %v460_v2, 1  ;;  %v472_v13 = vshll.u32 %v4059_v8, 16 }
  0x1f   : > { %v446_v14 = vor.u32 %v445_v6, %v441_v58  ;;  %v263_v16 = vshll.u32 %v219_v36, 16  ;;  %v4068_v17 = vsel %vm4016_vm5, %v262_v9, 0  ;;  %v465_v20 = vshrl.u32 %v4064_v15, 16  ;;  %v199_v36 = vld [vmem:[%s3992_s25 + $0x80] sm:$0xff] }
  0x20   : > { %v439_v18 = vsel %vm419_vm4, %v434_v10, %v438_v56  ;;  %v458_v19 = vor.u32 %v457_v11, %v453_v63  ;;  %v467_v21 = vshll.u32 %v4064_v15, 16  ;;  %v474_v25 = vrot.slane %v472_v13, 1  ;;  %v201_v10 = vld [vmem:[%s3992_s25 + $0x90] sm:$0xff]  ;;  %v202_v11 = vld [vmem:[%s3992_s25 + $0x98] sm:$0xff] }
  0x21   : > { %3339 = vmatmul.mubr.msk.bf16.vlgmr.msra.gmra.mrb[0].mxu1 %vm608_vm1, %v439_v18  ;;  %3474 = vmatprep.mubr.msk.bf16.mxu0 %vm608_vm1, %v439_v18  ;;  %v4081_v24 = vsel %vm419_vm4, %v446_v14, %v450_v60  ;;  %v265_v26 = vor.u32 %v263_v16, %v262_v9  ;;  %v484_v27 = vshll.u32 %v4068_v17, 16  ;;  %v267_v32 = vshrl.u32 %v4020_v41, 16 }
  0x22   : > { %3371 = vmatpush3.bf16.msra.mxu1 %v4004_v22  ;;  %3475 = vmatmul.mubr.msk.bf16.vlgmr.msra.gmra.mrb[0].mxu0 %vm608_vm1, %v4081_v24  ;;  %v4094_v30 = vsel %vm419_vm4, %v458_v19, %v462_v12  ;;  %v469_v31 = vrot.slane %v467_v21, 1  ;;  %v270_v33 = vshll.u32 %v4020_v41, 16  ;;  %v274_v39 = vshrl.u32 %v4026_v45, 16 }
  0x23   : > { %3507 = vmatpush3.bf16.msra.mxu0 %v4012_v34  ;;  %3342 = vmatprep.mubr.msk.bf16.mxu1 %vm608_vm1, %v4081_v24  ;;  %v4106_v22 = vsel %vm4016_vm5, 0, %v265_v26  ;;  %v277_v40 = vshll.u32 %v4026_v45, 16  ;;  %v269_v34 = vrot.slane %v267_v32, 7  ;;  %v486_v46 = vrot.slane %v484_v27, 1 }
  0x24   : > { %3478 = vmatprep.mubr.msk.bf16.mxu0 %vm608_vm1, %v4094_v30  ;;  %v470_v41 = vor.u32 %v469_v31, %v465_v20  ;;  %v477_v42 = vshrl.u32 %v4106_v22, 16  ;;  %v479_v44 = vshll.u32 %v4106_v22, 16  ;;  %3907 = vmatprep.subr.msk.bf16.mxu0 %vm657_vm0, %v4076_v23  ;;  %v276_v47 = vrot.slane %v274_v39, 7 }
  0x25   : > { %v222_v49 = vpack.c.bf16 %v198_v35, %v197_v28  ;;  %v223_v51 = vpack.c.bf16 %v200_v38, %v199_v36  ;;  %3902 = vmatprep.subr.msk.bf16.mxu1 %vm657_vm0, %v4088_v29  ;;  %v272_v54 = vor.u32 %v270_v33, %v269_v34  ;;  %v4123_v55 = vsel %vm4016_vm5, %v269_v34, 0 }
  0x26   : > { %v4119_v45 = vsel %vm419_vm4, %v470_v41, %v474_v25  ;;  %v481_v53 = vrot.slane %v479_v44, 1  ;;  %v496_v56 = vshll.u32 %v4123_v55, 16  ;;  %v279_v58 = vor.u32 %v277_v40, %v276_v47  ;;  %v203_v41 = vld [vmem:[%s3992_s25 + $0xa0] sm:$0xff] }
  0x27   : > { %v4128_v59 = vsel %vm4016_vm5, %v276_v47, 0  ;;  %v281_v60 = vshrl.u32 %v222_v49, 16  ;;  %v4132_v63 = vsel %vm4016_vm5, 0, %v272_v54  ;;  %v284_v9 = vshll.u32 %v222_v49, 16 }
  0x28   : > { %v482_v62 = vor.u32 %v481_v53, %v477_v42  ;;  %v508_v0 = vshll.u32 %v4128_v59, 16  ;;  %v489_v2 = vshrl.u32 %v4132_v63, 16  ;;  %v491_v6 = vshll.u32 %v4132_v63, 16  ;;  %v204_v42 = vld [vmem:[%s3992_s25 + $0xa8] sm:$0xff] }
  0x29   : > { %3343 = vmatmul.mubr.msk.bf16.gmra.mrb[4].mxu1 %vm608_vm1, %v4094_v30  ;;  %v4141_v7 = vsel %vm4016_vm5, 0, %v279_v58  ;;  %v498_v13 = vrot.slane %v496_v56, 1  ;;  %v283_v19 = vrot.slane %v281_v60, 7  ;;  %v288_v20 = vshrl.u32 %v223_v51, 16 }
  0x2a   : > { %3479 = vmatmul.mubr.msk.bf16.gmra.mrb[4].mxu0 %vm608_vm1, %v4119_v45  ;;  %3346 = vmatprep.mubr.msk.bf16.mxu1 %vm608_vm1, %v4119_v45  ;;  %v4150_v12 = vsel %vm419_vm4, %v482_v62, %v486_v46  ;;  %v501_v14 = vshrl.u32 %v4141_v7, 16  ;;  %v503_v16 = vshll.u32 %v4141_v7, 16  ;;  %v493_v18 = vrot.slane %v491_v6, 1  ;;  %v205_v6 = vld [vmem:[%s3992_s25 + $0xb0] sm:$0xff] }
  0x2b   : > { %3482 = vmatprep.mubr.msk.bf16.mxu0 %vm608_vm1, %v4150_v12  ;;  %v291_v21 = vshll.u32 %v223_v51, 16  ;;  %v510_v26 = vrot.slane %v508_v0, 1  ;;  %v224_v27 = vpack.c.bf16 %v202_v11, %v201_v10  ;;  %v286_v31 = vor.u32 %v284_v9, %v283_v19 }
  0x2c   : > { %v505_v25 = vrot.slane %v503_v16, 1  ;;  %v494_v28 = vor.u32 %v493_v18, %v489_v2  ;;  %v4158_v32 = vsel %vm4016_vm5, %v283_v19, 0  ;;  %v290_v33 = vrot.slane %v288_v20, 7  ;;  %v207_v16 = vld [vmem:[%s3992_s25 + $0xc0] sm:$0xff]  ;;  %v208_v18 = vld [vmem:[%s3992_s25 + $0xc8] sm:$0xff] }
  0x2d   : > { %v520_v36 = vshll.u32 %v4158_v32, 16  ;;  %v4166_v39 = vsel %vm4016_vm5, 0, %v286_v31  ;;  %v295_v51 = vshrl.u32 %v224_v27, 16  ;;  %v298_v53 = vshll.u32 %v224_v27, 16 }
  0x2e   : > { %v506_v35 = vor.u32 %v505_v25, %v501_v14  ;;  %v4162_v38 = vsel %vm419_vm4, %v494_v28, %v498_v13  ;;  %v293_v40 = vor.u32 %v291_v21, %v290_v33  ;;  %v513_v34 = vshrl.u32 %v4166_v39, 16  ;;  %v206_v14 = vld [vmem:[%s3992_s25 + $0xb8] sm:$0xff] }
  0x2f   : > { %v515_v46 = vshll.u32 %v4166_v39, 16  ;;  %v4183_v49 = vsel %vm4016_vm5, %v290_v33, 0  ;;  %v522_v56 = vrot.slane %v520_v36, 1  ;;  %v225_v60 = vpack.c.bf16 %v204_v42, %v203_v41 }
  0x30   : > { %v4171_v44 = vsel %vm419_vm4, %v506_v35, %v510_v26  ;;  %v4179_v47 = vsel %vm4016_vm5, 0, %v293_v40  ;;  %v1056_v62 = vrot.slane %v4031_v48, 1  ;;  %v1052_v0 = vrot.slane %v4035_v50, 1 }
  0x31   : > { %3347 = vmatmul.mubr.msk.bf16.gmra.mrb[8].mxu1 %vm608_vm1, %v4150_v12  ;;  %v517_v54 = vrot.slane %v515_v46, 1  ;;  %v527_v58 = vshll.u32 %v4179_v47, 16  ;;  %v297_v2 = vrot.slane %v295_v51, 7  ;;  %v532_v10 = vshll.u32 %v4183_v49, 16 }
  0x32   : > { %3483 = vmatmul.mubr.msk.bf16.gmra.mrb[8].mxu0 %vm608_vm1, %v4162_v38  ;;  %3350 = vmatprep.mubr.msk.bf16.mxu1 %vm608_vm1, %v4162_v38  ;;  %v1053_v11 = vrot.slane %v4024_v43, 1  ;;  %v302_v13 = vshrl.u32 %v225_v60, 16  ;;  %v1055_v19 = vrot.slane %v4046_v57, 1  ;;  %v305_v21 = vshll.u32 %v225_v60, 16 }
  0x33   : > { %3486 = vmatprep.mubr.msk.bf16.mxu0 %vm608_vm1, %v4171_v44  ;;  %v518_v9 = vor.u32 %v517_v54, %v513_v34  ;;  %v300_v48 = vor.u32 %v298_v53, %v297_v2  ;;  %v4203_v20 = vsel %vm4016_vm5, %v297_v2, 0  ;;  %v525_v26 = vshrl.u32 %v4179_v47, 16 }
  0x34   : > { %v529_v27 = vrot.slane %v527_v58, 1  ;;  %v304_v28 = vrot.slane %v302_v13, 7  ;;  %v544_v31 = vshll.u32 %v4203_v20, 16  ;;  %v226_v33 = vpack.c.bf16 %v206_v14, %v205_v6 }
  0x35   : > { %v4206_v25 = vsel %vm419_vm4, %v518_v9, %v522_v56  ;;  %v4211_v43 = vsel %vm4016_vm5, 0, %v300_v48  ;;  %v227_v35 = vpack.c.bf16 %v208_v18, %v207_v16  ;;  %v534_v36 = vrot.slane %v532_v10, 1 }
  0x36   : > { %v4215_v40 = vsel %vm1049_vm6, %v1052_v0, %v1053_v11  ;;  %v537_v41 = vshrl.u32 %v4211_v43, 16  ;;  %v539_v42 = vshll.u32 %v4211_v43, 16  ;;  %v307_v34 = vor.u32 %v305_v21, %v304_v28 }
  0x37   : > { %v4223_v46 = vsel %vm4016_vm5, %v304_v28, 0  ;;  %v1058_v51 = vrot.slane %v4052_v61, 1  ;;  %v309_v53 = vshrl.u32 %v226_v33, 16  ;;  %v530_v54 = vor.u32 %v529_v27, %v525_v26 }
  0x38   : > { %v541_v56 = vrot.slane %v539_v42, 1  ;;  %v312_v58 = vshll.u32 %v226_v33, 16  ;;  %v316_v60 = vshrl.u32 %v227_v35, 16  ;;  %v546_v0 = vrot.slane %v544_v31, 1  ;;  %v209_v31 = vld [vmem:[%s3992_s25 + $0xd0] sm:$0xff]  ;;  %v210_v33 = vld [vmem:[%s3992_s25 + $0xd8] sm:$0xff] }
  0x39   : > { %3351 = vmatmul.mubr.msk.bf16.gmra.mrb[12].mxu1 %vm608_vm1, %v4171_v44  ;;  %v4234_v2 = vsel %vm4016_vm5, 0, %v307_v34  ;;  %v311_v6 = vrot.slane %v309_v53, 7  ;;  %v319_v9 = vshll.u32 %v227_v35, 16  ;;  %v556_v13 = vshll.u32 %v4223_v46, 16 }
  0x3a   : > { %3487 = vmatmul.mubr.msk.bf16.gmra.mrb[12].mxu0 %vm608_vm1, %v4206_v25  ;;  %3354 = vmatprep.mubr.msk.bf16.mxu1 %vm608_vm1, %v4206_v25  ;;  %v542_v10 = vor.u32 %v541_v56, %v537_v41  ;;  %v551_v11 = vshll.u32 %v4234_v2, 16  ;;  %v1059_v14 = vrot.slane %v4040_v52, 1  ;;  %v549_v16 = vshrl.u32 %v4234_v2, 16 }
  0x3b   : > { %3508 = vmatprep.mubr.msk.bf16.mxu0 %vm608_vm1, %v4215_v40  ;;  %v314_v18 = vor.u32 %v312_v58, %v311_v6  ;;  %v4242_v48 = vsel %vm4016_vm5, %v311_v6, 0  ;;  %v318_v21 = vrot.slane %v316_v60, 7  ;;  %v4245_v26 = vsel %vm419_vm4, %v530_v54, %v534_v36  ;;  %v211_v60 = vld [vmem:[%s3992_s25 + $0xe0] sm:$0xff] }
  0x3c   : > { %v4248_v27 = vsel %vm1049_vm6, %v1055_v19, %v1056_v62  ;;  %v553_v28 = vrot.slane %v551_v11, 1  ;;  %v4253_v52 = vsel %vm419_vm4, %v542_v10, %v546_v0  ;;  %v568_v41 = vshll.u32 %v4242_v48, 16  ;;  %v212_v0 = vld [vmem:[%s3992_s25 + $0xe8] sm:$0xff] }
  0x3d   : > { %v4257_v35 = vsel %vm4016_vm5, 0, %v314_v18  ;;  %v321_v42 = vor.u32 %v319_v9, %v318_v21  ;;  %v1955_v36 = vsel %vm657_vm0, %v4076_v23, 0  ;;  %v4263_v62 = vsel %vm1049_vm6, %v1058_v51, %v1059_v14  ;;  %v4278_v23 = vld [vmem:[%s4835_s1 + $0xe] sm:$0x3] }
  0x3e   : > { %v561_v19 = vshrl.u32 %v4257_v35, 16  ;;  %v563_v34 = vshll.u32 %v4257_v35, 16  ;;  %v554_v53 = vor.u32 %v553_v28, %v549_v16  ;;  %v558_v54 = vrot.slane %v556_v13, 1 }
  0x3f   : > { %v4271_v56 = vsel %vm4016_vm5, 0, %v321_v42  ;;  %v228_v58 = vpack.c.bf16 %v210_v33, %v209_v31  ;;  %v1061_v51 = vrot.slane %v4064_v15, 1  ;;  %v4287_v9 = vsel %vm4016_vm5, %v318_v21, 0 }
  0x40   : > { %v565_v6 = vrot.slane %v563_v34, 1  ;;  %v575_v10 = vshll.u32 %v4271_v56, 16  ;;  %v1062_v11 = vrot.slane %v4059_v8, 1  ;;  %v570_v13 = vrot.slane %v568_v41, 1 }
  0x41   : > { %3355 = vmatmul.mubr.msk.bf16.gmra.mrb[16].mxu1 %vm608_vm1, %v4245_v26  ;;  %v323_v14 = vshrl.u32 %v228_v58, 16  ;;  %v326_v16 = vshll.u32 %v228_v58, 16  ;;  %v1064_v28 = vrot.slane %v4106_v22, 1  ;;  %v1065_v31 = vrot.slane %v4068_v17, 1 }
  0x42   : > { %3509 = vmatmul.mubr.msk.bf16.vlgmr.msra.gmra.mrb[0].mxu0 %vm608_vm1, %v4248_v27  ;;  %3358 = vmatprep.mubr.msk.bf16.mxu1 %vm608_vm1, %v4253_v52  ;;  %v566_v18 = vor.u32 %v565_v6, %v561_v19  ;;  %v229_v33 = vpack.c.bf16 %v212_v0, %v211_v60  ;;  %v4298_v21 = vsel %vm419_vm4, %v554_v53, %v558_v54  ;;  %v580_v42 = vshll.u32 %v4287_v9, 16 }
  0x43   : > { %3541 = vmatpush3.bf16.msra.mxu0 %v1955_v36  ;;  %3512 = vmatprep.mubr.msk.bf16.mxu0 %vm608_vm1, %v4263_v62  ;;  %v325_v36 = vrot.slane %v323_v14, 7  ;;  %v573_v8 = vshrl.u32 %v4271_v56, 16  ;;  %v577_v41 = vrot.slane %v575_v10, 1  ;;  %v4303_v19 = vsel %vm1049_vm6, %v1061_v51, %v1062_v11 }
  0x44   : > { %3908 = vmatprep.subr.msk.bf16.mxu0 %vm657_vm0, %v4278_v23  ;;  %v330_v34 = vshrl.u32 %v229_v33, 16  ;;  %v333_v58 = vshll.u32 %v229_v33, 16  ;;  %v4306_v17 = vsel %vm419_vm4, %v566_v18, %v570_v13  ;;  %v4313_v53 = vsel %vm1049_vm6, %v1064_v28, %v1065_v31 }
  0x45   : > { %v328_v60 = vor.u32 %v326_v16, %v325_v36  ;;  %v4310_v0 = vsel %vm4016_vm5, %v325_v36, 0  ;;  %v582_v10 = vrot.slane %v580_v42, 1  ;;  %v578_v11 = vor.u32 %v577_v41, %v573_v8 }
  0x46   : > { %v592_v54 = vshll.u32 %v4310_v0, 16  ;;  %v332_v6 = vrot.slane %v330_v34, 7  ;;  %v1067_v18 = vrot.slane %v4132_v63, 1  ;;  %v1068_v28 = vrot.slane %v4123_v55, 1 }
  0x47   : > { %v4320_v51 = vsel %vm4016_vm5, 0, %v328_v60  ;;  %v1070_v33 = vrot.slane %v4141_v7, 1  ;;  %v1071_v41 = vrot.slane %v4128_v59, 1 }
  0x48   : > { %v585_v13 = vshrl.u32 %v4320_v51, 16  ;;  %v587_v14 = vshll.u32 %v4320_v51, 16  ;;  %v335_v16 = vor.u32 %v333_v58, %v332_v6  ;;  %v4334_v31 = vsel %vm4016_vm5, %v332_v6, 0 }
  0x49   : > { %3359 = vmatmul.mubr.msk.bf16.gmra.mrb[20].mxu1 %vm608_vm1, %v4298_v21  ;;  %v594_v36 = vrot.slane %v592_v54, 1  ;;  %v4344_v58 = vsel %vm419_vm4, %v578_v11, %v582_v10  ;;  %v604_v6 = vshll.u32 %v4334_v31, 16  ;;  %v4349_v4 = vsel %vm1049_vm6, %v1067_v18, %v1068_v28 }
  0x4a   : > { %3513 = vmatmul.mubr.msk.bf16.gmra.mrb[4].mxu0 %vm608_vm1, %v4303_v19  ;;  %3362 = vmatprep.mubr.msk.bf16.mxu1 %vm608_vm1, %v4306_v17  ;;  %v589_v42 = vrot.slane %v587_v14, 1  ;;  %v4339_v8 = vsel %vm4016_vm5, 0, %v335_v16  ;;  %v4355_v16 = vsel %vm1049_vm6, %v1070_v33, %v1071_v41  ;;  %v1073_v11 = vrot.slane %v4166_v39, 1 }
  0x4b   : > { %3516 = vmatprep.mubr.msk.bf16.mxu0 %vm608_vm1, %v4313_v53  ;;  %v599_v34 = vshll.u32 %v4339_v8, 16  ;;  %v597_v60 = vshrl.u32 %v4339_v8, 16  ;;  %v606_v10 = vrot.slane %v604_v6, 1  ;;  %v1076_v18 = vrot.slane %v4179_v47, 1  ;;  %v214_v6 = vld [vmem:[%s3992_s25 + $0xf8] sm:$0xff] }
  0x4c   : > { %v590_v55 = vor.u32 %v589_v42, %v585_v13  ;;  %v1074_v13 = vrot.slane %v4158_v32, 1  ;;  %v1077_v28 = vrot.slane %v4183_v49, 1  ;;  %v4842_v32 = vmov 0  }
  0x4d   : > { %v601_v54 = vrot.slane %v599_v34, 1  ;;  %v1079_v49 = vrot.slane %v4211_v43, 1  ;;  %v1080_v41 = vrot.slane %v4203_v20, 1  ;;  %v1082_v34 = vrot.slane %v4234_v2, 1  ;;  %v413_v20 = vld [vmem:[%s4835_s1 + $0x6] sm:$0x3] }
  0x4e   : > { %v4352_v14 = vsel %vm419_vm4, %v590_v55, %v594_v36  ;;  %v4373_v42 = vsel %vm1049_vm6, %v1073_v11, %v1074_v13  ;;  %v4376_v36 = vsel %vm1049_vm6, %v1076_v18, %v1077_v28  ;;  %v1083_v55 = vrot.slane %v4223_v46, 1 }
  0x4f   : > { %v602_v59 = vor.u32 %v601_v54, %v597_v60  ;;  %v213_v60 = vld [vmem:[%s3992_s25 + $0xf0] sm:$0xff]  ;;  %v1146_v54 = vsel %vm657_vm0, %v4088_v29, 0  ;;  %v1085_v29 = vrot.slane %v4257_v35, 1  ;;  %v1086_v46 = vrot.slane %v4242_v48, 1 }
  0x50   : > { %v230_v11 = vpack.c.bf16 %v214_v6, %v213_v60  ;;  %v1088_v13 = vrot.slane %v4271_v56, 1  ;;  %v1089_v18 = vrot.slane %v4287_v9, 1  ;;  %v1091_v48 = vrot.slane %v4320_v51, 1 }
  0x51   : > { %3363 = vmatmul.mubr.msk.bf16.gmra.mrb[24].mxu1 %vm608_vm1, %v4344_v58  ;;  %v4370_v33 = vsel %vm419_vm4, %v602_v59, %v606_v10  ;;  %v4394_v59 = vsel %vm1049_vm6, %v1079_v49, %v1080_v41  ;;  %v4397_v10 = vsel %vm1049_vm6, %v1082_v34, %v1083_v55  ;;  %v4416_v49 = vsel %vm1049_vm6, %v1085_v29, %v1086_v46 }
  0x52   : > { %3517 = vmatmul.mubr.msk.bf16.gmra.mrb[8].mxu0 %vm608_vm1, %v4349_v4  ;;  %3366 = vmatprep.mubr.msk.bf16.mxu1 %vm608_vm1, %v4352_v14  ;;  %v337_v28 = vshrl.u32 %v230_v11, 16  ;;  %v4419_v41 = vsel %vm1049_vm6, %v1088_v13, %v1089_v18  ;;  %v340_v55 = vshll.u32 %v230_v11, 16  ;;  %v1092_v9 = vrot.slane %v4310_v0, 1 }
  0x53   : > { %3520 = vmatprep.mubr.msk.bf16.mxu0 %vm608_vm1, %v4355_v16  ;;  %v1094_v60 = vrot.slane %v4339_v8, 1  ;;  %v1095_v6 = vrot.slane %v4334_v31, 1  ;;  %v2151_v18 = vsel %vm657_vm0, %v4278_v23, 0  ;;  %v1345_v23 = vsel %vm657_vm0, %v413_v20, 0 }
  0x54   : > { %v339_v34 = vrot.slane %v337_v28, 7  ;;  %v4434_v11 = vsel %vm1049_vm6, %v1091_v48, %v1092_v9  ;;  %v418_v28 = vld [vmem:[%s4835_s1 + $0x10] sm:$0x3] }
  0x55   : > { %v4437_v29 = vsel %vm1049_vm6, %v1094_v60, %v1095_v6 }
  0x56   : > { %v4445_v13 = vsel %vm4016_vm5, %v339_v34, 0 }
  0x57   : > { %v1753_v31 = vrot.slane %v4445_v13, 1 }
  0x59   : > { %3367 = vmatmul.mubr.msk.bf16.gmra.mrb[28].mxu1 %vm608_vm1, %v4370_v33 }
  0x5a   : > { %3521 = vmatmul.mubr.msk.bf16.gmra.mrb[12].mxu0 %vm608_vm1, %v4373_v42  ;;  %3372 = vmatprep.mubr.bf16.mxu1 %v4842_v32 }
  0x5b   : > { %3524 = vmatprep.mubr.msk.bf16.mxu0 %vm608_vm1, %v4376_v36 }
  0x61   : > { %3373 = vmatmul.mubr.msk.bf16.vlgmr.msra.gmra.mrb[0].mxu1 %vm608_vm1, %v4035_v50 }
  0x62   : > { %3405 = vmatpush3.bf16.msra.mxu1 %v1146_v54  ;;  %3525 = vmatmul.mubr.msk.bf16.gmra.mrb[16].mxu0 %vm608_vm1, %v4394_v59  ;;  %v342_v54 = vor.u32 %v340_v55, %v339_v34 }
  0x63   : > { %3376 = vmatprep.mubr.msk.bf16.mxu1 %vm608_vm1, %v4046_v57  ;;  %3528 = vmatprep.mubr.msk.bf16.mxu0 %vm608_vm1, %v4397_v10 }
  0x64   : > { %3903 = vmatprep.subr.msk.bf16.mxu1 %vm657_vm0, %v413_v20  ;;  %v4441_v46 = vsel %vm4016_vm5, 0, %v342_v54 }
  0x65   : > { %v1752_v0 = vrot.slane %v4441_v46, 1 }
  0x67   : > { %v4458_v37 = vsel %vm1049_vm6, %v1752_v0, %v1753_v31 }
  0x69   : > { %3377 = vmatmul.mubr.msk.bf16.gmra.mrb[4].mxu1 %vm608_vm1, %v4052_v61 }
  0x6a   : > { %3529 = vmatmul.mubr.msk.bf16.gmra.mrb[20].mxu0 %vm608_vm1, %v4416_v49  ;;  %3380 = vmatprep.mubr.msk.bf16.mxu1 %vm608_vm1, %v4064_v15 }
  0x6b   : > { %3532 = vmatprep.mubr.msk.bf16.mxu0 %vm608_vm1, %v4419_v41 }
  0x71   : > { %3381 = vmatmul.mubr.msk.bf16.gmra.mrb[8].mxu1 %vm608_vm1, %v4106_v22 }
  0x72   : > { %3533 = vmatmul.mubr.msk.bf16.gmra.mrb[24].mxu0 %vm608_vm1, %v4434_v11  ;;  %3384 = vmatprep.mubr.msk.bf16.mxu1 %vm608_vm1, %v4132_v63 }
  0x73   : > { %3536 = vmatprep.mubr.msk.bf16.mxu0 %vm608_vm1, %v4437_v29 }
  0x79   : > { %3385 = vmatmul.mubr.msk.bf16.gmra.mrb[12].mxu1 %vm608_vm1, %v4141_v7 }
  0x7a   : > { %3537 = vmatmul.mubr.msk.bf16.gmra.mrb[28].mxu0 %vm608_vm1, %v4458_v37  ;;  %3388 = vmatprep.mubr.msk.bf16.mxu1 %vm608_vm1, %v4166_v39 }
  0x7b   : > { %3542 = vmatprep.mubr.msk.bf16.mxu0 %vm608_vm1, %v4046_v57 }
  0x81   : > { %3389 = vmatmul.mubr.msk.bf16.gmra.mrb[16].mxu1 %vm608_vm1, %v4179_v47 }
  0x82   : > { %3543 = vmatmul.mubr.msk.bf16.vlgmr.msra.gmra.mrb[0].mxu0 %vm608_vm1, %v4052_v61  ;;  %3392 = vmatprep.mubr.msk.bf16.mxu1 %vm608_vm1, %v4211_v43 }
  0x83   : > { %3575 = vmatpush3.bf16.msra.mxu0 %v2151_v18  ;;  %3546 = vmatprep.mubr.msk.bf16.mxu0 %vm608_vm1, %v4064_v15 }
  0x84   : > { %3909 = vmatprep.subr.msk.bf16.mxu0 %vm657_vm0, %v418_v28 }
  0x89   : > { %3393 = vmatmul.mubr.msk.bf16.gmra.mrb[20].mxu1 %vm608_vm1, %v4234_v2 }
  0x8a   : > { %3547 = vmatmul.mubr.msk.bf16.gmra.mrb[4].mxu0 %vm608_vm1, %v4106_v22  ;;  %3396 = vmatprep.mubr.msk.bf16.mxu1 %vm608_vm1, %v4257_v35 }
  0x8b   : > { %3550 = vmatprep.mubr.msk.bf16.mxu0 %vm608_vm1, %v4132_v63 }
  0x91   : > { %3397 = vmatmul.mubr.msk.bf16.gmra.mrb[24].mxu1 %vm608_vm1, %v4271_v56 }
  0x92   : > { %3551 = vmatmul.mubr.msk.bf16.gmra.mrb[8].mxu0 %vm608_vm1, %v4141_v7  ;;  %3400 = vmatprep.mubr.msk.bf16.mxu1 %vm608_vm1, %v4320_v51 }
  0x93   : > { %3554 = vmatprep.mubr.msk.bf16.mxu0 %vm608_vm1, %v4166_v39 }
  0x99   : > { %3401 = vmatmul.mubr.msk.bf16.gmra.mrb[28].mxu1 %vm608_vm1, %v4339_v8 }
  0x9a   : > { %3555 = vmatmul.mubr.msk.bf16.gmra.mrb[12].mxu0 %vm608_vm1, %v4179_v47  ;;  %3406 = vmatprep.mubr.msk.bf16.mxu1 %vm608_vm1, %v3973_v5 }
  0x9b   : > { %3558 = vmatprep.mubr.msk.bf16.mxu0 %vm608_vm1, %v4211_v43 }
  0xa1   : > { %3407 = vmatmul.mubr.msk.bf16.vlgmr.msra.gmra.mrb[0].mxu1 %vm608_vm1, %v4215_v40 }
  0xa2   : > { %3439 = vmatpush3.bf16.msra.mxu1 %v1345_v23  ;;  %3559 = vmatmul.mubr.msk.bf16.gmra.mrb[16].mxu0 %vm608_vm1, %v4234_v2 }
  0xa3   : > { %3410 = vmatprep.mubr.msk.bf16.mxu1 %vm608_vm1, %v4248_v27  ;;  %3562 = vmatprep.mubr.msk.bf16.mxu0 %vm608_vm1, %v4257_v35 }
  0xa4   : > { %3905 = vmatprep.subr.msk.bf16.mxu1 %vm657_vm0, %v3962_v1  ;;  %v2347_v1 = vsel %vm657_vm0, %v418_v28, 0 }
  0xa9   : > { %3411 = vmatmul.mubr.msk.bf16.gmra.mrb[4].mxu1 %vm608_vm1, %v4263_v62 }
  0xaa   : > { %3563 = vmatmul.mubr.msk.bf16.gmra.mrb[20].mxu0 %vm608_vm1, %v4271_v56  ;;  %3414 = vmatprep.mubr.msk.bf16.mxu1 %vm608_vm1, %v4303_v19 }
  0xab   : > { %3566 = vmatprep.mubr.msk.bf16.mxu0 %vm608_vm1, %v4320_v51 }
  0xb1   : > { %3415 = vmatmul.mubr.msk.bf16.gmra.mrb[8].mxu1 %vm608_vm1, %v4313_v53 }
  0xb2   : > { %3567 = vmatmul.mubr.msk.bf16.gmra.mrb[24].mxu0 %vm608_vm1, %v4339_v8  ;;  %3418 = vmatprep.mubr.msk.bf16.mxu1 %vm608_vm1, %v4349_v4 }
  0xb3   : > { %3570 = vmatprep.mubr.msk.bf16.mxu0 %vm608_vm1, %v4441_v46 }
  0xb9   : > { %3419 = vmatmul.mubr.msk.bf16.gmra.mrb[12].mxu1 %vm608_vm1, %v4355_v16 }
  0xba   : > { %3571 = vmatmul.mubr.bf16.gmra.mrb[28].mxu0 %v4842_v32  ;;  %3422 = vmatprep.mubr.msk.bf16.mxu1 %vm608_vm1, %v4373_v42 }
  0xbb   : > { %3576 = vmatprep.mubr.msk.bf16.mxu0 %vm608_vm1, %v4081_v24  ;;  %v1542_v24 = vshll.u32 %v4441_v46, 16 }
  0xc1   : > { %3423 = vmatmul.mubr.msk.bf16.gmra.mrb[16].mxu1 %vm608_vm1, %v4376_v36 }
  0xc2   : > { %3577 = vmatmul.mubr.msk.bf16.vlgmr.msra.gmra.mrb[0].mxu0 %vm608_vm1, %v4094_v30  ;;  %3426 = vmatprep.mubr.msk.bf16.mxu1 %vm608_vm1, %v4394_v59  ;;  %v1544_v30 = vrot.slane %v1542_v24, 1 }
  0xc3   : > { %3609 = vmatpush3.bf16.msra.mxu0 %v2347_v1  ;;  %3580 = vmatprep.mubr.msk.bf16.mxu0 %vm608_vm1, %v4119_v45  ;;  %v1547_v45 = vshll.u32 %v4445_v13, 16 }
  0xc9   : > { %3427 = vmatmul.mubr.msk.bf16.gmra.mrb[20].mxu1 %vm608_vm1, %v4397_v10 }
  0xca   : > { %3581 = vmatmul.mubr.msk.bf16.gmra.mrb[4].mxu0 %vm608_vm1, %v4150_v12  ;;  %3430 = vmatprep.mubr.msk.bf16.mxu1 %vm608_vm1, %v4416_v49 }
  0xcb   : > { %3584 = vmatprep.mubr.msk.bf16.mxu0 %vm608_vm1, %v4162_v38 }
  0xd1   : > { %3431 = vmatmul.mubr.msk.bf16.gmra.mrb[24].mxu1 %vm608_vm1, %v4419_v41 }
  0xd2   : > { %3585 = vmatmul.mubr.msk.bf16.gmra.mrb[8].mxu0 %vm608_vm1, %v4171_v44  ;;  %3434 = vmatprep.mubr.msk.bf16.mxu1 %vm608_vm1, %v4434_v11 }
  0xd3   : > { %3588 = vmatprep.mubr.msk.bf16.mxu0 %vm608_vm1, %v4206_v25 }
  0xd9   : > { %3435 = vmatmul.mubr.msk.bf16.gmra.mrb[28].mxu1 %vm608_vm1, %v4437_v29 }
  0xda   : > { %3589 = vmatmul.mubr.msk.bf16.gmra.mrb[12].mxu0 %vm608_vm1, %v4245_v26  ;;  %3440 = vmatprep.mubr.msk.bf16.mxu1 %vm608_vm1, %v4035_v50  ;;  %v1540_v50 = vshrl.u32 %v4441_v46, 16 }
  0xdb   : > { %3592 = vmatprep.mubr.msk.bf16.mxu0 %vm608_vm1, %v4253_v52 }
  0xe1   : > { %3441 = vmatmul.mubr.msk.bf16.vlgmr.msra.gmra.mrb[0].mxu1 %vm608_vm1, %v4046_v57  ;;  %v1549_v57 = vrot.slane %v1547_v45, 1 }
  0xe2   : > { %3643 = vmatpush3.bf16.msra.mxu1 %v3970_v3  ;;  %3593 = vmatmul.mubr.msk.bf16.gmra.mrb[16].mxu0 %vm608_vm1, %v4298_v21  ;;  %v1545_v3 = vor.u32 %v1544_v30, %v1540_v50 }
  0xe3   : > { %3444 = vmatprep.mubr.msk.bf16.mxu1 %vm608_vm1, %v4052_v61  ;;  %3596 = vmatprep.mubr.msk.bf16.mxu0 %vm608_vm1, %v4306_v17 }
  0xe4   : > { %v1550_v61 = vsel %vm419_vm4, %v1545_v3, %v1549_v57 }
  0xe9   : > { %3445 = vmatmul.mubr.msk.bf16.gmra.mrb[4].mxu1 %vm608_vm1, %v4064_v15 }
  0xea   : > { %3597 = vmatmul.mubr.msk.bf16.gmra.mrb[20].mxu0 %vm608_vm1, %v4344_v58  ;;  %3448 = vmatprep.mubr.msk.bf16.mxu1 %vm608_vm1, %v4106_v22 }
  0xeb   : > { %3600 = vmatprep.mubr.msk.bf16.mxu0 %vm608_vm1, %v4352_v14 }
  0xf1   : > { %3449 = vmatmul.mubr.msk.bf16.gmra.mrb[8].mxu1 %vm608_vm1, %v4132_v63 }
  0xf2   : > { %3601 = vmatmul.mubr.msk.bf16.gmra.mrb[24].mxu0 %vm608_vm1, %v4370_v33  ;;  %3452 = vmatprep.mubr.msk.bf16.mxu1 %vm608_vm1, %v4141_v7 }
  0xf3   : > { %3604 = vmatprep.mubr.msk.bf16.mxu0 %vm608_vm1, %v1550_v61 }
  0xf9   : > { %3453 = vmatmul.mubr.msk.bf16.gmra.mrb[12].mxu1 %vm608_vm1, %v4166_v39 }
  0xfa   : > { %3605 = vmatmul.mubr.msk.bf16.gmra.mrb[28].mxu0 %vm608_vm1, %v3973_v5  ;;  %3456 = vmatprep.mubr.msk.bf16.mxu1 %vm608_vm1, %v4179_v47 }
  0xfb   : > { %3610 = vmatprep.mubr.msk.bf16.mxu0 %vm608_vm1, %v4248_v27 }
 0x101   : > { %3457 = vmatmul.mubr.msk.bf16.gmra.mrb[16].mxu1 %vm608_vm1, %v4211_v43 }
 0x102   : > { %3611 = vmatmul.mubr.msk.bf16.vlgmr.msra.gmra.mrb[0].mxu0 %vm608_vm1, %v4263_v62  ;;  %3460 = vmatprep.mubr.msk.bf16.mxu1 %vm608_vm1, %v4234_v2 }
 0x103   : > { %3614 = vmatprep.mubr.msk.bf16.mxu0 %vm608_vm1, %v4303_v19 }
 0x109   : > { %3461 = vmatmul.mubr.msk.bf16.gmra.mrb[20].mxu1 %vm608_vm1, %v4257_v35 }
 0x10a   : > { %3615 = vmatmul.mubr.msk.bf16.gmra.mrb[4].mxu0 %vm608_vm1, %v4313_v53  ;;  %3464 = vmatprep.mubr.msk.bf16.mxu1 %vm608_vm1, %v4271_v56 }
 0x10b   : > { %3618 = vmatprep.mubr.msk.bf16.mxu0 %vm608_vm1, %v4349_v4 }
 0x111   : > { %3465 = vmatmul.mubr.msk.bf16.gmra.mrb[24].mxu1 %vm608_vm1, %v4320_v51 }
 0x112   : > { %3619 = vmatmul.mubr.msk.bf16.gmra.mrb[8].mxu0 %vm608_vm1, %v4355_v16  ;;  %3468 = vmatprep.mubr.msk.bf16.mxu1 %vm608_vm1, %v4339_v8 }
 0x113   : > { %3622 = vmatprep.mubr.msk.bf16.mxu0 %vm608_vm1, %v4373_v42 }
 0x119   : > { %3469 = vmatmul.mubr.msk.bf16.gmra.mrb[28].mxu1 %vm608_vm1, %v4441_v46 }
 0x11a   : > { %3623 = vmatmul.mubr.msk.bf16.gmra.mrb[12].mxu0 %vm608_vm1, %v4376_v36  ;;  %3490 = vmatprep.mubr.msk.bf16.mxu1 %vm608_vm1, %v4245_v26 }
 0x11b   : > { %3626 = vmatprep.mubr.msk.bf16.mxu0 %vm608_vm1, %v4394_v59 }
 0x121   : > { %3491 = vmatmul.mubr.msk.bf16.vlgmr.msra.gmra.mrb[16].mxu1 %vm608_vm1, %v4253_v52 }
 0x122   : > { %3627 = vmatmul.mubr.msk.bf16.gmra.mrb[16].mxu0 %vm608_vm1, %v4397_v10  ;;  %3494 = vmatprep.mubr.msk.bf16.mxu1 %vm608_vm1, %v4298_v21 }
 0x123   : > { %3630 = vmatprep.mubr.msk.bf16.mxu0 %vm608_vm1, %v4416_v49 }
 0x129   : > { %3495 = vmatmul.mubr.msk.bf16.gmra.mrb[20].mxu1 %vm608_vm1, %v4306_v17 }
 0x12a   : > { %3631 = vmatmul.mubr.msk.bf16.gmra.mrb[20].mxu0 %vm608_vm1, %v4419_v41  ;;  %3498 = vmatprep.mubr.msk.bf16.mxu1 %vm608_vm1, %v4344_v58 }
 0x12b   : > { %3634 = vmatprep.mubr.msk.bf16.mxu0 %vm608_vm1, %v4434_v11 }
 0x131   : > { %3499 = vmatmul.mubr.msk.bf16.gmra.mrb[24].mxu1 %vm608_vm1, %v4352_v14 }
 0x132   : > { %3635 = vmatmul.mubr.msk.bf16.gmra.mrb[24].mxu0 %vm608_vm1, %v4437_v29  ;;  %3502 = vmatprep.mubr.msk.bf16.mxu1 %vm608_vm1, %v4370_v33 }
 0x133   : > { %3638 = vmatprep.mubr.msk.bf16.mxu0 %vm608_vm1, %v4458_v37 }
 0x139   : > { %3503 = vmatmul.mubr.msk.bf16.gmra.mrb[28].mxu1 %vm608_vm1, %v1550_v61 }
 0x13a   : > { %3639 = vmatmul.mubr.msk.bf16.gmra.mrb[28].mxu0 %vm608_vm1, %v3973_v5 }
 0x1b4   : > { %v3442_v4 = vpop.f32.mrb[0].mxu1 }
 0x1b5   : > { %v1381_v15 = vpop.f32.mrb[1].mxu1 }
 0x1b6   : > { %v3443_v22 = vpop.f32.mrb[2].mxu1 }
 0x1b7   : > { %v1384_v63 = vpop.f32.mrb[3].mxu1 }
 0x1bc   : > { %v3446_v7 = vpop.f32.mrb[4].mxu1 }
 0x1bd   : > { %v1397_v12 = vpop.f32.mrb[5].mxu1 }
 0x1be   : > { %v3447_v38 = vpop.f32.mrb[6].mxu1 }
 0x1bf   : > { %v1400_v39 = vpop.f32.mrb[7].mxu1 }
 0x1c4   : > { %v4668_v44 = vpop.f32.mrb[8].mxu1 }
 0x1c5   : > { %v4670_v47 = vpop.f32.mrb[9].mxu1 }
 0x1c6   : > { %v4672_v25 = vpop.f32.mrb[10].mxu1 }
 0x1c7   : > { %v4674_v43 = vpop.f32.mrb[11].mxu1 }
 0x1cc   : > { %v4676_v40 = vpop.f32.mrb[12].mxu1 }
 0x1cd   : > { %v4678_v5 = vpop.f32.mrb[13].mxu1 }
 0x1ce   : > { %v4680_v2 = vpop.f32.mrb[14].mxu1 }
 0x1cf   : > { %v4682_v26 = vpop.f32.mrb[15].mxu1 }
 0x1d5   : > { %v3612_v27 = vpop.f32.mrb[0].mxu0 }
 0x1d6   : > { %v3644_v52 = vadd.f32 %v3612_v27, %v3442_v4  ;;  %v2383_v35 = vpop.f32.mrb[1].mxu0 }
 0x1d7   : > { %v3645_v62 = vadd.f32 %v2383_v35, %v1381_v15  ;;  %v3613_v56 = vpop.f32.mrb[2].mxu0 }
 0x1d8   : > { %v3153_v21 = vpack.c.bf16 %v3644_v52, %v3644_v52  ;;  %v3646_v19 = vadd.f32 %v3613_v56, %v3443_v22  ;;  %v2386_v17 = vpop.f32.mrb[3].mxu0  ;;  %v2774_v58 = vmul.f32 %v3644_v52, %v3644_v52  ;;  %v2706_v10 = vsel %vm608_vm1, %v3644_v52, 0.0 }
 0x1d9   : > { %v3151_v53 = vpack.c.bf16 %v3645_v62, %v3645_v62  ;;  %v2772_v51 = vmul.f32 %v3645_v62, %v3645_v62  ;;  %v3647_v8 = vadd.f32 %v2386_v17, %v1384_v63  ;;  %v2703_v16 = vsel %vm608_vm1, %v3645_v62, 0.0 }
 0x1da   : > { %2673 = vst.msk [vmem:[%s4688_s14 + $0x8] sm:$0xf] %vm2670_vm7, %v3153_v21  ;;  %v3154_v14 = vpack.c.bf16 %v3646_v19, %v3646_v19  ;;  %v2775_v32 = vmul.f32 %v3646_v19, %v3646_v19  ;;  %v2807_v60 = vsel %vm608_vm1, %v2774_v58, 0.0  ;;  %v2708_v11 = vsel %vm608_vm1, %v3646_v19, 0.0 }
 0x1db   : > { %2671 = vst.msk [vmem:[%s4688_s14] sm:$0xf] %vm2670_vm7, %v3151_v53  ;;  %v3152_v33 = vpack.c.bf16 %v3647_v8, %v3647_v8  ;;  %v2704_v42 = vsel %vm608_vm1, %v3647_v8, 0.0  ;;  %v2773_v36 = vmul.f32 %v3647_v8, %v3647_v8  ;;  %v2804_v20 = vsel %vm608_vm1, %v2772_v51, 0.0 }
 0x1dc   : > { %2674 = vst.msk [vmem:[%s4688_s14 + $0xc] sm:$0xf] %vm2670_vm7, %v3154_v14  ;;  %v2705_v59 = vadd.f32 %v2704_v42, %v2703_v16  ;;  %v2809_v29 = vsel %vm608_vm1, %v2775_v32, 0.0 }
 0x1dd   : > { %2672 = vst.msk [vmem:[%s4688_s14 + $0x4] sm:$0xf] %vm2670_vm7, %v3152_v33  ;;  %v2805_v49 = vsel %vm608_vm1, %v2773_v36, 0.0  ;;  %v3616_v41 = vpop.f32.mrb[4].mxu0 }
 0x1de   : > { %v2707_v34 = vadd.f32 %v2706_v10, %v2705_v59  ;;  %v2806_v55 = vadd.f32 %v2805_v49, %v2804_v20  ;;  %v3648_v48 = vadd.f32 %v3616_v41, %v3446_v7  ;;  %v2399_v9 = vpop.f32.mrb[5].mxu0 }
 0x1df   : > { %v3649_v6 = vadd.f32 %v2399_v9, %v1397_v12  ;;  %v3617_v54 = vpop.f32.mrb[6].mxu0 }
 0x1e0   : > { %v2808_v46 = vadd.f32 %v2807_v60, %v2806_v55  ;;  %v3157_v13 = vpack.c.bf16 %v3648_v48, %v3648_v48  ;;  %v2402_v0 = vpop.f32.mrb[7].mxu0  ;;  %v2709_v37 = vadd.f32 %v2708_v11, %v2707_v34  ;;  %v3650_v1 = vadd.f32 %v3617_v54, %v3447_v38 }
 0x1e1   : > { %v3155_v31 = vpack.c.bf16 %v3649_v6, %v3649_v6  ;;  %v2710_v18 = vsel %vm608_vm1, %v3649_v6, 0.0  ;;  %v2776_v28 = vmul.f32 %v3649_v6, %v3649_v6  ;;  %v3651_v24 = vadd.f32 %v2402_v0, %v1400_v39 }
 0x1e2   : > { %2677 = vst.msk [vmem:[%s4688_s14 + $0x18] sm:$0xf] %vm2670_vm7, %v3157_v13  ;;  %v2810_v23 = vadd.f32 %v2809_v29, %v2808_v46  ;;  %v2711_v50 = vadd.f32 %v2710_v18, %v2709_v37  ;;  %v2778_v45 = vmul.f32 %v3648_v48, %v3648_v48  ;;  %v3158_v57 = vpack.c.bf16 %v3650_v1, %v3650_v1 }
 0x1e3   : > { %2675 = vst.msk [vmem:[%s4688_s14 + $0x10] sm:$0xf] %vm2670_vm7, %v3155_v31  ;;  %v2811_v30 = vsel %vm608_vm1, %v2776_v28, 0.0  ;;  %v3156_v61 = vpack.c.bf16 %v3651_v24, %v3651_v24  ;;  %v2712_v4 = vsel %vm608_vm1, %v3651_v24, 0.0  ;;  %v2777_v15 = vmul.f32 %v3651_v24, %v3651_v24 }
 0x1e4   : > { %v2812_v3 = vadd.f32 %v2811_v30, %v2810_v23  ;;  %2678 = vst.msk [vmem:[%s4688_s14 + $0x1c] sm:$0xf] %vm2670_vm7, %v3158_v57  ;;  %v2713_v63 = vadd.f32 %v2712_v4, %v2711_v50  ;;  %v2714_v38 = vsel %vm608_vm1, %v3648_v48, 0.0  ;;  %v2779_v39 = vmul.f32 %v3650_v1, %v3650_v1 }
 0x1e5   : > { %v3620_v22 = vpop.f32.mrb[8].mxu0  ;;  %2676 = vst.msk [vmem:[%s4688_s14 + $0x14] sm:$0xf] %vm2670_vm7, %v3156_v61  ;;  %v2813_v27 = vsel %vm608_vm1, %v2777_v15, 0.0  ;;  %v2815_v62 = vsel %vm608_vm1, %v2778_v45, 0.0 }
 0x1e6   : > { %v3652_v7 = vadd.f32 %v3620_v22, %v4668_v44  ;;  %v2415_v12 = vpop.f32.mrb[9].mxu0  ;;  %v2715_v56 = vadd.f32 %v2714_v38, %v2713_v63  ;;  %v2814_v21 = vadd.f32 %v2813_v27, %v2812_v3  ;;  %v2716_v44 = vsel %vm608_vm1, %v3650_v1, 0.0 }
 0x1e7   : > { %v3653_v52 = vadd.f32 %v2415_v12, %v4670_v47  ;;  %v3621_v35 = vpop.f32.mrb[10].mxu0  ;;  %v2817_v33 = vsel %vm608_vm1, %v2779_v39, 0.0 }
 0x1e8   : > { %v3161_v19 = vpack.c.bf16 %v3652_v7, %v3652_v7  ;;  %v2418_v17 = vpop.f32.mrb[11].mxu0  ;;  %v2816_v58 = vadd.f32 %v2815_v62, %v2814_v21  ;;  %v2717_v14 = vadd.f32 %v2716_v44, %v2715_v56  ;;  %v3654_v47 = vadd.f32 %v3621_v35, %v4672_v25 }
 0x1e9   : > { %v3159_v53 = vpack.c.bf16 %v3653_v52, %v3653_v52  ;;  %v2718_v51 = vsel %vm608_vm1, %v3653_v52, 0.0  ;;  %v2780_v8 = vmul.f32 %v3653_v52, %v3653_v52  ;;  %v3655_v16 = vadd.f32 %v2418_v17, %v4674_v43 }
 0x1ea   : > { %2681 = vst.msk [vmem:[%s4688_s14 + $0x28] sm:$0xf] %vm2670_vm7, %v3161_v19  ;;  %v2782_v36 = vmul.f32 %v3652_v7, %v3652_v7  ;;  %v2719_v32 = vadd.f32 %v2718_v51, %v2717_v14  ;;  %v2818_v59 = vadd.f32 %v2817_v33, %v2816_v58  ;;  %v3162_v10 = vpack.c.bf16 %v3654_v47, %v3654_v47 }
 0x1eb   : > { %2679 = vst.msk [vmem:[%s4688_s14 + $0x20] sm:$0xf] %vm2670_vm7, %v3159_v53  ;;  %v2819_v42 = vsel %vm608_vm1, %v2780_v8, 0.0  ;;  %v3160_v20 = vpack.c.bf16 %v3655_v16, %v3655_v16  ;;  %v2720_v49 = vsel %vm608_vm1, %v3655_v16, 0.0  ;;  %v2781_v41 = vmul.f32 %v3655_v16, %v3655_v16 }
 0x1ec   : > { %v2820_v55 = vadd.f32 %v2819_v42, %v2818_v59  ;;  %2682 = vst.msk [vmem:[%s4688_s14 + $0x2c] sm:$0xf] %vm2670_vm7, %v3162_v10  ;;  %v2721_v25 = vadd.f32 %v2720_v49, %v2719_v32  ;;  %v2722_v9 = vsel %vm608_vm1, %v3652_v7, 0.0  ;;  %v2783_v60 = vmul.f32 %v3654_v47, %v3654_v47 }
 0x1ed   : > { %v3624_v34 = vpop.f32.mrb[12].mxu0  ;;  %2680 = vst.msk [vmem:[%s4688_s14 + $0x24] sm:$0xf] %vm2670_vm7, %v3160_v20  ;;  %v2821_v6 = vsel %vm608_vm1, %v2781_v41, 0.0  ;;  %v2823_v29 = vsel %vm608_vm1, %v2782_v36, 0.0 }
 0x1ee   : > { %v3656_v43 = vadd.f32 %v3624_v34, %v4676_v40  ;;  %v2431_v48 = vpop.f32.mrb[13].mxu0  ;;  %v2723_v46 = vadd.f32 %v2722_v9, %v2721_v25  ;;  %v2822_v13 = vadd.f32 %v2821_v6, %v2820_v55  ;;  %v2724_v40 = vsel %vm608_vm1, %v3654_v47, 0.0 }
 0x1ef   : > { %v3657_v54 = vadd.f32 %v2431_v48, %v4678_v5  ;;  %v3625_v11 = vpop.f32.mrb[14].mxu0  ;;  %v2825_v50 = vsel %vm608_vm1, %v2783_v60, 0.0 }
 0x1f0   : > { %v3165_v0 = vpack.c.bf16 %v3656_v43, %v3656_v43  ;;  %v2434_v31 = vpop.f32.mrb[15].mxu0  ;;  %v2824_v23 = vadd.f32 %v2823_v29, %v2822_v13  ;;  %v2725_v1 = vadd.f32 %v2724_v40, %v2723_v46  ;;  %v3658_v5 = vadd.f32 %v3625_v11, %v4680_v2 }
 0x1f1   : > { %v3163_v37 = vpack.c.bf16 %v3657_v54, %v3657_v54  ;;  %v2726_v18 = vsel %vm608_vm1, %v3657_v54, 0.0  ;;  %v2784_v28 = vmul.f32 %v3657_v54, %v3657_v54  ;;  %v3659_v24 = vadd.f32 %v2434_v31, %v4682_v26 }
 0x1f2   : > { %2685 = vst.msk [vmem:[%s4688_s14 + $0x38] sm:$0xf] %vm2670_vm7, %v3165_v0  ;;  %v2786_v45 = vmul.f32 %v3656_v43, %v3656_v43  ;;  %v2727_v3 = vadd.f32 %v2726_v18, %v2725_v1  ;;  %v2826_v57 = vadd.f32 %v2825_v50, %v2824_v23  ;;  %v3166_v61 = vpack.c.bf16 %v3658_v5, %v3658_v5 }
 0x1f3   : > { %2683 = vst.msk [vmem:[%s4688_s14 + $0x30] sm:$0xf] %vm2670_vm7, %v3163_v37  ;;  %v2827_v30 = vsel %vm608_vm1, %v2784_v28, 0.0  ;;  %v3164_v15 = vpack.c.bf16 %v3659_v24, %v3659_v24  ;;  %v2728_v22 = vsel %vm608_vm1, %v3659_v24, 0.0  ;;  %v2785_v63 = vmul.f32 %v3659_v24, %v3659_v24 }
 0x1f4   : > { %v3492_v4 = vpop.f32.mrb[16].mxu1  ;;  %v2828_v12 = vadd.f32 %v2827_v30, %v2826_v57  ;;  %2686 = vst.msk [vmem:[%s4688_s14 + $0x3c] sm:$0xf] %vm2670_vm7, %v3166_v61  ;;  %v2729_v26 = vadd.f32 %v2728_v22, %v2727_v3  ;;  %v2730_v52 = vsel %vm608_vm1, %v3656_v43, 0.0  ;;  %v2787_v35 = vmul.f32 %v3658_v5, %v3658_v5 }
 0x1f5   : > { %v1655_v2 = vpop.f32.mrb[17].mxu1  ;;  %v3628_v7 = vpop.f32.mrb[16].mxu0  ;;  %2684 = vst.msk [vmem:[%s4688_s14 + $0x34] sm:$0xf] %vm2670_vm7, %v3164_v15  ;;  %v2829_v62 = vsel %vm608_vm1, %v2785_v63, 0.0  ;;  %v2831_v17 = vsel %vm608_vm1, %v2786_v45, 0.0 }
 0x1f6   : > { %v3660_v38 = vadd.f32 %v3628_v7, %v3492_v4  ;;  %v3493_v39 = vpop.f32.mrb[18].mxu1  ;;  %v2447_v27 = vpop.f32.mrb[17].mxu0  ;;  %v2731_v44 = vadd.f32 %v2730_v52, %v2729_v26  ;;  %v2830_v53 = vadd.f32 %v2829_v62, %v2828_v12  ;;  %v2732_v58 = vsel %vm608_vm1, %v3658_v5, 0.0 }
 0x1f7   : > { %v3661_v56 = vadd.f32 %v2447_v27, %v1655_v2  ;;  %v1658_v21 = vpop.f32.mrb[19].mxu1  ;;  %v3629_v19 = vpop.f32.mrb[18].mxu0  ;;  %v2833_v59 = vsel %vm608_vm1, %v2787_v35, 0.0 }
 0x1f8   : > { %v3169_v51 = vpack.c.bf16 %v3660_v38, %v3660_v38  ;;  %v2450_v8 = vpop.f32.mrb[19].mxu0  ;;  %v2832_v33 = vadd.f32 %v2831_v17, %v2830_v53  ;;  %v2733_v42 = vadd.f32 %v2732_v58, %v2731_v44  ;;  %v3662_v36 = vadd.f32 %v3629_v19, %v3493_v39 }
 0x1f9   : > { %v3167_v14 = vpack.c.bf16 %v3661_v56, %v3661_v56  ;;  %v2734_v47 = vsel %vm608_vm1, %v3661_v56, 0.0  ;;  %v2788_v16 = vmul.f32 %v3661_v56, %v3661_v56  ;;  %v3663_v32 = vadd.f32 %v2450_v8, %v1658_v21 }
 0x1fa   : > { %2689 = vst.msk [vmem:[%s4688_s14 + $0x48] sm:$0xf] %vm2670_vm7, %v3169_v51  ;;  %v2790_v20 = vmul.f32 %v3660_v38, %v3660_v38  ;;  %v2735_v49 = vadd.f32 %v2734_v47, %v2733_v42  ;;  %v2834_v41 = vadd.f32 %v2833_v59, %v2832_v33  ;;  %v3170_v34 = vpack.c.bf16 %v3662_v36, %v3662_v36 }
 0x1fb   : > { %2687 = vst.msk [vmem:[%s4688_s14 + $0x40] sm:$0xf] %vm2670_vm7, %v3167_v14  ;;  %v2835_v10 = vsel %vm608_vm1, %v2788_v16, 0.0  ;;  %v3168_v25 = vpack.c.bf16 %v3663_v32, %v3663_v32  ;;  %v2736_v43 = vsel %vm608_vm1, %v3663_v32, 0.0  ;;  %v2789_v48 = vmul.f32 %v3663_v32, %v3663_v32 }
 0x1fc   : > { %v3496_v55 = vpop.f32.mrb[20].mxu1  ;;  %v2836_v6 = vadd.f32 %v2835_v10, %v2834_v41  ;;  %2690 = vst.msk [vmem:[%s4688_s14 + $0x4c] sm:$0xf] %vm2670_vm7, %v3170_v34  ;;  %v2737_v54 = vadd.f32 %v2736_v43, %v2735_v49  ;;  %v2738_v13 = vsel %vm608_vm1, %v3660_v38, 0.0  ;;  %v2791_v0 = vmul.f32 %v3662_v36, %v3662_v36 }
 0x1fd   : > { %v1671_v9 = vpop.f32.mrb[21].mxu1  ;;  %v3632_v60 = vpop.f32.mrb[20].mxu0  ;;  %2688 = vst.msk [vmem:[%s4688_s14 + $0x44] sm:$0xf] %vm2670_vm7, %v3168_v25  ;;  %v2837_v31 = vsel %vm608_vm1, %v2789_v48, 0.0  ;;  %v2839_v28 = vsel %vm608_vm1, %v2790_v20, 0.0 }
 0x1fe   : > { %v3664_v11 = vadd.f32 %v3632_v60, %v3496_v55  ;;  %v3497_v29 = vpop.f32.mrb[22].mxu1  ;;  %v2463_v46 = vpop.f32.mrb[21].mxu0  ;;  %v2739_v23 = vadd.f32 %v2738_v13, %v2737_v54  ;;  %v2838_v1 = vadd.f32 %v2837_v31, %v2836_v6  ;;  %v2740_v50 = vsel %vm608_vm1, %v3662_v36, 0.0 }
 0x1ff   : > { %v3665_v40 = vadd.f32 %v2463_v46, %v1671_v9  ;;  %v1674_v37 = vpop.f32.mrb[23].mxu1  ;;  %v3633_v18 = vpop.f32.mrb[22].mxu0  ;;  %v2841_v22 = vsel %vm608_vm1, %v2791_v0, 0.0 }
 0x200   : > { %v3173_v5 = vpack.c.bf16 %v3664_v11, %v3664_v11  ;;  %v2466_v24 = vpop.f32.mrb[23].mxu0  ;;  %v2840_v57 = vadd.f32 %v2839_v28, %v2838_v1  ;;  %v2741_v61 = vadd.f32 %v2740_v50, %v2739_v23  ;;  %v3666_v4 = vadd.f32 %v3633_v18, %v3497_v29 }
 0x201   : > { %v3171_v30 = vpack.c.bf16 %v3665_v40, %v3665_v40  ;;  %v2742_v45 = vsel %vm608_vm1, %v3665_v40, 0.0  ;;  %v2792_v3 = vmul.f32 %v3665_v40, %v3665_v40  ;;  %v3667_v15 = vadd.f32 %v2466_v24, %v1674_v37 }
 0x202   : > { %2693 = vst.msk [vmem:[%s4688_s14 + $0x58] sm:$0xf] %vm2670_vm7, %v3173_v5  ;;  %v2794_v2 = vmul.f32 %v3664_v11, %v3664_v11  ;;  %v2743_v7 = vadd.f32 %v2742_v45, %v2741_v61  ;;  %v2842_v12 = vadd.f32 %v2841_v22, %v2840_v57  ;;  %v3174_v26 = vpack.c.bf16 %v3666_v4, %v3666_v4 }
 0x203   : > { %2691 = vst.msk [vmem:[%s4688_s14 + $0x50] sm:$0xf] %vm2670_vm7, %v3171_v30  ;;  %v2843_v63 = vsel %vm608_vm1, %v2792_v3, 0.0  ;;  %v3172_v39 = vpack.c.bf16 %v3667_v15, %v3667_v15  ;;  %v2744_v27 = vsel %vm608_vm1, %v3667_v15, 0.0  ;;  %v2793_v52 = vmul.f32 %v3667_v15, %v3667_v15 }
 0x204   : > { %v3500_v38 = vpop.f32.mrb[24].mxu1  ;;  %v2844_v56 = vadd.f32 %v2843_v63, %v2842_v12  ;;  %2694 = vst.msk [vmem:[%s4688_s14 + $0x5c] sm:$0xf] %vm2670_vm7, %v3174_v26  ;;  %v2745_v21 = vadd.f32 %v2744_v27, %v2743_v7  ;;  %v2746_v53 = vsel %vm608_vm1, %v3664_v11, 0.0  ;;  %v2795_v51 = vmul.f32 %v3666_v4, %v3666_v4 }
 0x205   : > { %v1687_v35 = vpop.f32.mrb[25].mxu1  ;;  %v3636_v62 = vpop.f32.mrb[24].mxu0  ;;  %2692 = vst.msk [vmem:[%s4688_s14 + $0x54] sm:$0xf] %vm2670_vm7, %v3172_v39  ;;  %v2845_v8 = vsel %vm608_vm1, %v2793_v52, 0.0  ;;  %v2847_v16 = vsel %vm608_vm1, %v2794_v2, 0.0 }
 0x206   : > { %v3668_v19 = vadd.f32 %v3636_v62, %v3500_v38  ;;  %v3501_v17 = vpop.f32.mrb[26].mxu1  ;;  %v2479_v44 = vpop.f32.mrb[25].mxu0  ;;  %v2747_v33 = vadd.f32 %v2746_v53, %v2745_v21  ;;  %v2846_v42 = vadd.f32 %v2845_v8, %v2844_v56  ;;  %v2748_v59 = vsel %vm608_vm1, %v3666_v4, 0.0 }
 0x207   : > { %v3669_v58 = vadd.f32 %v2479_v44, %v1687_v35  ;;  %v1690_v14 = vpop.f32.mrb[27].mxu1  ;;  %v3637_v47 = vpop.f32.mrb[26].mxu0  ;;  %v2849_v43 = vsel %vm608_vm1, %v2795_v51, 0.0 }
 0x208   : > { %v3177_v36 = vpack.c.bf16 %v3668_v19, %v3668_v19  ;;  %v2482_v32 = vpop.f32.mrb[27].mxu0  ;;  %v2848_v41 = vadd.f32 %v2847_v16, %v2846_v42  ;;  %v2749_v34 = vadd.f32 %v2748_v59, %v2747_v33  ;;  %v3670_v55 = vadd.f32 %v3637_v47, %v3501_v17 }
 0x209   : > { %v3175_v10 = vpack.c.bf16 %v3669_v58, %v3669_v58  ;;  %v2750_v20 = vsel %vm608_vm1, %v3669_v58, 0.0  ;;  %v2796_v49 = vmul.f32 %v3669_v58, %v3669_v58  ;;  %v3671_v25 = vadd.f32 %v2482_v32, %v1690_v14 }
 0x20a   : > { %2697 = vst.msk [vmem:[%s4688_s14 + $0x68] sm:$0xf] %vm2670_vm7, %v3177_v36  ;;  %v2798_v9 = vmul.f32 %v3668_v19, %v3668_v19  ;;  %v2751_v60 = vadd.f32 %v2750_v20, %v2749_v34  ;;  %v2850_v6 = vadd.f32 %v2849_v43, %v2848_v41  ;;  %v3178_v54 = vpack.c.bf16 %v3670_v55, %v3670_v55 }
 0x20b   : > { %2695 = vst.msk [vmem:[%s4688_s14 + $0x60] sm:$0xf] %vm2670_vm7, %v3175_v10  ;;  %v2851_v48 = vsel %vm608_vm1, %v2796_v49, 0.0  ;;  %v3176_v29 = vpack.c.bf16 %v3671_v25, %v3671_v25  ;;  %v2752_v46 = vsel %vm608_vm1, %v3671_v25, 0.0  ;;  %v2797_v13 = vmul.f32 %v3671_v25, %v3671_v25 }
 0x20c   : > { %v3504_v11 = vpop.f32.mrb[28].mxu1  ;;  %v2852_v40 = vadd.f32 %v2851_v48, %v2850_v6  ;;  %2698 = vst.msk [vmem:[%s4688_s14 + $0x6c] sm:$0xf] %vm2670_vm7, %v3178_v54  ;;  %v2753_v37 = vadd.f32 %v2752_v46, %v2751_v60  ;;  %v2754_v1 = vsel %vm608_vm1, %v3668_v19, 0.0  ;;  %v2799_v5 = vmul.f32 %v3670_v55, %v3670_v55 }
 0x20d   : > { %v1703_v0 = vpop.f32.mrb[29].mxu1  ;;  %v3640_v31 = vpop.f32.mrb[28].mxu0  ;;  %2696 = vst.msk [vmem:[%s4688_s14 + $0x64] sm:$0xf] %vm2670_vm7, %v3176_v29  ;;  %v2853_v24 = vsel %vm608_vm1, %v2797_v13, 0.0  ;;  %v2855_v3 = vsel %vm608_vm1, %v2798_v9, 0.0 }
 0x20e   : > { %v3672_v18 = vadd.f32 %v3640_v31, %v3504_v11  ;;  %v3505_v28 = vpop.f32.mrb[30].mxu1  ;;  %v2495_v23 = vpop.f32.mrb[29].mxu0  ;;  %v2755_v57 = vadd.f32 %v2754_v1, %v2753_v37  ;;  %v2854_v61 = vadd.f32 %v2853_v24, %v2852_v40  ;;  %v2756_v22 = vsel %vm608_vm1, %v3670_v55, 0.0 }
 0x20f   : > { %v3673_v50 = vadd.f32 %v2495_v23, %v1703_v0  ;;  %v1706_v30 = vpop.f32.mrb[31].mxu1  ;;  %v3641_v45 = vpop.f32.mrb[30].mxu0  ;;  %v2857_v27 = vsel %vm608_vm1, %v2799_v5, 0.0 }
 0x210   : > { %v3181_v4 = vpack.c.bf16 %v3672_v18, %v3672_v18  ;;  %v2498_v15 = vpop.f32.mrb[31].mxu0  ;;  %v2856_v12 = vadd.f32 %v2855_v3, %v2854_v61  ;;  %v2757_v26 = vadd.f32 %v2756_v22, %v2755_v57  ;;  %v3674_v38 = vadd.f32 %v3641_v45, %v3505_v28 }
 0x211   : > { %v3179_v63 = vpack.c.bf16 %v3673_v50, %v3673_v50  ;;  %v2758_v2 = vsel %vm608_vm1, %v3673_v50, 0.0  ;;  %v2800_v7 = vmul.f32 %v3673_v50, %v3673_v50  ;;  %v3675_v39 = vadd.f32 %v2498_v15, %v1706_v30 }
 0x212   : > { %2701 = vst.msk [vmem:[%s4688_s14 + $0x78] sm:$0xf] %vm2670_vm7, %v3181_v4  ;;  %v2759_v35 = vadd.f32 %v2758_v2, %v2757_v26  ;;  %v2858_v62 = vadd.f32 %v2857_v27, %v2856_v12  ;;  %v3182_v56 = vpack.c.bf16 %v3674_v38, %v3674_v38  ;;  %v2802_v21 = vmul.f32 %v3672_v18, %v3672_v18 }
 0x213   : > { %2699 = vst.msk [vmem:[%s4688_s14 + $0x70] sm:$0xf] %vm2670_vm7, %v3179_v63  ;;  %v2859_v52 = vsel %vm608_vm1, %v2800_v7, 0.0  ;;  %v3180_v19 = vpack.c.bf16 %v3675_v39, %v3675_v39  ;;  %v2760_v17 = vsel %vm608_vm1, %v3675_v39, 0.0  ;;  %v2801_v44 = vmul.f32 %v3675_v39, %v3675_v39 }
 0x214   : > { %v2860_v53 = vadd.f32 %v2859_v52, %v2858_v62  ;;  %2702 = vst.msk [vmem:[%s4688_s14 + $0x7c] sm:$0xf] %vm2670_vm7, %v3182_v56  ;;  %v2761_v51 = vadd.f32 %v2760_v17, %v2759_v35  ;;  %v2762_v8 = vsel %vm608_vm1, %v3672_v18, 0.0  ;;  %v2803_v58 = vmul.f32 %v3674_v38, %v3674_v38 }
 0x215   : > { %2700 = vst.msk [vmem:[%s4688_s14 + $0x74] sm:$0xf] %vm2670_vm7, %v3180_v19  ;;  %v2861_v14 = vsel %vm608_vm1, %v2801_v44, 0.0  ;;  %v2863_v33 = vsel %vm608_vm1, %v2802_v21, 0.0  ;;  %v2764_v42 = vsel %vm608_vm1, %v3674_v38, 0.0 }
 0x216   : > { %v2763_v47 = vadd.f32 %v2762_v8, %v2761_v51  ;;  %v2862_v16 = vadd.f32 %v2861_v14, %v2860_v53  ;;  %v2865_v59 = vsel %vm608_vm1, %v2803_v58, 0.0 }
 0x218   : > { %v2765_v36 = vadd.f32 %v2764_v42, %v2763_v47  ;;  %v2864_v32 = vadd.f32 %v2863_v33, %v2862_v16 }
 0x21a   : > { %v2766_v10 = vrot.slane %v2765_v36, 4  ;;  %v2866_v20 = vadd.f32 %v2865_v59, %v2864_v32 }
 0x21c   : > { %v2767_v49 = vadd.f32 %v2766_v10, %v2765_v36  ;;  %v2867_v41 = vrot.slane %v2866_v20, 4 }
 0x21e   : > { %v2768_v34 = vrot.slane %v2767_v49, 2  ;;  %v2868_v55 = vadd.f32 %v2867_v41, %v2866_v20 }
 0x220   : > { %v2769_v25 = vadd.f32 %v2768_v34, %v2767_v49  ;;  %v2869_v43 = vrot.slane %v2868_v55, 2 }
 0x222   : > { %v2770_v48 = vrot.slane %v2769_v25, 1  ;;  %v2870_v9 = vadd.f32 %v2869_v43, %v2868_v55 }
 0x224   : > { %v2871_v60 = vrot.slane %v2870_v9, 1  ;;  %v2771_v6 = vadd.f32 %v2770_v48, %v2769_v25 }
 0x226   : > { %v2872_v54 = vadd.f32 %v2871_v60, %v2870_v9 }
 0x228   : > { %v2874_v11 = vsel %vm375_vm2, %v2771_v6, %v2872_v54 }
 0x229   : > { %2876 = vst.msk [vmem:[%s181_s18] sm:$0x3] %vm2875_vm8, %v2874_v11 }
 0x22a PF: > { %s14_s12 = sadd.s32 1, %s3925_s12  }
 0x22b   : > { %p11_p4 = scmp.ge.s32.totalorder %s14_s12, 4  }
 0x22d   :  { %13 = sbr.rel (!%p11_p4) target bundleno = 1 (0x1), region = 70 }

// kernel: basic_block_forward.4
= control target key start
LH: loop header
LB: loop body
LE: loop exit
PB: predicated region body
PF: predicated region fallthrough
CT: control target
= control target key end

     0   :  { %s4236_s18 = smov 0   ;;  %s5194_s0 = inlined_call_operand.vmem [shape: bf16[2,16,16,4], index: 0, kind: input, shape index: {}]   ;;  %s5195_s1 = inlined_call_operand.vmem [shape: f32[1,4], index: 1, kind: input, shape index: {}]   ;;  %s5196_s2 = inlined_call_operand.vmem [shape: f32[1,4], index: 2, kind: input, shape index: {}]   ;;  %s5197_s3 = inlined_call_operand.vmem [shape: bf16[9,4,4], index: 3, kind: input, shape index: {}]   ;;  %s5198_s4 = inlined_call_operand.vmem [shape: bf16[2,16,16,4], index: 4, kind: output, shape index: {0}]   ;;  %s5199_s5 = inlined_call_operand.vmem [shape: f32[2,2,4], index: 5, kind: output, shape index: {1}]  }
   0x1 LB: > { %s3159_s19 = sadd.s32 4294967295, %s4203_s18   ;;  %p3163_p0 = scmp.ge.s32.totalorder %s4203_s18, 1  ;;  %s4203_s18 = sphi %s4236_s18, %s16_s18  }
   0x2   : > { %p190_p1 = scmp.lt.s32.totalorder %s4203_s18, 3 }
   0x4   : > { %p191_p2 = pnand %p3163_p0, %p190_p1 }
   0x6   : > { %194 = sbr.rel (%p191_p2) target bundleno = 584 (0x248), region = 36 }
   0xd   : > { %v607_v0 = vld [vmem:[%s5197_s3 + $0x2] sm:$0x3]  ;;  %vm853_vm0 = vcmask 1041408   ;;  %v610_v1 = vld [vmem:[%s5197_s3 + $0x8] sm:$0x3]  ;;  %v5200_v4 = vmov 0  }
   0xe   : > { %4177 = vmatprep.subr.msk.bf16.mxu1 %vm853_vm0, %v607_v0  ;;  %4181 = vmatprep.subr.msk.bf16.mxu0 %vm853_vm0, %v610_v1  ;;  %v855_v2 = vsel %vm853_vm0, %v607_v0, 0  ;;  %v4254_v3 = vsel %vm853_vm0, %v610_v1, 0  ;;  %v4257_v5 = vrot.slane %v5200_v4, 1  ;;  %vm804_vm1 = vcmask 31744   ;;  %p222_p3 = scmp.lt.s32.totalorder %s3159_s19, 1 }
   0xf   : > { %5207 = vst [vmem:[#allocation2_spill] sm:$0xff] %v4254_v3  ;;  %3614 = vmatpush3.bf16.msra.mxu1 %v855_v2  ;;  %3750 = vmatpush3.bf16.msra.mxu0 %v4254_v3  ;;  %v606_v6 = vld [vmem:[%s5197_s3] sm:$0x3]  ;;  %v611_v7 = vld [vmem:[%s5197_s3 + $0xa] sm:$0x3]  ;;  %vm571_vm2 = vcmask 1040384  }
  0x10   : > { %3615 = vmatprep.mubr.msk.bf16.mxu1 %vm804_vm1, %v4257_v5  ;;  %s5217_s19 = smov (!%p222_p3, %s3159_s19), 1  ;;  %4178 = vmatprep.subr.msk.bf16.mxu1 %vm853_vm0, %v606_v6  ;;  %v4276_v8 = vld [vmem:[%s5197_s3 + $0xc] sm:$0x3]  ;;  %v4288_v9 = vld [vmem:[%s5195_s1] ss:$0 sm:$0xff]  ;;  %v4292_v11 = vsel %vm853_vm0, %v606_v6, 0 }
  0x11   : > { %s3347_s28 = sshll.u32 %s5217_s19, 7  ;;  %4183 = vmatprep.subr.msk.bf16.mxu0 %vm853_vm0, %v611_v7  ;;  %v4296_v13 = vsel %vm853_vm0, %v611_v7, 0  ;;  %v4301_v15 = vsel %vm853_vm0, %v4276_v8, 0  ;;  %v4307_v21 = vld [vmem:[%s5196_s2] ss:$0 sm:$0xff]  ;;  %vm1245_vm6 = vcmask 1046528  }
  0x12   : > { %s4283_s8 = scalar_lea.vmem %s5194_s0, %s3347_s28  ;;  %vm572_vm3 = vsmask.f32 256  ;;  %vm615_vm4 = vsmask.f32 7424  ;;  %s5012_s27 = scalar_lea.vmem %s5198_s4, %s3347_s28  ;;  %vm2866_vm7 = vcmask 27648   ;;  %vm3071_vm8 = vcmask 25600  }
  0x13   : > { %v3382_v10 = vld [vmem:[%s4283_s8] sm:$0xff]   ;;  %v3445_v12 = vld [vmem:[%s4283_s8 + $0x8] sm:$0xff]   ;;  %v3446_v14 = vld [vmem:[%s4283_s8 + $0x10] sm:$0xff]   ;;  %s3168_s28 = sshll.u32 %s5217_s19, 1 }
  0x14   : > { %v3383_v16 = vunpack.c.l.bf16 %v3382_v10  ;;  %v3384_v17 = vunpack.c.h.bf16 %v3382_v10  ;;  %v3387_v18 = vunpack.c.l.bf16 %v3445_v12  ;;  %v3388_v19 = vunpack.c.h.bf16 %v3445_v12  ;;  %v3447_v20 = vld [vmem:[%s4283_s8 + $0x18] sm:$0xff]   ;;  %v3448_v42 = vld [vmem:[%s4283_s8 + $0x20] sm:$0xff]   ;;  %v3449_v47 = vld [vmem:[%s4283_s8 + $0x28] sm:$0xff]   ;;  %s235_s6 = scalar_lea.vmem %s5199_s5, %s3168_s28 }
  0x15   : > { %v3391_v22 = vunpack.c.l.bf16 %v3446_v14  ;;  %v3392_v23 = vunpack.c.h.bf16 %v3446_v14  ;;  %v3395_v24 = vunpack.c.l.bf16 %v3447_v20  ;;  %v3396_v25 = vunpack.c.h.bf16 %v3447_v20  ;;  %vm4331_vm5 = vmand %vm571_vm2, %vm572_vm3 }
  0x16   : > { %v308_v26 = vmul.f32 %v3383_v16, %v4288_v9  ;;  %v309_v27 = vmul.f32 %v3384_v17, %v4288_v9  ;;  %v310_v28 = vmul.f32 %v3387_v18, %v4288_v9  ;;  %v311_v29 = vmul.f32 %v3388_v19, %v4288_v9 }
  0x17   : > { %v312_v30 = vmul.f32 %v3391_v22, %v4288_v9  ;;  %v313_v31 = vmul.f32 %v3392_v23, %v4288_v9  ;;  %v314_v32 = vmul.f32 %v3395_v24, %v4288_v9  ;;  %v315_v33 = vmul.f32 %v3396_v25, %v4288_v9 }
  0x18   : > { %v347_v34 = vadd.f32 %v4307_v21, %v308_v26  ;;  %v348_v35 = vadd.f32 %v4307_v21, %v309_v27  ;;  %v349_v36 = vadd.f32 %v4307_v21, %v310_v28  ;;  %v350_v37 = vadd.f32 %v4307_v21, %v311_v29 }
  0x19   : > { %v351_v38 = vadd.f32 %v4307_v21, %v312_v30  ;;  %v352_v39 = vadd.f32 %v4307_v21, %v313_v31  ;;  %v353_v40 = vadd.f32 %v4307_v21, %v314_v32  ;;  %v354_v41 = vadd.f32 %v4307_v21, %v315_v33 }
  0x1a   : > { %v379_v43 = vmax.f32 %v347_v34, 0.0  ;;  %v380_v44 = vmax.f32 %v348_v35, 0.0  ;;  %v381_v45 = vmax.f32 %v349_v36, 0.0  ;;  %v382_v46 = vmax.f32 %v350_v37, 0.0 }
  0x1b   : > { %v383_v48 = vmax.f32 %v351_v38, 0.0  ;;  %v384_v49 = vmax.f32 %v352_v39, 0.0  ;;  %v385_v50 = vmax.f32 %v353_v40, 0.0  ;;  %v386_v51 = vmax.f32 %v354_v41, 0.0 }
  0x1c   : > { %v411_v52 = vpack.c.bf16 %v380_v44, %v379_v43  ;;  %v412_v53 = vpack.c.bf16 %v382_v46, %v381_v45  ;;  %v3399_v54 = vunpack.c.l.bf16 %v3448_v42  ;;  %v3400_v55 = vunpack.c.h.bf16 %v3448_v42 }
  0x1d   : > { %v413_v56 = vpack.c.bf16 %v384_v49, %v383_v48  ;;  %v414_v57 = vpack.c.bf16 %v386_v51, %v385_v50  ;;  %v3403_v58 = vunpack.c.l.bf16 %v3449_v47  ;;  %v3404_v59 = vunpack.c.h.bf16 %v3449_v47 }
  0x1e   : > { %v428_v60 = vshrl.u32 %v411_v52, 16  ;;  %v431_v61 = vshll.u32 %v411_v52, 16  ;;  %v435_v62 = vshrl.u32 %v412_v53, 16  ;;  %v438_v63 = vshll.u32 %v412_v53, 16 }
  0x1f   : > { %v442_v0 = vshrl.u32 %v413_v56, 16  ;;  %v445_v1 = vshll.u32 %v413_v56, 16  ;;  %v449_v2 = vshrl.u32 %v414_v57, 16  ;;  %v452_v6 = vshll.u32 %v414_v57, 16 }
  0x20   : > { %v430_v7 = vrot.slane %v428_v60, 7  ;;  %v437_v10 = vrot.slane %v435_v62, 7  ;;  %v316_v12 = vmul.f32 %v3399_v54, %v4288_v9  ;;  %v317_v14 = vmul.f32 %v3400_v55, %v4288_v9 }
  0x21   : > { %v444_v17 = vrot.slane %v442_v0, 7  ;;  %v451_v18 = vrot.slane %v449_v2, 7  ;;  %v318_v19 = vmul.f32 %v3403_v58, %v4288_v9  ;;  %v319_v20 = vmul.f32 %v3404_v59, %v4288_v9  ;;  %v3450_v58 = vld [vmem:[%s4283_s8 + $0x30] sm:$0xff]  }
  0x22   : > { %v433_v22 = vor.u32 %v431_v61, %v430_v7  ;;  %v4339_v23 = vsel %vm4331_vm5, %v430_v7, 0  ;;  %v440_v24 = vor.u32 %v438_v63, %v437_v10  ;;  %v4343_v25 = vsel %vm4331_vm5, %v437_v10, 0  ;;  %v3451_v63 = vld [vmem:[%s4283_s8 + $0x38] sm:$0xff]   ;;  %v3452_v7 = vld [vmem:[%s4283_s8 + $0x40] sm:$0xff]  }
  0x23   : > { %v632_v26 = vshll.u32 %v4339_v23, 16  ;;  %v644_v27 = vshll.u32 %v4343_v25, 16  ;;  %v1252_v28 = vrot.slane %v4343_v25, 1  ;;  %v447_v29 = vor.u32 %v445_v1, %v444_v17 }
  0x24   : > { %v4350_v30 = vsel %vm4331_vm5, 0, %v433_v22  ;;  %v4354_v31 = vsel %vm4331_vm5, 0, %v440_v24  ;;  %v4358_v32 = vsel %vm4331_vm5, %v444_v17, 0  ;;  %v454_v33 = vor.u32 %v452_v6, %v451_v18 }
  0x25   : > { %v625_v34 = vshrl.u32 %v4350_v30, 16  ;;  %v627_v35 = vshll.u32 %v4350_v30, 16  ;;  %v634_v36 = vrot.slane %v632_v26, 1  ;;  %v637_v37 = vshrl.u32 %v4354_v31, 16 }
  0x26   : > { %v639_v38 = vshll.u32 %v4354_v31, 16  ;;  %v646_v39 = vrot.slane %v644_v27, 1  ;;  %v4366_v40 = vsel %vm4331_vm5, 0, %v447_v29  ;;  %v656_v41 = vshll.u32 %v4358_v32, 16 }
  0x27   : > { %v629_v42 = vrot.slane %v627_v35, 1  ;;  %v649_v43 = vshrl.u32 %v4366_v40, 16  ;;  %v651_v44 = vshll.u32 %v4366_v40, 16  ;;  %v4373_v45 = vsel %vm4331_vm5, 0, %v454_v33 }
  0x28   : > { %v641_v46 = vrot.slane %v639_v38, 1  ;;  %v658_v47 = vrot.slane %v656_v41, 1  ;;  %v4377_v48 = vsel %vm4331_vm5, %v451_v18, 0  ;;  %v661_v49 = vshrl.u32 %v4373_v45, 16  ;;  %v4404_v18 = vld [vmem:[%s5197_s3 + $0x4] sm:$0x3] }
  0x29   : > { %v630_v50 = vor.u32 %v629_v42, %v625_v34  ;;  %v653_v51 = vrot.slane %v651_v44, 1  ;;  %v663_v52 = vshll.u32 %v4373_v45, 16  ;;  %v668_v53 = vshll.u32 %v4377_v48, 16 }
  0x2a   : > { %v642_v54 = vor.u32 %v641_v46, %v637_v37  ;;  %v355_v55 = vadd.f32 %v4307_v21, %v316_v12  ;;  %v356_v56 = vadd.f32 %v4307_v21, %v317_v14  ;;  %v357_v57 = vadd.f32 %v4307_v21, %v318_v19 }
  0x2b   : > { %v635_v59 = vsel %vm615_vm4, %v630_v50, %v634_v36  ;;  %v654_v60 = vor.u32 %v653_v51, %v649_v43  ;;  %v665_v61 = vrot.slane %v663_v52, 1  ;;  %v670_v62 = vrot.slane %v668_v53, 1 }
  0x2c   : > { %3616 = vmatmul.mubr.msk.bf16.vlgmr.msra.gmra.mrb[0].mxu1 %vm804_vm1, %v635_v59  ;;  %3751 = vmatprep.mubr.msk.bf16.mxu0 %vm804_vm1, %v635_v59  ;;  %v4391_v0 = vsel %vm615_vm4, %v642_v54, %v646_v39  ;;  %v387_v1 = vmax.f32 %v355_v55, 0.0  ;;  %v388_v2 = vmax.f32 %v356_v56, 0.0  ;;  %v358_v6 = vadd.f32 %v4307_v21, %v319_v20 }
  0x2d   : > { %3648 = vmatpush3.bf16.msra.mxu1 %v4292_v11  ;;  %3752 = vmatmul.mubr.msk.bf16.vlgmr.msra.gmra.mrb[0].mxu0 %vm804_vm1, %v4391_v0  ;;  %v4399_v10 = vsel %vm615_vm4, %v654_v60, %v658_v47  ;;  %v666_v12 = vor.u32 %v665_v61, %v661_v49  ;;  %v389_v14 = vmax.f32 %v357_v57, 0.0  ;;  %v3407_v17 = vunpack.c.l.bf16 %v3450_v58 }
  0x2e   : > { %3784 = vmatpush3.bf16.msra.mxu0 %v4296_v13  ;;  %3619 = vmatprep.mubr.msk.bf16.mxu1 %vm804_vm1, %v4391_v0  ;;  %v415_v11 = vpack.c.bf16 %v388_v2, %v387_v1  ;;  %v390_v19 = vmax.f32 %v358_v6, 0.0  ;;  %v3408_v20 = vunpack.c.h.bf16 %v3450_v58  ;;  %v3411_v22 = vunpack.c.l.bf16 %v3451_v63 }
  0x2f   : > { %3755 = vmatprep.mubr.msk.bf16.mxu0 %vm804_vm1, %v4399_v10  ;;  %v4412_v24 = vsel %vm615_vm4, %v666_v12, %v670_v62  ;;  %v320_v26 = vmul.f32 %v3407_v17, %v4288_v9  ;;  %v3412_v27 = vunpack.c.h.bf16 %v3451_v63  ;;  %v3415_v29 = vunpack.c.l.bf16 %v3452_v7  ;;  %4184 = vmatprep.subr.msk.bf16.mxu0 %vm853_vm0, %v4276_v8 }
  0x30   : > { %v456_v13 = vshrl.u32 %v415_v11, 16  ;;  %v459_v33 = vshll.u32 %v415_v11, 16  ;;  %v416_v34 = vpack.c.bf16 %v390_v19, %v389_v14  ;;  %v321_v35 = vmul.f32 %v3408_v20, %v4288_v9  ;;  %4179 = vmatprep.subr.msk.bf16.mxu1 %vm853_vm0, %v4404_v18 }
  0x31   : > { %v359_v36 = vadd.f32 %v4307_v21, %v320_v26  ;;  %v322_v37 = vmul.f32 %v3411_v22, %v4288_v9  ;;  %v323_v38 = vmul.f32 %v3412_v27, %v4288_v9  ;;  %v3416_v39 = vunpack.c.h.bf16 %v3452_v7 }
  0x32   : > { %v458_v41 = vrot.slane %v456_v13, 7  ;;  %v463_v42 = vshrl.u32 %v416_v34, 16  ;;  %v466_v43 = vshll.u32 %v416_v34, 16  ;;  %v360_v8 = vadd.f32 %v4307_v21, %v321_v35 }
  0x33   : > { %v391_v44 = vmax.f32 %v359_v36, 0.0  ;;  %v361_v46 = vadd.f32 %v4307_v21, %v322_v37  ;;  %v362_v47 = vadd.f32 %v4307_v21, %v323_v38  ;;  %v324_v49 = vmul.f32 %v3415_v29, %v4288_v9 }
  0x34   : > { %3620 = vmatmul.mubr.msk.bf16.gmra.mrb[4].mxu1 %vm804_vm1, %v4399_v10  ;;  %v461_v50 = vor.u32 %v459_v33, %v458_v41  ;;  %v4431_v51 = vsel %vm4331_vm5, %v458_v41, 0  ;;  %v465_v52 = vrot.slane %v463_v42, 7  ;;  %v392_v53 = vmax.f32 %v360_v8, 0.0 }
  0x35   : > { %3756 = vmatmul.mubr.msk.bf16.gmra.mrb[4].mxu0 %vm804_vm1, %v4412_v24  ;;  %3623 = vmatprep.mubr.msk.bf16.mxu1 %vm804_vm1, %v4412_v24  ;;  %v680_v54 = vshll.u32 %v4431_v51, 16  ;;  %v393_v55 = vmax.f32 %v361_v46, 0.0  ;;  %v394_v56 = vmax.f32 %v362_v47, 0.0  ;;  %v325_v57 = vmul.f32 %v3416_v39, %v4288_v9 }
  0x36   : > { %v4441_v58 = vsel %vm4331_vm5, 0, %v461_v50  ;;  %v468_v59 = vor.u32 %v466_v43, %v465_v52  ;;  %v4445_v60 = vsel %vm4331_vm5, %v465_v52, 0  ;;  %v417_v61 = vpack.c.bf16 %v392_v53, %v391_v44 }
  0x37   : > { %v673_v62 = vshrl.u32 %v4441_v58, 16  ;;  %v675_v63 = vshll.u32 %v4441_v58, 16  ;;  %v682_v1 = vrot.slane %v680_v54, 1  ;;  %v692_v2 = vshll.u32 %v4445_v60, 16 }
  0x38   : > { %v4452_v6 = vsel %vm4331_vm5, 0, %v468_v59  ;;  %v470_v7 = vshrl.u32 %v417_v61, 16  ;;  %v473_v12 = vshll.u32 %v417_v61, 16  ;;  %v418_v14 = vpack.c.bf16 %v394_v56, %v393_v55  ;;  %v3453_v55 = vld [vmem:[%s4283_s8 + $0x48] sm:$0xff]  }
  0x39   : > { %v677_v17 = vrot.slane %v675_v63, 1  ;;  %v685_v11 = vshrl.u32 %v4452_v6, 16  ;;  %v687_v19 = vshll.u32 %v4452_v6, 16  ;;  %v694_v20 = vrot.slane %v692_v2, 1  ;;  %v3454_v2 = vld [vmem:[%s4283_s8 + $0x50] sm:$0xff]  }
  0x3a   : > { %v472_v22 = vrot.slane %v470_v7, 7  ;;  %v477_v26 = vshrl.u32 %v418_v14, 16  ;;  %v480_v27 = vshll.u32 %v418_v14, 16  ;;  %v363_v29 = vadd.f32 %v4307_v21, %v324_v49 }
  0x3b   : > { %v678_v13 = vor.u32 %v677_v17, %v673_v62  ;;  %v689_v33 = vrot.slane %v687_v19, 1  ;;  %v364_v34 = vadd.f32 %v4307_v21, %v325_v57  ;;  %v1248_v35 = vrot.slane %v4350_v30, 1 }
  0x3c   : > { %v475_v36 = vor.u32 %v473_v12, %v472_v22  ;;  %v4461_v37 = vsel %vm4331_vm5, %v472_v22, 0  ;;  %v479_v38 = vrot.slane %v477_v26, 7  ;;  %v395_v39 = vmax.f32 %v363_v29, 0.0 }
  0x3d   : > { %v4464_v41 = vsel %vm615_vm4, %v678_v13, %v682_v1  ;;  %v690_v42 = vor.u32 %v689_v33, %v685_v11  ;;  %v704_v43 = vshll.u32 %v4461_v37, 16  ;;  %v396_v8 = vmax.f32 %v364_v34, 0.0 }
  0x3e   : > { %3624 = vmatmul.mubr.msk.bf16.gmra.mrb[8].mxu1 %vm804_vm1, %v4464_v41  ;;  %3759 = vmatprep.mubr.msk.bf16.mxu0 %vm804_vm1, %v4464_v41  ;;  %v4473_v44 = vsel %vm4331_vm5, 0, %v475_v36  ;;  %v482_v46 = vor.u32 %v480_v27, %v479_v38  ;;  %v4477_v47 = vsel %vm4331_vm5, %v479_v38, 0  ;;  %v1249_v49 = vrot.slane %v4339_v23, 1 }
  0x3f   : > { %v4481_v50 = vsel %vm615_vm4, %v690_v42, %v694_v20  ;;  %v697_v52 = vshrl.u32 %v4473_v44, 16  ;;  %v699_v53 = vshll.u32 %v4473_v44, 16  ;;  %v706_v54 = vrot.slane %v704_v43, 1 }
  0x40   : > { %3760 = vmatmul.mubr.msk.bf16.gmra.mrb[8].mxu0 %vm804_vm1, %v4481_v50  ;;  %3627 = vmatprep.mubr.msk.bf16.mxu1 %vm804_vm1, %v4481_v50  ;;  %v4492_v56 = vsel %vm4331_vm5, 0, %v482_v46  ;;  %v716_v23 = vshll.u32 %v4477_v47, 16  ;;  %v419_v57 = vpack.c.bf16 %v396_v8, %v395_v39  ;;  %v4496_v59 = vsel %vm1245_vm6, %v1248_v35, %v1249_v49 }
  0x41   : > { %v701_v61 = vrot.slane %v699_v53, 1  ;;  %v709_v62 = vshrl.u32 %v4492_v56, 16  ;;  %v711_v63 = vshll.u32 %v4492_v56, 16  ;;  %v1251_v1 = vrot.slane %v4354_v31, 1 }
  0x42   : > { %v718_v7 = vrot.slane %v716_v23, 1  ;;  %v484_v12 = vshrl.u32 %v419_v57, 16  ;;  %v487_v14 = vshll.u32 %v419_v57, 16  ;;  %v3419_v17 = vunpack.c.l.bf16 %v3453_v55 }
  0x43   : > { %v702_v11 = vor.u32 %v701_v61, %v697_v52  ;;  %v713_v19 = vrot.slane %v711_v63, 1  ;;  %v4505_v20 = vsel %vm1245_vm6, %v1251_v1, %v1252_v28  ;;  %v3420_v22 = vunpack.c.h.bf16 %v3453_v55  ;;  %v3455_v55 = vld [vmem:[%s4283_s8 + $0x58] sm:$0xff]   ;;  %v3456_v63 = vld [vmem:[%s4283_s8 + $0x60] sm:$0xff]  }
  0x44   : > { %v486_v26 = vrot.slane %v484_v12, 7  ;;  %v326_v27 = vmul.f32 %v3419_v17, %v4288_v9  ;;  %v3423_v29 = vunpack.c.l.bf16 %v3454_v2  ;;  %v3424_v13 = vunpack.c.h.bf16 %v3454_v2 }
  0x45   : > { %v4509_v33 = vsel %vm615_vm4, %v702_v11, %v706_v54  ;;  %v714_v34 = vor.u32 %v713_v19, %v709_v62  ;;  %v327_v35 = vmul.f32 %v3420_v22, %v4288_v9  ;;  %v1254_v36 = vrot.slane %v4366_v40, 1 }
  0x46   : > { %3628 = vmatmul.mubr.msk.bf16.gmra.mrb[12].mxu1 %vm804_vm1, %v4509_v33  ;;  %3763 = vmatprep.mubr.msk.bf16.mxu0 %vm804_vm1, %v4509_v33  ;;  %v489_v25 = vor.u32 %v487_v14, %v486_v26  ;;  %v4519_v28 = vsel %vm4331_vm5, %v486_v26, 0  ;;  %v365_v38 = vadd.f32 %v4307_v21, %v326_v27  ;;  %v328_v39 = vmul.f32 %v3423_v29, %v4288_v9 }
  0x47   : > { %v4524_v42 = vsel %vm615_vm4, %v714_v34, %v718_v7  ;;  %v728_v43 = vshll.u32 %v4519_v28, 16  ;;  %v366_v8 = vadd.f32 %v4307_v21, %v327_v35  ;;  %v329_v46 = vmul.f32 %v3424_v13, %v4288_v9 }
  0x48   : > { %3764 = vmatmul.mubr.msk.bf16.gmra.mrb[12].mxu0 %vm804_vm1, %v4524_v42  ;;  %3631 = vmatprep.mubr.msk.bf16.mxu1 %vm804_vm1, %v4524_v42  ;;  %v4535_v49 = vsel %vm4331_vm5, 0, %v489_v25  ;;  %v397_v52 = vmax.f32 %v365_v38, 0.0  ;;  %v367_v53 = vadd.f32 %v4307_v21, %v328_v39  ;;  %v1255_v54 = vrot.slane %v4358_v32, 1 }
  0x49   : > { %v721_v23 = vshrl.u32 %v4535_v49, 16  ;;  %v723_v57 = vshll.u32 %v4535_v49, 16  ;;  %v730_v61 = vrot.slane %v728_v43, 1  ;;  %3785 = vmatprep.mubr.msk.bf16.mxu0 %vm804_vm1, %v4496_v59  ;;  %v398_v62 = vmax.f32 %v366_v8, 0.0 }
  0x4a   : > { %v368_v1 = vadd.f32 %v4307_v21, %v329_v46  ;;  %v399_v2 = vmax.f32 %v367_v53, 0.0  ;;  %v4547_v7 = vsel %vm1245_vm6, %v1254_v36, %v1255_v54  ;;  %v1257_v12 = vrot.slane %v4373_v45, 1 }
  0x4b   : > { %v725_v32 = vrot.slane %v723_v57, 1  ;;  %v420_v14 = vpack.c.bf16 %v398_v62, %v397_v52  ;;  %v1258_v17 = vrot.slane %v4377_v48, 1  ;;  %v3427_v11 = vunpack.c.l.bf16 %v3455_v55  ;;  %v4565_v52 = vld [vmem:[%s5197_s3 + $0xe] sm:$0x3] }
  0x4c   : > { %v400_v19 = vmax.f32 %v368_v1, 0.0  ;;  %v3428_v22 = vunpack.c.h.bf16 %v3455_v55  ;;  %v3431_v26 = vunpack.c.l.bf16 %v3456_v63  ;;  %v3432_v27 = vunpack.c.h.bf16 %v3456_v63 }
  0x4d   : > { %v726_v29 = vor.u32 %v725_v32, %v721_v23  ;;  %v491_v13 = vshrl.u32 %v420_v14, 16  ;;  %v494_v34 = vshll.u32 %v420_v14, 16  ;;  %v4552_v35 = vsel %vm1245_vm6, %v1257_v12, %v1258_v17 }
  0x4e   : > { %v421_v25 = vpack.c.bf16 %v400_v19, %v399_v2  ;;  %v330_v36 = vmul.f32 %v3427_v11, %v4288_v9  ;;  %v331_v38 = vmul.f32 %v3428_v22, %v4288_v9  ;;  %v332_v39 = vmul.f32 %v3431_v26, %v4288_v9 }
  0x4f   : > { %v4558_v48 = vsel %vm615_vm4, %v726_v29, %v730_v61  ;;  %v493_v43 = vrot.slane %v491_v13, 7  ;;  %v333_v8 = vmul.f32 %v3432_v27, %v4288_v9  ;;  %v1260_v46 = vrot.slane %v4441_v58, 1 }
  0x50   : > { %3632 = vmatmul.mubr.msk.bf16.gmra.mrb[16].mxu1 %vm804_vm1, %v4558_v48  ;;  %3786 = vmatmul.mubr.msk.bf16.vlgmr.msra.gmra.mrb[0].mxu0 %vm804_vm1, %v4505_v20  ;;  %v498_v53 = vshrl.u32 %v421_v25, 16  ;;  %v501_v54 = vshll.u32 %v421_v25, 16  ;;  %v369_v55 = vadd.f32 %v4307_v21, %v330_v36  ;;  %v370_v23 = vadd.f32 %v4307_v21, %v331_v38 }
  0x51   : > { %3818 = vmatpush3.bf16.msra.mxu0 %v4301_v15  ;;  %v496_v57 = vor.u32 %v494_v34, %v493_v43  ;;  %v4576_v61 = vsel %vm4331_vm5, %v493_v43, 0  ;;  %3789 = vmatprep.mubr.msk.bf16.mxu0 %vm804_vm1, %v4547_v7  ;;  %v371_v62 = vadd.f32 %v4307_v21, %v332_v39  ;;  %v372_v63 = vadd.f32 %v4307_v21, %v333_v8  ;;  %v3457_v43 = vld [vmem:[%s4283_s8 + $0x68] sm:$0xff]  }
  0x52   : > { %v740_v1 = vshll.u32 %v4576_v61, 16  ;;  %v500_v2 = vrot.slane %v498_v53, 7  ;;  %v401_v12 = vmax.f32 %v369_v55, 0.0  ;;  %v402_v32 = vmax.f32 %v370_v23, 0.0  ;;  %4185 = vmatprep.subr.msk.bf16.mxu0 %vm853_vm0, %v4565_v52  ;;  %v3458_v23 = vld [vmem:[%s4283_s8 + $0x70] sm:$0xff]  }
  0x53   : > { %v4587_v15 = vsel %vm4331_vm5, 0, %v496_v57  ;;  %v403_v14 = vmax.f32 %v371_v62, 0.0  ;;  %v404_v17 = vmax.f32 %v372_v63, 0.0  ;;  %v1261_v11 = vrot.slane %v4431_v51, 1 }
  0x54   : > { %v733_v19 = vshrl.u32 %v4587_v15, 16  ;;  %v735_v22 = vshll.u32 %v4587_v15, 16  ;;  %v742_v26 = vrot.slane %v740_v1, 1  ;;  %v503_v27 = vor.u32 %v501_v54, %v500_v2 }
  0x55   : > { %v4594_v29 = vsel %vm4331_vm5, %v500_v2, 0  ;;  %v422_v13 = vpack.c.bf16 %v402_v32, %v401_v12  ;;  %v423_v34 = vpack.c.bf16 %v404_v17, %v403_v14  ;;  %v4597_v25 = vsel %vm1245_vm6, %v1260_v46, %v1261_v11 }
  0x56   : > { %v737_v36 = vrot.slane %v735_v22, 1  ;;  %v4601_v51 = vsel %vm4331_vm5, 0, %v503_v27  ;;  %v752_v38 = vshll.u32 %v4594_v29, 16  ;;  %v1263_v39 = vrot.slane %v4452_v6, 1 }
  0x57   : > { %v745_v8 = vshrl.u32 %v4601_v51, 16  ;;  %v747_v53 = vshll.u32 %v4601_v51, 16  ;;  %v505_v54 = vshrl.u32 %v422_v13, 16  ;;  %v508_v55 = vshll.u32 %v422_v13, 16 }
  0x58   : > { %v738_v57 = vor.u32 %v737_v36, %v733_v19  ;;  %v754_v46 = vrot.slane %v752_v38, 1  ;;  %3790 = vmatmul.mubr.msk.bf16.gmra.mrb[4].mxu0 %vm804_vm1, %v4552_v35  ;;  %v512_v62 = vshrl.u32 %v423_v34, 16  ;;  %v515_v63 = vshll.u32 %v423_v34, 16 }
  0x59   : > { %v749_v1 = vrot.slane %v747_v53, 1  ;;  %v507_v2 = vrot.slane %v505_v54, 7  ;;  %3793 = vmatprep.mubr.msk.bf16.mxu0 %vm804_vm1, %v4597_v25  ;;  %v1264_v12 = vrot.slane %v4445_v60, 1  ;;  %v3435_v32 = vunpack.c.l.bf16 %v3457_v43 }
  0x5a   : > { %v4615_v14 = vsel %vm615_vm4, %v738_v57, %v742_v26  ;;  %v514_v17 = vrot.slane %v512_v62, 7  ;;  %v3436_v11 = vunpack.c.h.bf16 %v3457_v43  ;;  %v3439_v19 = vunpack.c.l.bf16 %v3458_v23 }
  0x5b   : > { %3635 = vmatprep.mubr.msk.bf16.mxu1 %vm804_vm1, %v4615_v14  ;;  %v750_v22 = vor.u32 %v749_v1, %v745_v8  ;;  %v510_v27 = vor.u32 %v508_v55, %v507_v2  ;;  %v4621_v13 = vsel %vm4331_vm5, %v507_v2, 0  ;;  %v4624_v34 = vsel %vm1245_vm6, %v1263_v39, %v1264_v12 }
  0x5c   : > { %v764_v60 = vshll.u32 %v4621_v13, 16  ;;  %v517_v36 = vor.u32 %v515_v63, %v514_v17  ;;  %v4629_v26 = vsel %vm4331_vm5, %v514_v17, 0  ;;  %v334_v38 = vmul.f32 %v3435_v32, %v4288_v9 }
  0x5d   : > { %v4633_v43 = vsel %vm615_vm4, %v750_v22, %v754_v46  ;;  %v4637_v8 = vsel %vm4331_vm5, 0, %v510_v27  ;;  %v776_v53 = vshll.u32 %v4629_v26, 16  ;;  %v335_v39 = vmul.f32 %v3436_v11, %v4288_v9 }
  0x5e   : > { %5210 = vst [vmem:[#allocation3_spill] sm:$0xff] %v4633_v43  ;;  %3636 = vmatmul.mubr.msk.bf16.gmra.mrb[20].mxu1 %vm804_vm1, %v4633_v43  ;;  %v757_v54 = vshrl.u32 %v4637_v8, 16  ;;  %v759_v55 = vshll.u32 %v4637_v8, 16  ;;  %v766_v57 = vrot.slane %v764_v60, 1  ;;  %v4647_v46 = vsel %vm4331_vm5, 0, %v517_v36 }
  0x5f   : > { %v769_v62 = vshrl.u32 %v4647_v46, 16  ;;  %v771_v63 = vshll.u32 %v4647_v46, 16  ;;  %v778_v1 = vrot.slane %v776_v53, 1  ;;  %v373_v2 = vadd.f32 %v4307_v21, %v334_v38 }
  0x60   : > { %v761_v12 = vrot.slane %v759_v55, 1  ;;  %3794 = vmatmul.mubr.msk.bf16.gmra.mrb[8].mxu0 %vm804_vm1, %v4624_v34  ;;  %v374_v32 = vadd.f32 %v4307_v21, %v335_v39  ;;  %v3440_v17 = vunpack.c.h.bf16 %v3458_v23  ;;  %v336_v11 = vmul.f32 %v3439_v19, %v4288_v9 }
  0x61   : > { %v773_v22 = vrot.slane %v771_v63, 1  ;;  %v405_v27 = vmax.f32 %v373_v2, 0.0  ;;  %v1266_v60 = vrot.slane %v4473_v44, 1  ;;  %v1267_v36 = vrot.slane %v4461_v37, 1 }
  0x62   : > { %v762_v4 = vor.u32 %v761_v12, %v757_v54  ;;  %v406_v3 = vmax.f32 %v374_v32, 0.0  ;;  %v337_v53 = vmul.f32 %v3440_v17, %v4288_v9  ;;  %v375_v38 = vadd.f32 %v4307_v21, %v336_v11 }
  0x63   : > { %v774_v55 = vor.u32 %v773_v22, %v769_v62  ;;  %v4661_v43 = vsel %vm1245_vm6, %v1266_v60, %v1267_v36  ;;  %v1269_v23 = vrot.slane %v4492_v56, 1  ;;  %v1270_v19 = vrot.slane %v4477_v47, 1  ;;  %v3459_v60 = vld [vmem:[%s4283_s8 + $0x78] sm:$0xff]  }
  0x64   : > { %v4666_v39 = vsel %vm615_vm4, %v762_v4, %v766_v57  ;;  %v424_v63 = vpack.c.bf16 %v406_v3, %v405_v27  ;;  %v376_v37 = vadd.f32 %v4307_v21, %v337_v53  ;;  %v407_v54 = vmax.f32 %v375_v38, 0.0  ;;  %3797 = vmatprep.mubr.msk.bf16.mxu0 %vm804_vm1, %v4661_v43 }
  0x65   : > { %3639 = vmatprep.mubr.msk.bf16.mxu1 %vm804_vm1, %v4666_v39  ;;  %v4674_v62 = vsel %vm615_vm4, %v774_v55, %v778_v1  ;;  %v4677_v2 = vsel %vm1245_vm6, %v1269_v23, %v1270_v19  ;;  %v1272_v4 = vrot.slane %v4535_v49, 1  ;;  %v1273_v3 = vrot.slane %v4519_v28, 1 }
  0x66   : > { %5211 = vst [vmem:[#allocation4_spill] sm:$0xff] %v4674_v62  ;;  %3640 = vmatmul.mubr.msk.bf16.gmra.mrb[24].mxu1 %vm804_vm1, %v4674_v62  ;;  %v519_v47 = vshrl.u32 %v424_v63, 16  ;;  %v522_v57 = vshll.u32 %v424_v63, 16  ;;  %v408_v12 = vmax.f32 %v376_v37, 0.0  ;;  %v1275_v11 = vrot.slane %v4587_v15, 1 }
  0x67   : > { %v4684_v32 = vsel %vm1245_vm6, %v1272_v4, %v1273_v3  ;;  %v1276_v28 = vrot.slane %v4576_v61, 1  ;;  %v1278_v22 = vrot.slane %v4601_v51, 1  ;;  %v1279_v27 = vrot.slane %v4594_v29, 1 }
  0x68   : > { %v521_v17 = vrot.slane %v519_v47, 7  ;;  %v425_v1 = vpack.c.bf16 %v408_v12, %v407_v54  ;;  %3798 = vmatmul.mubr.msk.bf16.gmra.mrb[12].mxu0 %vm804_vm1, %v4677_v2  ;;  %v3443_v37 = vunpack.c.l.bf16 %v3459_v60  ;;  %v3444_v54 = vunpack.c.h.bf16 %v3459_v60 }
  0x69   : > { %3801 = vmatprep.mubr.msk.bf16.mxu0 %vm804_vm1, %v4684_v32  ;;  %v4704_v29 = vsel %vm1245_vm6, %v1275_v11, %v1276_v28  ;;  %v4707_v3 = vsel %vm1245_vm6, %v1278_v22, %v1279_v27  ;;  %v1281_v11 = vrot.slane %v4637_v8, 1 }
  0x6a   : > { %v524_v36 = vor.u32 %v522_v57, %v521_v17  ;;  %v603_v53 = vsel %vm4331_vm5, %v521_v17, 0  ;;  %v526_v38 = vshrl.u32 %v425_v1, 16  ;;  %v529_v55 = vshll.u32 %v425_v1, 16 }
  0x6b   : > { %v788_v23 = vshll.u32 %v603_v53, 16  ;;  %v338_v12 = vmul.f32 %v3443_v37, %v4288_v9  ;;  %v339_v17 = vmul.f32 %v3444_v54, %v4288_v9  ;;  %v1285_v37 = vrot.slane %v4629_v26, 1 }
  0x6c   : > { %v4699_v19 = vsel %vm4331_vm5, 0, %v524_v36  ;;  %v528_v63 = vrot.slane %v526_v38, 7 }
  0x6d   : > { %v781_v61 = vshrl.u32 %v4699_v19, 16  ;;  %v783_v4 = vshll.u32 %v4699_v19, 16  ;;  %v790_v60 = vrot.slane %v788_v23, 1  ;;  %v377_v28 = vadd.f32 %v4307_v21, %v338_v12 }
  0x6e   : > { %v531_v47 = vor.u32 %v529_v55, %v528_v63  ;;  %v604_v57 = vsel %vm4331_vm5, %v528_v63, 0  ;;  %v378_v22 = vadd.f32 %v4307_v21, %v339_v17  ;;  %v1282_v23 = vrot.slane %v4621_v13, 1 }
  0x6f   : > { %v785_v1 = vrot.slane %v783_v4, 1  ;;  %v800_v36 = vshll.u32 %v604_v57, 16  ;;  %v1284_v63 = vrot.slane %v4647_v46, 1  ;;  %v409_v54 = vmax.f32 %v377_v28, 0.0 }
  0x70   : > { %v4715_v38 = vsel %vm4331_vm5, 0, %v531_v47  ;;  %3802 = vmatmul.mubr.msk.bf16.gmra.mrb[16].mxu0 %vm804_vm1, %v4704_v29  ;;  %v410_v4 = vmax.f32 %v378_v22, 0.0  ;;  %v1288_v22 = vrot.slane %v603_v53, 1 }
  0x71   : > { %v786_v27 = vor.u32 %v785_v1, %v781_v61  ;;  %v793_v55 = vshrl.u32 %v4715_v38, 16  ;;  %v795_v9 = vshll.u32 %v4715_v38, 16  ;;  %3805 = vmatprep.mubr.msk.bf16.mxu0 %vm804_vm1, %v4707_v3  ;;  %v802_v61 = vrot.slane %v800_v36, 1 }
  0x72   : > { %v426_v12 = vpack.c.bf16 %v410_v4, %v409_v54  ;;  %v4735_v1 = vsel %vm1245_vm6, %v1281_v11, %v1282_v23  ;;  %v4738_v13 = vsel %vm1245_vm6, %v1284_v63, %v1285_v37  ;;  %v5212_v36 = vmov 0  }
  0x73   : > { %v4730_v47 = vsel %vm615_vm4, %v786_v27, %v790_v60  ;;  %v797_v21 = vrot.slane %v795_v9, 1  ;;  %v1287_v11 = vrot.slane %v4699_v19, 1  ;;  %v1291_v9 = vrot.slane %v604_v57, 1  ;;  %v609_v57 = vld [vmem:[%s5197_s3 + $0x6] sm:$0x3] }
  0x74   : > { %3643 = vmatprep.mubr.msk.bf16.mxu1 %vm804_vm1, %v4730_v47  ;;  %v533_v62 = vshrl.u32 %v426_v12, 16  ;;  %v536_v26 = vshll.u32 %v426_v12, 16  ;;  %v1342_v63 = vsel %vm853_vm0, %v4404_v18, 0  ;;  %v2347_v4 = vsel %vm853_vm0, %v4565_v52, 0 }
  0x75   : > { %v798_v17 = vor.u32 %v797_v21, %v793_v55  ;;  %v1290_v55 = vrot.slane %v4715_v38, 1  ;;  %v4753_v23 = vsel %vm1245_vm6, %v1287_v11, %v1288_v22  ;;  %v614_v21 = vld [vmem:[%s5197_s3 + $0x10] sm:$0x3]  ;;  %v1541_v52 = vsel %vm853_vm0, %v609_v57, 0 }
  0x76   : > { %v535_v60 = vrot.slane %v533_v62, 7 }
  0x77   : > { %v4741_v28 = vsel %vm615_vm4, %v798_v17, %v802_v61  ;;  %v4766_v53 = vsel %vm1245_vm6, %v1290_v55, %v1291_v9  ;;  %v4196_v61 = vld [vmem:[%s5197_s3 + $0x8] sm:$0x3] }
  0x78   : > { %3644 = vmatmul.mubr.msk.bf16.gmra.mrb[28].mxu1 %vm804_vm1, %v4741_v28  ;;  %3806 = vmatmul.mubr.msk.bf16.gmra.mrb[20].mxu0 %vm804_vm1, %v4735_v1  ;;  %v538_v27 = vor.u32 %v536_v26, %v535_v60  ;;  %v4763_v37 = vsel %vm4331_vm5, %v535_v60, 0  ;;  %v5215_v26 = vld [vmem:[#allocation2_spill] sm:$0xff] }
  0x79   : > { %3649 = vmatprep.mubr.bf16.mxu1 %v5212_v36  ;;  %3809 = vmatprep.mubr.msk.bf16.mxu0 %vm804_vm1, %v4738_v13  ;;  %v1949_v18 = vrot.slane %v4763_v37, 1 }
  0x7a   : > { %v4759_v62 = vsel %vm4331_vm5, 0, %v538_v27 }
  0x7b   : > { %v1948_v16 = vrot.slane %v4759_v62, 1 }
  0x7d   : > { %v4783_v54 = vsel %vm1245_vm6, %v1948_v16, %v1949_v18 }
  0x80   : > { %3650 = vmatmul.mubr.msk.bf16.vlgmr.msra.gmra.mrb[0].mxu1 %vm804_vm1, %v4350_v30  ;;  %3810 = vmatmul.mubr.msk.bf16.gmra.mrb[24].mxu0 %vm804_vm1, %v4753_v23 }
  0x81   : > { %3682 = vmatpush3.bf16.msra.mxu1 %v1342_v63  ;;  %3653 = vmatprep.mubr.msk.bf16.mxu1 %vm804_vm1, %v4354_v31 }
  0x82   : > { %3813 = vmatprep.mubr.msk.bf16.mxu0 %vm804_vm1, %v4766_v53  ;;  %4180 = vmatprep.subr.msk.bf16.mxu1 %vm853_vm0, %v609_v57 }
  0x88   : > { %3654 = vmatmul.mubr.msk.bf16.gmra.mrb[4].mxu1 %vm804_vm1, %v4366_v40  ;;  %3814 = vmatmul.mubr.msk.bf16.gmra.mrb[28].mxu0 %vm804_vm1, %v4783_v54 }
  0x89   : > { %3657 = vmatprep.mubr.msk.bf16.mxu1 %vm804_vm1, %v4373_v45  ;;  %3819 = vmatprep.mubr.msk.bf16.mxu0 %vm804_vm1, %v4354_v31 }
  0x90   : > { %3658 = vmatmul.mubr.msk.bf16.gmra.mrb[8].mxu1 %vm804_vm1, %v4441_v58  ;;  %3820 = vmatmul.mubr.msk.bf16.vlgmr.msra.gmra.mrb[0].mxu0 %vm804_vm1, %v4366_v40 }
  0x91   : > { %3661 = vmatprep.mubr.msk.bf16.mxu1 %vm804_vm1, %v4452_v6  ;;  %3852 = vmatpush3.bf16.msra.mxu0 %v2347_v4 }
  0x92   : > { %3823 = vmatprep.mubr.msk.bf16.mxu0 %vm804_vm1, %v4373_v45  ;;  %4186 = vmatprep.subr.msk.bf16.mxu0 %vm853_vm0, %v614_v21 }
  0x98   : > { %3662 = vmatmul.mubr.msk.bf16.gmra.mrb[12].mxu1 %vm804_vm1, %v4473_v44  ;;  %3824 = vmatmul.mubr.msk.bf16.gmra.mrb[4].mxu0 %vm804_vm1, %v4441_v58 }
  0x99   : > { %3665 = vmatprep.mubr.msk.bf16.mxu1 %vm804_vm1, %v4492_v56  ;;  %3827 = vmatprep.mubr.msk.bf16.mxu0 %vm804_vm1, %v4452_v6 }
  0xa0   : > { %3666 = vmatmul.mubr.msk.bf16.gmra.mrb[16].mxu1 %vm804_vm1, %v4535_v49  ;;  %3828 = vmatmul.mubr.msk.bf16.gmra.mrb[8].mxu0 %vm804_vm1, %v4473_v44 }
  0xa1   : > { %3669 = vmatprep.mubr.msk.bf16.mxu1 %vm804_vm1, %v4587_v15  ;;  %3831 = vmatprep.mubr.msk.bf16.mxu0 %vm804_vm1, %v4492_v56 }
  0xa8   : > { %3670 = vmatmul.mubr.msk.bf16.gmra.mrb[20].mxu1 %vm804_vm1, %v4601_v51  ;;  %3832 = vmatmul.mubr.msk.bf16.gmra.mrb[12].mxu0 %vm804_vm1, %v4535_v49 }
  0xa9   : > { %3673 = vmatprep.mubr.msk.bf16.mxu1 %vm804_vm1, %v4637_v8  ;;  %3835 = vmatprep.mubr.msk.bf16.mxu0 %vm804_vm1, %v4587_v15 }
  0xb0   : > { %3674 = vmatmul.mubr.msk.bf16.gmra.mrb[24].mxu1 %vm804_vm1, %v4647_v46  ;;  %3836 = vmatmul.mubr.msk.bf16.gmra.mrb[16].mxu0 %vm804_vm1, %v4601_v51 }
  0xb1   : > { %3677 = vmatprep.mubr.msk.bf16.mxu1 %vm804_vm1, %v4699_v19  ;;  %3839 = vmatprep.mubr.msk.bf16.mxu0 %vm804_vm1, %v4637_v8 }
  0xb8   : > { %3678 = vmatmul.mubr.msk.bf16.gmra.mrb[28].mxu1 %vm804_vm1, %v4715_v38  ;;  %3840 = vmatmul.mubr.msk.bf16.gmra.mrb[20].mxu0 %vm804_vm1, %v4647_v46 }
  0xb9   : > { %3683 = vmatprep.mubr.msk.bf16.mxu1 %vm804_vm1, %v4257_v5  ;;  %3843 = vmatprep.mubr.msk.bf16.mxu0 %vm804_vm1, %v4699_v19 }
  0xc0   : > { %3684 = vmatmul.mubr.msk.bf16.vlgmr.msra.gmra.mrb[0].mxu1 %vm804_vm1, %v4496_v59  ;;  %3844 = vmatmul.mubr.msk.bf16.gmra.mrb[24].mxu0 %vm804_vm1, %v4715_v38  ;;  %v2543_v59 = vsel %vm853_vm0, %v614_v21, 0 }
  0xc1   : > { %3716 = vmatpush3.bf16.msra.mxu1 %v1541_v52  ;;  %3687 = vmatprep.mubr.msk.bf16.mxu1 %vm804_vm1, %v4505_v20 }
  0xc2   : > { %3847 = vmatprep.mubr.msk.bf16.mxu0 %vm804_vm1, %v4759_v62  ;;  %4182 = vmatprep.subr.msk.bf16.mxu1 %vm853_vm0, %v4196_v61 }
  0xc8   : > { %3688 = vmatmul.mubr.msk.bf16.gmra.mrb[4].mxu1 %vm804_vm1, %v4547_v7  ;;  %3848 = vmatmul.mubr.bf16.gmra.mrb[28].mxu0 %v5212_v36 }
  0xc9   : > { %3691 = vmatprep.mubr.msk.bf16.mxu1 %vm804_vm1, %v4552_v35  ;;  %3853 = vmatprep.mubr.msk.bf16.mxu0 %vm804_vm1, %v4391_v0  ;;  %v5213_v0 = vld [vmem:[#allocation3_spill] sm:$0xff] }
  0xd0   : > { %3692 = vmatmul.mubr.msk.bf16.gmra.mrb[8].mxu1 %vm804_vm1, %v4597_v25  ;;  %3854 = vmatmul.mubr.msk.bf16.vlgmr.msra.gmra.mrb[0].mxu0 %vm804_vm1, %v4399_v10  ;;  %v1738_v10 = vshll.u32 %v4759_v62, 16 }
  0xd1   : > { %3695 = vmatprep.mubr.msk.bf16.mxu1 %vm804_vm1, %v4624_v34  ;;  %3886 = vmatpush3.bf16.msra.mxu0 %v2543_v59 }
  0xd2   : > { %3857 = vmatprep.mubr.msk.bf16.mxu0 %vm804_vm1, %v4412_v24  ;;  %v1736_v24 = vshrl.u32 %v4759_v62, 16 }
  0xd8   : > { %3696 = vmatmul.mubr.msk.bf16.gmra.mrb[12].mxu1 %vm804_vm1, %v4661_v43  ;;  %3858 = vmatmul.mubr.msk.bf16.gmra.mrb[4].mxu0 %vm804_vm1, %v4464_v41  ;;  %v1740_v41 = vrot.slane %v1738_v10, 1 }
  0xd9   : > { %3699 = vmatprep.mubr.msk.bf16.mxu1 %vm804_vm1, %v4677_v2  ;;  %3861 = vmatprep.mubr.msk.bf16.mxu0 %vm804_vm1, %v4481_v50  ;;  %v1743_v50 = vshll.u32 %v4763_v37, 16 }
  0xdb   : > { %v1745_v12 = vrot.slane %v1743_v50, 1 }
  0xe0   : > { %3700 = vmatmul.mubr.msk.bf16.gmra.mrb[16].mxu1 %vm804_vm1, %v4684_v32  ;;  %3862 = vmatmul.mubr.msk.bf16.gmra.mrb[8].mxu0 %vm804_vm1, %v4509_v33  ;;  %v5214_v33 = vld [vmem:[#allocation4_spill] sm:$0xff] }
  0xe1   : > { %3703 = vmatprep.mubr.msk.bf16.mxu1 %vm804_vm1, %v4704_v29  ;;  %3865 = vmatprep.mubr.msk.bf16.mxu0 %vm804_vm1, %v4524_v42  ;;  %v1741_v42 = vor.u32 %v1740_v41, %v1736_v24 }
  0xe3   : > { %v1746_v17 = vsel %vm615_vm4, %v1741_v42, %v1745_v12 }
  0xe8   : > { %3704 = vmatmul.mubr.msk.bf16.gmra.mrb[20].mxu1 %vm804_vm1, %v4707_v3  ;;  %3866 = vmatmul.mubr.msk.bf16.gmra.mrb[12].mxu0 %vm804_vm1, %v4558_v48 }
  0xe9   : > { %3707 = vmatprep.mubr.msk.bf16.mxu1 %vm804_vm1, %v4735_v1  ;;  %3869 = vmatprep.mubr.msk.bf16.mxu0 %vm804_vm1, %v4615_v14 }
  0xf0   : > { %3708 = vmatmul.mubr.msk.bf16.gmra.mrb[24].mxu1 %vm804_vm1, %v4738_v13  ;;  %3870 = vmatmul.mubr.msk.bf16.gmra.mrb[16].mxu0 %vm804_vm1, %v5213_v0 }
  0xf1   : > { %3711 = vmatprep.mubr.msk.bf16.mxu1 %vm804_vm1, %v4753_v23  ;;  %3873 = vmatprep.mubr.msk.bf16.mxu0 %vm804_vm1, %v4666_v39 }
  0xf8   : > { %3712 = vmatmul.mubr.msk.bf16.gmra.mrb[28].mxu1 %vm804_vm1, %v4766_v53  ;;  %3874 = vmatmul.mubr.msk.bf16.gmra.mrb[20].mxu0 %vm804_vm1, %v5214_v33 }
  0xf9   : > { %3717 = vmatprep.mubr.msk.bf16.mxu1 %vm804_vm1, %v4350_v30  ;;  %3877 = vmatprep.mubr.msk.bf16.mxu0 %vm804_vm1, %v4730_v47 }
 0x100   : > { %3718 = vmatmul.mubr.msk.bf16.vlgmr.msra.gmra.mrb[0].mxu1 %vm804_vm1, %v4354_v31  ;;  %3878 = vmatmul.mubr.msk.bf16.gmra.mrb[24].mxu0 %vm804_vm1, %v4741_v28 }
 0x101   : > { %3920 = vmatpush3.bf16.msra.mxu1 %v5215_v26  ;;  %3721 = vmatprep.mubr.msk.bf16.mxu1 %vm804_vm1, %v4366_v40 }
 0x102   : > { %3881 = vmatprep.mubr.msk.bf16.mxu0 %vm804_vm1, %v1746_v17 }
 0x108   : > { %3722 = vmatmul.mubr.msk.bf16.gmra.mrb[4].mxu1 %vm804_vm1, %v4373_v45  ;;  %3882 = vmatmul.mubr.msk.bf16.gmra.mrb[28].mxu0 %vm804_vm1, %v4257_v5 }
 0x109   : > { %3725 = vmatprep.mubr.msk.bf16.mxu1 %vm804_vm1, %v4441_v58  ;;  %3887 = vmatprep.mubr.msk.bf16.mxu0 %vm804_vm1, %v4505_v20 }
 0x110   : > { %3726 = vmatmul.mubr.msk.bf16.gmra.mrb[8].mxu1 %vm804_vm1, %v4452_v6  ;;  %3888 = vmatmul.mubr.msk.bf16.vlgmr.msra.gmra.mrb[0].mxu0 %vm804_vm1, %v4547_v7 }
 0x111   : > { %3729 = vmatprep.mubr.msk.bf16.mxu1 %vm804_vm1, %v4473_v44  ;;  %3891 = vmatprep.mubr.msk.bf16.mxu0 %vm804_vm1, %v4552_v35 }
 0x118   : > { %3730 = vmatmul.mubr.msk.bf16.gmra.mrb[12].mxu1 %vm804_vm1, %v4492_v56  ;;  %3892 = vmatmul.mubr.msk.bf16.gmra.mrb[4].mxu0 %vm804_vm1, %v4597_v25 }
 0x119   : > { %3733 = vmatprep.mubr.msk.bf16.mxu1 %vm804_vm1, %v4535_v49  ;;  %3895 = vmatprep.mubr.msk.bf16.mxu0 %vm804_vm1, %v4624_v34 }
 0x120   : > { %3734 = vmatmul.mubr.msk.bf16.gmra.mrb[16].mxu1 %vm804_vm1, %v4587_v15  ;;  %3896 = vmatmul.mubr.msk.bf16.gmra.mrb[8].mxu0 %vm804_vm1, %v4661_v43 }
 0x121   : > { %3737 = vmatprep.mubr.msk.bf16.mxu1 %vm804_vm1, %v4601_v51  ;;  %3899 = vmatprep.mubr.msk.bf16.mxu0 %vm804_vm1, %v4677_v2 }
 0x128   : > { %3738 = vmatmul.mubr.msk.bf16.gmra.mrb[20].mxu1 %vm804_vm1, %v4637_v8  ;;  %3900 = vmatmul.mubr.msk.bf16.gmra.mrb[12].mxu0 %vm804_vm1, %v4684_v32 }
 0x129   : > { %3741 = vmatprep.mubr.msk.bf16.mxu1 %vm804_vm1, %v4647_v46  ;;  %3903 = vmatprep.mubr.msk.bf16.mxu0 %vm804_vm1, %v4704_v29 }
 0x130   : > { %3742 = vmatmul.mubr.msk.bf16.gmra.mrb[24].mxu1 %vm804_vm1, %v4699_v19  ;;  %3904 = vmatmul.mubr.msk.bf16.gmra.mrb[16].mxu0 %vm804_vm1, %v4707_v3 }
 0x131   : > { %3745 = vmatprep.mubr.msk.bf16.mxu1 %vm804_vm1, %v4715_v38  ;;  %3907 = vmatprep.mubr.msk.bf16.mxu0 %vm804_vm1, %v4735_v1 }
 0x138   : > { %3746 = vmatmul.mubr.msk.bf16.gmra.mrb[28].mxu1 %vm804_vm1, %v4759_v62  ;;  %3908 = vmatmul.mubr.msk.bf16.gmra.mrb[20].mxu0 %vm804_vm1, %v4738_v13 }
 0x139   : > { %3767 = vmatprep.mubr.msk.bf16.mxu1 %vm804_vm1, %v4558_v48  ;;  %3911 = vmatprep.mubr.msk.bf16.mxu0 %vm804_vm1, %v4753_v23 }
 0x140   : > { %3768 = vmatmul.mubr.msk.bf16.vlgmr.msra.gmra.mrb[16].mxu1 %vm804_vm1, %v4615_v14  ;;  %3912 = vmatmul.mubr.msk.bf16.gmra.mrb[24].mxu0 %vm804_vm1, %v4766_v53 }
 0x141   : > { %3771 = vmatprep.mubr.msk.bf16.mxu1 %vm804_vm1, %v5213_v0  ;;  %3915 = vmatprep.mubr.msk.bf16.mxu0 %vm804_vm1, %v4783_v54 }
 0x148   : > { %3772 = vmatmul.mubr.msk.bf16.gmra.mrb[20].mxu1 %vm804_vm1, %v4666_v39  ;;  %3916 = vmatmul.mubr.msk.bf16.gmra.mrb[28].mxu0 %vm804_vm1, %v4257_v5 }
 0x149   : > { %3775 = vmatprep.mubr.msk.bf16.mxu1 %vm804_vm1, %v5214_v33 }
 0x150   : > { %3776 = vmatmul.mubr.msk.bf16.gmra.mrb[24].mxu1 %vm804_vm1, %v4730_v47 }
 0x151   : > { %3779 = vmatprep.mubr.msk.bf16.mxu1 %vm804_vm1, %v4741_v28 }
 0x158   : > { %3780 = vmatmul.mubr.msk.bf16.gmra.mrb[28].mxu1 %vm804_vm1, %v1746_v17 }
 0x1d3   : > { %v3719_v30 = vpop.f32.mrb[0].mxu1 }
 0x1d4   : > { %v1577_v31 = vpop.f32.mrb[1].mxu1 }
 0x1d5   : > { %v3720_v40 = vpop.f32.mrb[2].mxu1 }
 0x1d6   : > { %v1580_v45 = vpop.f32.mrb[3].mxu1 }
 0x1db   : > { %v3723_v58 = vpop.f32.mrb[4].mxu1 }
 0x1dc   : > { %v1593_v6 = vpop.f32.mrb[5].mxu1 }
 0x1dd   : > { %v3724_v44 = vpop.f32.mrb[6].mxu1 }
 0x1de   : > { %v1596_v5 = vpop.f32.mrb[7].mxu1 }
 0x1e3   : > { %v5003_v56 = vpop.f32.mrb[8].mxu1  ;;  %v3889_v20 = vpop.f32.mrb[0].mxu0 }
 0x1e4   : > { %v5005_v49 = vpop.f32.mrb[9].mxu1  ;;  %v3921_v7 = vadd.f32 %v3889_v20, %v3719_v30  ;;  %v2579_v35 = vpop.f32.mrb[1].mxu0 }
 0x1e5   : > { %v5014_v48 = vpop.f32.mrb[10].mxu1  ;;  %v3922_v15 = vadd.f32 %v2579_v35, %v1577_v31  ;;  %v3890_v25 = vpop.f32.mrb[2].mxu0 }
 0x1e6   : > { %v5016_v51 = vpop.f32.mrb[11].mxu1  ;;  %v3351_v14 = vpack.c.bf16 %v3921_v7, %v3921_v7  ;;  %v3923_v34 = vadd.f32 %v3890_v25, %v3720_v40  ;;  %v2582_v43 = vpop.f32.mrb[3].mxu0  ;;  %v2970_v2 = vmul.f32 %v3921_v7, %v3921_v7  ;;  %v2902_v28 = vsel %vm804_vm1, %v3921_v7, 0.0 }
 0x1e7   : > { %v3349_v8 = vpack.c.bf16 %v3922_v15, %v3922_v15  ;;  %v2968_v46 = vmul.f32 %v3922_v15, %v3922_v15  ;;  %v3924_v39 = vadd.f32 %v2582_v43, %v1580_v45  ;;  %v2899_v19 = vsel %vm804_vm1, %v3922_v15, 0.0 }
 0x1e8   : > { %2869 = vst.msk [vmem:[%s5012_s27 + $0x8] sm:$0xf] %vm2866_vm7, %v3351_v14  ;;  %v3352_v32 = vpack.c.bf16 %v3923_v34, %v3923_v34  ;;  %v2971_v47 = vmul.f32 %v3923_v34, %v3923_v34  ;;  %v3003_v62 = vsel %vm804_vm1, %v2970_v2, 0.0  ;;  %v2904_v16 = vsel %vm804_vm1, %v3923_v34, 0.0 }
 0x1e9   : > { %2867 = vst.msk [vmem:[%s5012_s27] sm:$0xf] %vm2866_vm7, %v3349_v8  ;;  %v3350_v29 = vpack.c.bf16 %v3924_v39, %v3924_v39  ;;  %v2900_v3 = vsel %vm804_vm1, %v3924_v39, 0.0  ;;  %v2969_v38 = vmul.f32 %v3924_v39, %v3924_v39  ;;  %v3000_v60 = vsel %vm804_vm1, %v2968_v46, 0.0 }
 0x1ea   : > { %2870 = vst.msk [vmem:[%s5012_s27 + $0xc] sm:$0xf] %vm2866_vm7, %v3352_v32  ;;  %v2901_v1 = vadd.f32 %v2900_v3, %v2899_v19  ;;  %v3005_v18 = vsel %vm804_vm1, %v2971_v47, 0.0 }
 0x1eb   : > { %v5026_v13 = vpop.f32.mrb[12].mxu1  ;;  %2868 = vst.msk [vmem:[%s5012_s27 + $0x4] sm:$0xf] %vm2866_vm7, %v3350_v29  ;;  %v3001_v36 = vsel %vm804_vm1, %v2969_v38, 0.0  ;;  %v3893_v11 = vpop.f32.mrb[4].mxu0 }
 0x1ec   : > { %v5033_v22 = vpop.f32.mrb[13].mxu1  ;;  %v2903_v27 = vadd.f32 %v2902_v28, %v2901_v1  ;;  %v3002_v55 = vadd.f32 %v3001_v36, %v3000_v60  ;;  %v3925_v9 = vadd.f32 %v3893_v11, %v3723_v58  ;;  %v2595_v23 = vpop.f32.mrb[5].mxu0 }
 0x1ed   : > { %v5035_v63 = vpop.f32.mrb[14].mxu1  ;;  %v3926_v37 = vadd.f32 %v2595_v23, %v1593_v6  ;;  %v3894_v53 = vpop.f32.mrb[6].mxu0 }
 0x1ee   : > { %v5038_v57 = vpop.f32.mrb[15].mxu1  ;;  %v3004_v54 = vadd.f32 %v3003_v62, %v3002_v55  ;;  %v3355_v4 = vpack.c.bf16 %v3925_v9, %v3925_v9  ;;  %v2598_v21 = vpop.f32.mrb[7].mxu0  ;;  %v2905_v61 = vadd.f32 %v2904_v16, %v2903_v27  ;;  %v3927_v24 = vadd.f32 %v3894_v53, %v3724_v44 }
 0x1ef   : > { %v3353_v52 = vpack.c.bf16 %v3926_v37, %v3926_v37  ;;  %v2906_v59 = vsel %vm804_vm1, %v3926_v37, 0.0  ;;  %v2972_v0 = vmul.f32 %v3926_v37, %v3926_v37  ;;  %v3928_v41 = vadd.f32 %v2598_v21, %v1596_v5 }
 0x1f0   : > { %2873 = vst.msk [vmem:[%s5012_s27 + $0x18] sm:$0xf] %vm2866_vm7, %v3355_v4  ;;  %v3006_v10 = vadd.f32 %v3005_v18, %v3004_v54  ;;  %v2907_v50 = vadd.f32 %v2906_v59, %v2905_v61  ;;  %v2974_v42 = vmul.f32 %v3925_v9, %v3925_v9  ;;  %v3356_v17 = vpack.c.bf16 %v3927_v24, %v3927_v24 }
 0x1f1   : > { %2871 = vst.msk [vmem:[%s5012_s27 + $0x10] sm:$0xf] %vm2866_vm7, %v3353_v52  ;;  %v3007_v33 = vsel %vm804_vm1, %v2972_v0, 0.0  ;;  %v3354_v26 = vpack.c.bf16 %v3928_v41, %v3928_v41  ;;  %v2908_v30 = vsel %vm804_vm1, %v3928_v41, 0.0  ;;  %v2973_v31 = vmul.f32 %v3928_v41, %v3928_v41 }
 0x1f2   : > { %v3008_v12 = vadd.f32 %v3007_v33, %v3006_v10  ;;  %2874 = vst.msk [vmem:[%s5012_s27 + $0x1c] sm:$0xf] %vm2866_vm7, %v3356_v17  ;;  %v2909_v45 = vadd.f32 %v2908_v30, %v2907_v50  ;;  %v2910_v44 = vsel %vm804_vm1, %v3925_v9, 0.0  ;;  %v2975_v5 = vmul.f32 %v3927_v24, %v3927_v24 }
 0x1f3   : > { %v3897_v40 = vpop.f32.mrb[8].mxu0  ;;  %2872 = vst.msk [vmem:[%s5012_s27 + $0x14] sm:$0xf] %vm2866_vm7, %v3354_v26  ;;  %v3009_v20 = vsel %vm804_vm1, %v2973_v31, 0.0  ;;  %v3011_v15 = vsel %vm804_vm1, %v2974_v42, 0.0 }
 0x1f4   : > { %v3929_v58 = vadd.f32 %v3897_v40, %v5003_v56  ;;  %v2611_v6 = vpop.f32.mrb[9].mxu0  ;;  %v2911_v25 = vadd.f32 %v2910_v44, %v2909_v45  ;;  %v3010_v14 = vadd.f32 %v3009_v20, %v3008_v12  ;;  %v2912_v56 = vsel %vm804_vm1, %v3927_v24, 0.0 }
 0x1f5   : > { %v3930_v7 = vadd.f32 %v2611_v6, %v5005_v49  ;;  %v3898_v35 = vpop.f32.mrb[10].mxu0  ;;  %v3013_v29 = vsel %vm804_vm1, %v2975_v5, 0.0 }
 0x1f6   : > { %v3359_v34 = vpack.c.bf16 %v3929_v58, %v3929_v58  ;;  %v2614_v43 = vpop.f32.mrb[11].mxu0  ;;  %v3012_v2 = vadd.f32 %v3011_v15, %v3010_v14  ;;  %v2913_v32 = vadd.f32 %v2912_v56, %v2911_v25  ;;  %v3931_v49 = vadd.f32 %v3898_v35, %v5014_v48 }
 0x1f7   : > { %v3357_v8 = vpack.c.bf16 %v3930_v7, %v3930_v7  ;;  %v2914_v46 = vsel %vm804_vm1, %v3930_v7, 0.0  ;;  %v2976_v39 = vmul.f32 %v3930_v7, %v3930_v7  ;;  %v3932_v19 = vadd.f32 %v2614_v43, %v5016_v51 }
 0x1f8   : > { %2877 = vst.msk [vmem:[%s5012_s27 + $0x28] sm:$0xf] %vm2866_vm7, %v3359_v34  ;;  %v2978_v38 = vmul.f32 %v3929_v58, %v3929_v58  ;;  %v2915_v47 = vadd.f32 %v2914_v46, %v2913_v32  ;;  %v3014_v1 = vadd.f32 %v3013_v29, %v3012_v2  ;;  %v3360_v28 = vpack.c.bf16 %v3931_v49, %v3931_v49 }
 0x1f9   : > { %2875 = vst.msk [vmem:[%s5012_s27 + $0x20] sm:$0xf] %vm2866_vm7, %v3357_v8  ;;  %v3015_v3 = vsel %vm804_vm1, %v2976_v39, 0.0  ;;  %v3358_v60 = vpack.c.bf16 %v3932_v19, %v3932_v19  ;;  %v2916_v36 = vsel %vm804_vm1, %v3932_v19, 0.0  ;;  %v2977_v11 = vmul.f32 %v3932_v19, %v3932_v19 }
 0x1fa   : > { %v3016_v55 = vadd.f32 %v3015_v3, %v3014_v1  ;;  %2878 = vst.msk [vmem:[%s5012_s27 + $0x2c] sm:$0xf] %vm2866_vm7, %v3360_v28  ;;  %v2917_v48 = vadd.f32 %v2916_v36, %v2915_v47  ;;  %v2918_v23 = vsel %vm804_vm1, %v3929_v58, 0.0  ;;  %v2979_v62 = vmul.f32 %v3931_v49, %v3931_v49 }
 0x1fb   : > { %v3901_v27 = vpop.f32.mrb[12].mxu0  ;;  %2876 = vst.msk [vmem:[%s5012_s27 + $0x24] sm:$0xf] %vm2866_vm7, %v3358_v60  ;;  %v3017_v37 = vsel %vm804_vm1, %v2977_v11, 0.0  ;;  %v3019_v18 = vsel %vm804_vm1, %v2978_v38, 0.0 }
 0x1fc   : > { %v3933_v51 = vadd.f32 %v3901_v27, %v5026_v13  ;;  %v2627_v9 = vpop.f32.mrb[13].mxu0  ;;  %v2919_v54 = vadd.f32 %v2918_v23, %v2917_v48  ;;  %v3018_v4 = vadd.f32 %v3017_v37, %v3016_v55  ;;  %v2920_v13 = vsel %vm804_vm1, %v3931_v49, 0.0 }
 0x1fd   : > { %v3934_v53 = vadd.f32 %v2627_v9, %v5033_v22  ;;  %v3902_v16 = vpop.f32.mrb[14].mxu0  ;;  %v3021_v50 = vsel %vm804_vm1, %v2979_v62, 0.0 }
 0x1fe   : > { %v3363_v21 = vpack.c.bf16 %v3933_v51, %v3933_v51  ;;  %v2630_v52 = vpop.f32.mrb[15].mxu0  ;;  %v3020_v10 = vadd.f32 %v3019_v18, %v3018_v4  ;;  %v2921_v24 = vadd.f32 %v2920_v13, %v2919_v54  ;;  %v3935_v22 = vadd.f32 %v3902_v16, %v5035_v63 }
 0x1ff   : > { %v3361_v61 = vpack.c.bf16 %v3934_v53, %v3934_v53  ;;  %v2922_v59 = vsel %vm804_vm1, %v3934_v53, 0.0  ;;  %v2980_v0 = vmul.f32 %v3934_v53, %v3934_v53  ;;  %v3936_v41 = vadd.f32 %v2630_v52, %v5038_v57 }
 0x200   : > { %2881 = vst.msk [vmem:[%s5012_s27 + $0x38] sm:$0xf] %vm2866_vm7, %v3363_v21  ;;  %v2923_v42 = vadd.f32 %v2922_v59, %v2921_v24  ;;  %v3022_v12 = vadd.f32 %v3021_v50, %v3020_v10  ;;  %v3364_v17 = vpack.c.bf16 %v3935_v22, %v3935_v22  ;;  %v2982_v26 = vmul.f32 %v3933_v51, %v3933_v51 }
 0x201   : > { %2879 = vst.msk [vmem:[%s5012_s27 + $0x30] sm:$0xf] %vm2866_vm7, %v3361_v61  ;;  %v3023_v33 = vsel %vm804_vm1, %v2980_v0, 0.0  ;;  %v3362_v30 = vpack.c.bf16 %v3936_v41, %v3936_v41  ;;  %v2924_v31 = vsel %vm804_vm1, %v3936_v41, 0.0  ;;  %v2981_v40 = vmul.f32 %v3936_v41, %v3936_v41 }
 0x202   : > { %v3024_v58 = vadd.f32 %v3023_v33, %v3022_v12  ;;  %2882 = vst.msk [vmem:[%s5012_s27 + $0x3c] sm:$0xf] %vm2866_vm7, %v3364_v17  ;;  %v2925_v63 = vadd.f32 %v2924_v31, %v2923_v42  ;;  %v2926_v6 = vsel %vm804_vm1, %v3933_v51, 0.0  ;;  %v2983_v44 = vmul.f32 %v3935_v22, %v3935_v22 }
 0x203   : > { %v3905_v45 = vpop.f32.mrb[16].mxu0  ;;  %2880 = vst.msk [vmem:[%s5012_s27 + $0x34] sm:$0xf] %vm2866_vm7, %v3362_v30  ;;  %v3025_v5 = vsel %vm804_vm1, %v2981_v40, 0.0  ;;  %v3027_v25 = vsel %vm804_vm1, %v2982_v26, 0.0  ;;  %v2928_v14 = vsel %vm804_vm1, %v3935_v22, 0.0 }
 0x204   : > { %v2643_v57 = vpop.f32.mrb[17].mxu0  ;;  %v2927_v7 = vadd.f32 %v2926_v6, %v2925_v63  ;;  %v3026_v35 = vadd.f32 %v3025_v5, %v3024_v58  ;;  %v3029_v56 = vsel %vm804_vm1, %v2983_v44, 0.0 }
 0x205   : > { %v3906_v20 = vpop.f32.mrb[18].mxu0 }
 0x206   : > { %v2646_v15 = vpop.f32.mrb[19].mxu0  ;;  %v3028_v34 = vadd.f32 %v3027_v25, %v3026_v35  ;;  %v2929_v43 = vadd.f32 %v2928_v14, %v2927_v7 }
 0x208   : > { %v3030_v8 = vadd.f32 %v3029_v56, %v3028_v34 }
 0x20b   : > { %v3909_v46 = vpop.f32.mrb[20].mxu0 }
 0x20c   : > { %v2659_v39 = vpop.f32.mrb[21].mxu0 }
 0x20d   : > { %v3910_v2 = vpop.f32.mrb[22].mxu0 }
 0x20e   : > { %v2662_v32 = vpop.f32.mrb[23].mxu0 }
 0x213   : > { %v3769_v49 = vpop.f32.mrb[16].mxu1  ;;  %v5098_v19 = vpop.f32.mrb[24].mxu0 }
 0x214   : > { %v1851_v29 = vpop.f32.mrb[17].mxu1  ;;  %v3937_v3 = vadd.f32 %v3905_v45, %v3769_v49  ;;  %v5100_v38 = vpop.f32.mrb[25].mxu0 }
 0x215   : > { %v3770_v47 = vpop.f32.mrb[18].mxu1  ;;  %v3938_v1 = vadd.f32 %v2643_v57, %v1851_v29  ;;  %v5102_v28 = vpop.f32.mrb[26].mxu0 }
 0x216   : > { %v3367_v60 = vpack.c.bf16 %v3937_v3, %v3937_v3  ;;  %v1854_v36 = vpop.f32.mrb[19].mxu1  ;;  %v3939_v11 = vadd.f32 %v3906_v20, %v3770_v47  ;;  %v5104_v27 = vpop.f32.mrb[27].mxu0  ;;  %v2986_v18 = vmul.f32 %v3937_v3, %v3937_v3  ;;  %v2934_v52 = vsel %vm804_vm1, %v3937_v3, 0.0 }
 0x217   : > { %v3365_v55 = vpack.c.bf16 %v3938_v1, %v3938_v1  ;;  %v2930_v48 = vsel %vm804_vm1, %v3938_v1, 0.0  ;;  %v2984_v51 = vmul.f32 %v3938_v1, %v3938_v1  ;;  %v3940_v9 = vadd.f32 %v2646_v15, %v1854_v36 }
 0x218   : > { %2885 = vst.msk [vmem:[%s5012_s27 + $0x48] sm:$0xf] %vm2866_vm7, %v3367_v60  ;;  %v2931_v23 = vadd.f32 %v2930_v48, %v2929_v43  ;;  %v3368_v62 = vpack.c.bf16 %v3939_v11, %v3939_v11  ;;  %v2987_v59 = vmul.f32 %v3939_v11, %v3939_v11  ;;  %v2936_v50 = vsel %vm804_vm1, %v3939_v11, 0.0 }
 0x219   : > { %2883 = vst.msk [vmem:[%s5012_s27 + $0x40] sm:$0xf] %vm2866_vm7, %v3365_v55  ;;  %v3031_v37 = vsel %vm804_vm1, %v2984_v51, 0.0  ;;  %v3366_v53 = vpack.c.bf16 %v3940_v9, %v3940_v9  ;;  %v2932_v16 = vsel %vm804_vm1, %v3940_v9, 0.0  ;;  %v2985_v21 = vmul.f32 %v3940_v9, %v3940_v9 }
 0x21a   : > { %v3032_v54 = vadd.f32 %v3031_v37, %v3030_v8  ;;  %2886 = vst.msk [vmem:[%s5012_s27 + $0x4c] sm:$0xf] %vm2866_vm7, %v3368_v62  ;;  %v2933_v4 = vadd.f32 %v2932_v16, %v2931_v23  ;;  %v3035_v26 = vsel %vm804_vm1, %v2986_v18, 0.0  ;;  %v3037_v44 = vsel %vm804_vm1, %v2987_v59, 0.0 }
 0x21b   : > { %2884 = vst.msk [vmem:[%s5012_s27 + $0x44] sm:$0xf] %vm2866_vm7, %v3366_v53  ;;  %v3773_v13 = vpop.f32.mrb[20].mxu1  ;;  %v5118_v61 = vpop.f32.mrb[28].mxu0  ;;  %v3033_v10 = vsel %vm804_vm1, %v2985_v21, 0.0 }
 0x21c   : > { %v2935_v0 = vadd.f32 %v2934_v52, %v2933_v4  ;;  %v1867_v24 = vpop.f32.mrb[21].mxu1  ;;  %v3941_v22 = vadd.f32 %v3909_v46, %v3773_v13  ;;  %v5121_v41 = vpop.f32.mrb[29].mxu0  ;;  %v3034_v33 = vadd.f32 %v3033_v10, %v3032_v54 }
 0x21d   : > { %v3774_v42 = vpop.f32.mrb[22].mxu1  ;;  %v3942_v12 = vadd.f32 %v2659_v39, %v1867_v24  ;;  %v5124_v17 = vpop.f32.mrb[30].mxu0 }
 0x21e   : > { %v3371_v30 = vpack.c.bf16 %v3941_v22, %v3941_v22  ;;  %v2937_v31 = vadd.f32 %v2936_v50, %v2935_v0  ;;  %v1870_v40 = vpop.f32.mrb[23].mxu1  ;;  %v5127_v45 = vpop.f32.mrb[31].mxu0  ;;  %v3036_v58 = vadd.f32 %v3035_v26, %v3034_v33  ;;  %v3943_v20 = vadd.f32 %v3910_v2, %v3774_v42 }
 0x21f   : > { %v3369_v63 = vpack.c.bf16 %v3942_v12, %v3942_v12  ;;  %v2938_v57 = vsel %vm804_vm1, %v3942_v12, 0.0  ;;  %v2988_v6 = vmul.f32 %v3942_v12, %v3942_v12  ;;  %v3944_v7 = vadd.f32 %v2662_v32, %v1870_v40 }
 0x220   : > { %2889 = vst.msk [vmem:[%s5012_s27 + $0x58] sm:$0xf] %vm2866_vm7, %v3371_v30  ;;  %v2939_v5 = vadd.f32 %v2938_v57, %v2937_v31  ;;  %v3038_v35 = vadd.f32 %v3037_v44, %v3036_v58  ;;  %v2990_v25 = vmul.f32 %v3941_v22, %v3941_v22  ;;  %v3372_v14 = vpack.c.bf16 %v3943_v20, %v3943_v20 }
 0x221   : > { %2887 = vst.msk [vmem:[%s5012_s27 + $0x50] sm:$0xf] %vm2866_vm7, %v3369_v63  ;;  %v3039_v15 = vsel %vm804_vm1, %v2988_v6, 0.0  ;;  %v3370_v34 = vpack.c.bf16 %v3944_v7, %v3944_v7  ;;  %v2940_v56 = vsel %vm804_vm1, %v3944_v7, 0.0  ;;  %v2989_v8 = vmul.f32 %v3944_v7, %v3944_v7 }
 0x222   : > { %v3040_v43 = vadd.f32 %v3039_v15, %v3038_v35  ;;  %2890 = vst.msk [vmem:[%s5012_s27 + $0x5c] sm:$0xf] %vm2866_vm7, %v3372_v14  ;;  %v2941_v39 = vadd.f32 %v2940_v56, %v2939_v5  ;;  %v2942_v49 = vsel %vm804_vm1, %v3941_v22, 0.0  ;;  %v2991_v29 = vmul.f32 %v3943_v20, %v3943_v20 }
 0x223   : > { %v3777_v46 = vpop.f32.mrb[24].mxu1  ;;  %2888 = vst.msk [vmem:[%s5012_s27 + $0x54] sm:$0xf] %vm2866_vm7, %v3370_v34  ;;  %v3041_v3 = vsel %vm804_vm1, %v2989_v8, 0.0  ;;  %v3043_v60 = vsel %vm804_vm1, %v2990_v25, 0.0  ;;  %v2944_v51 = vsel %vm804_vm1, %v3943_v20, 0.0 }
 0x224   : > { %v1883_v2 = vpop.f32.mrb[25].mxu1  ;;  %v3945_v32 = vadd.f32 %v5098_v19, %v3777_v46  ;;  %v2943_v36 = vadd.f32 %v2942_v49, %v2941_v39  ;;  %v3042_v11 = vadd.f32 %v3041_v3, %v3040_v43  ;;  %v3045_v16 = vsel %vm804_vm1, %v2991_v29, 0.0 }
 0x225   : > { %v3778_v47 = vpop.f32.mrb[26].mxu1  ;;  %v3946_v1 = vadd.f32 %v5100_v38, %v1883_v2 }
 0x226   : > { %v3375_v55 = vpack.c.bf16 %v3945_v32, %v3945_v32  ;;  %v1886_v48 = vpop.f32.mrb[27].mxu1  ;;  %v3044_v62 = vadd.f32 %v3043_v60, %v3042_v11  ;;  %v2945_v37 = vadd.f32 %v2944_v51, %v2943_v36  ;;  %v3947_v38 = vadd.f32 %v5102_v28, %v3778_v47 }
 0x227   : > { %v3373_v9 = vpack.c.bf16 %v3946_v1, %v3946_v1  ;;  %v2946_v19 = vsel %vm804_vm1, %v3946_v1, 0.0  ;;  %v2992_v23 = vmul.f32 %v3946_v1, %v3946_v1  ;;  %v3948_v53 = vadd.f32 %v5104_v27, %v1886_v48 }
 0x228   : > { %2893 = vst.msk [vmem:[%s5012_s27 + $0x68] sm:$0xf] %vm2866_vm7, %v3375_v55  ;;  %v2994_v54 = vmul.f32 %v3945_v32, %v3945_v32  ;;  %v2947_v4 = vadd.f32 %v2946_v19, %v2945_v37  ;;  %v3046_v21 = vadd.f32 %v3045_v16, %v3044_v62  ;;  %v3376_v52 = vpack.c.bf16 %v3947_v38, %v3947_v38 }
 0x229   : > { %2891 = vst.msk [vmem:[%s5012_s27 + $0x60] sm:$0xf] %vm2866_vm7, %v3373_v9  ;;  %v3047_v18 = vsel %vm804_vm1, %v2992_v23, 0.0  ;;  %v3374_v13 = vpack.c.bf16 %v3948_v53, %v3948_v53  ;;  %v2948_v59 = vsel %vm804_vm1, %v3948_v53, 0.0  ;;  %v2993_v0 = vmul.f32 %v3948_v53, %v3948_v53 }
 0x22a   : > { %v3048_v24 = vadd.f32 %v3047_v18, %v3046_v21  ;;  %2894 = vst.msk [vmem:[%s5012_s27 + $0x6c] sm:$0xf] %vm2866_vm7, %v3376_v52  ;;  %v2949_v28 = vadd.f32 %v2948_v59, %v2947_v4  ;;  %v2950_v50 = vsel %vm804_vm1, %v3945_v32, 0.0  ;;  %v2995_v33 = vmul.f32 %v3947_v38, %v3947_v38 }
 0x22b   : > { %v3781_v10 = vpop.f32.mrb[28].mxu1  ;;  %2892 = vst.msk [vmem:[%s5012_s27 + $0x64] sm:$0xf] %vm2866_vm7, %v3374_v13  ;;  %v3049_v42 = vsel %vm804_vm1, %v2993_v0, 0.0  ;;  %v3051_v30 = vsel %vm804_vm1, %v2994_v54, 0.0 }
 0x22c   : > { %v1899_v27 = vpop.f32.mrb[29].mxu1  ;;  %v3949_v22 = vadd.f32 %v5118_v61, %v3781_v10  ;;  %v2951_v31 = vadd.f32 %v2950_v50, %v2949_v28  ;;  %v3050_v40 = vadd.f32 %v3049_v42, %v3048_v24  ;;  %v2952_v61 = vsel %vm804_vm1, %v3947_v38, 0.0 }
 0x22d   : > { %v3782_v12 = vpop.f32.mrb[30].mxu1  ;;  %v3950_v26 = vadd.f32 %v5121_v41, %v1899_v27  ;;  %v3053_v35 = vsel %vm804_vm1, %v2995_v33, 0.0 }
 0x22e   : > { %v3379_v58 = vpack.c.bf16 %v3949_v22, %v3949_v22  ;;  %v1902_v63 = vpop.f32.mrb[31].mxu1  ;;  %v3052_v5 = vadd.f32 %v3051_v30, %v3050_v40  ;;  %v2953_v20 = vadd.f32 %v2952_v61, %v2951_v31  ;;  %v3951_v41 = vadd.f32 %v5124_v17, %v3782_v12 }
 0x22f   : > { %v3377_v57 = vpack.c.bf16 %v3950_v26, %v3950_v26  ;;  %v2954_v6 = vsel %vm804_vm1, %v3950_v26, 0.0  ;;  %v2996_v44 = vmul.f32 %v3950_v26, %v3950_v26  ;;  %v3952_v7 = vadd.f32 %v5127_v45, %v1902_v63 }
 0x230   : > { %2897 = vst.msk [vmem:[%s5012_s27 + $0x78] sm:$0xf] %vm2866_vm7, %v3379_v58  ;;  %v2955_v25 = vadd.f32 %v2954_v6, %v2953_v20  ;;  %v3054_v14 = vadd.f32 %v3053_v35, %v3052_v5  ;;  %v3380_v34 = vpack.c.bf16 %v3951_v41, %v3951_v41  ;;  %v2998_v43 = vmul.f32 %v3949_v22, %v3949_v22 }
 0x231   : > { %2895 = vst.msk [vmem:[%s5012_s27 + $0x70] sm:$0xf] %vm2866_vm7, %v3377_v57  ;;  %v3055_v15 = vsel %vm804_vm1, %v2996_v44, 0.0  ;;  %v3378_v56 = vpack.c.bf16 %v3952_v7, %v3952_v7  ;;  %v2956_v8 = vsel %vm804_vm1, %v3952_v7, 0.0  ;;  %v2997_v46 = vmul.f32 %v3952_v7, %v3952_v7 }
 0x232   : > { %v3056_v39 = vadd.f32 %v3055_v15, %v3054_v14  ;;  %2898 = vst.msk [vmem:[%s5012_s27 + $0x7c] sm:$0xf] %vm2866_vm7, %v3380_v34  ;;  %v2957_v17 = vadd.f32 %v2956_v8, %v2955_v25  ;;  %v2958_v45 = vsel %vm804_vm1, %v3949_v22, 0.0  ;;  %v2999_v2 = vmul.f32 %v3951_v41, %v3951_v41 }
 0x233   : > { %2896 = vst.msk [vmem:[%s5012_s27 + $0x74] sm:$0xf] %vm2866_vm7, %v3378_v56  ;;  %v3057_v32 = vsel %vm804_vm1, %v2997_v46, 0.0  ;;  %v3059_v3 = vsel %vm804_vm1, %v2998_v43, 0.0  ;;  %v2960_v47 = vsel %vm804_vm1, %v3951_v41, 0.0 }
 0x234   : > { %v2959_v49 = vadd.f32 %v2958_v45, %v2957_v17  ;;  %v3058_v29 = vadd.f32 %v3057_v32, %v3056_v39  ;;  %v3061_v36 = vsel %vm804_vm1, %v2999_v2, 0.0 }
 0x236   : > { %v2961_v1 = vadd.f32 %v2960_v47, %v2959_v49  ;;  %v3060_v60 = vadd.f32 %v3059_v3, %v3058_v29 }
 0x238   : > { %v2962_v11 = vrot.slane %v2961_v1, 4  ;;  %v3062_v55 = vadd.f32 %v3061_v36, %v3060_v60 }
 0x23a   : > { %v2963_v48 = vadd.f32 %v2962_v11, %v2961_v1  ;;  %v3063_v51 = vrot.slane %v3062_v55, 4 }
 0x23c   : > { %v2964_v9 = vrot.slane %v2963_v48, 2  ;;  %v3064_v19 = vadd.f32 %v3063_v51, %v3062_v55 }
 0x23e   : > { %v2965_v23 = vadd.f32 %v2964_v9, %v2963_v48  ;;  %v3065_v62 = vrot.slane %v3064_v19, 2 }
 0x240   : > { %v2966_v37 = vrot.slane %v2965_v23, 1  ;;  %v3066_v38 = vadd.f32 %v3065_v62, %v3064_v19 }
 0x242   : > { %v3067_v53 = vrot.slane %v3066_v38, 1  ;;  %v2967_v16 = vadd.f32 %v2966_v37, %v2965_v23 }
 0x244   : > { %v3068_v18 = vadd.f32 %v3067_v53, %v3066_v38 }
 0x246   : > { %v3070_v54 = vsel %vm571_vm2, %v2967_v16, %v3068_v18 }
 0x247   : > { %3072 = vst.msk [vmem:[%s235_s6] sm:$0x3] %vm3071_vm8, %v3070_v54 }
 0x248 PF: > { %s16_s18 = sadd.s32 1, %s4203_s18  }
 0x249   : > { %p13_p4 = scmp.ge.s32.totalorder %s16_s18, 4  }
 0x24b   :  { %15 = sbr.rel (!%p13_p4) target bundleno = 1 (0x1), region = 78 }

// kernel: basic_block_forward.5
= control target key start
LH: loop header
LB: loop body
LE: loop exit
PB: predicated region body
PF: predicated region fallthrough
CT: control target
= control target key end

     0   :  { %s350_s15 = smov 0   ;;  %s370_s0 = inlined_call_operand.vmem [shape: bf16[2,8,128], index: 0, kind: input, shape index: {}]   ;;  %s371_s1 = inlined_call_operand.vmem [shape: f32[2,8,128], index: 1, kind: input, shape index: {}]   ;;  %s372_s2 = inlined_call_operand.vmem [shape: f32[1,128], index: 2, kind: input, shape index: {}]   ;;  %s373_s3 = inlined_call_operand.vmem [shape: f32[1,128], index: 3, kind: input, shape index: {}]   ;;  %s374_s4 = inlined_call_operand.vmem [shape: f32[2,8,128], index: 4, kind: output, shape index: {}]  }
   0x1 LB: > { %s297_s16 = sadd.s32 4294967295, %s323_s15   ;;  %p301_p0 = scmp.ge.s32.totalorder %s323_s15, 1  ;;  %s323_s15 = sphi %s350_s15, %s14_s15  }
   0x2   : > { %p170_p1 = scmp.lt.s32.totalorder %s323_s15, 3 }
   0x4   : > { %p171_p2 = pnand %p301_p0, %p170_p1 }
   0x5   : > { %p198_p3 = scmp.lt.s32.totalorder (!%p171_p2), %s297_s16, 1  ;;  %v305_v1 = vld [vmem:[%s372_s2] ss:$0 sm:$0xff] (!%p171_p2) }
   0x6   : > { %174 = sbr.rel (%p171_p2) target bundleno = 28 (0x1c), region = 36  ;;  %v306_v3 = vld [vmem:[%s373_s3] ss:$0 sm:$0xff] (!%p171_p2) }
   0xd   : > { %s376_s16 = smov (!%p198_p3, %s297_s16), 1 }
   0xe   : > { %s302_s17 = sshll.u32 %s376_s16, 2  ;;  %s303_s18 = sshll.u32 %s376_s16, 3 }
   0xf   : > { %s201_s21 = scalar_lea.vmem %s370_s0, %s302_s17  ;;  %s205_s26 = scalar_lea.vmem %s371_s1, %s303_s18 }
  0x10   : > { %v210_v0 = vld [vmem:[%s201_s21] sm:$0xf]  ;;  %s209_s5 = scalar_lea.vmem %s374_s4, %s303_s18 }
  0x11   : > { %v211_v2 = vunpack.c.l.bf16 %v210_v0  ;;  %v228_v5 = vld [vmem:[%s205_s26] sm:$0xff] }
  0x13   : > { %v219_v4 = vmul.f32 %v305_v1, %v211_v2 }
  0x15   : > { %v227_v6 = vadd.f32 %v306_v3, %v219_v4 }
  0x17   : > { %v229_v7 = vadd.f32 %v228_v5, %v227_v6 }
  0x19   : > { %v230_v8 = vmax.f32 %v229_v7, 0.0 }
  0x1b   : > { %231 = vst [vmem:[%s209_s5] sm:$0xff] %v230_v8 }
  0x1c PF: > { %s14_s15 = sadd.s32 1, %s323_s15  }
  0x1d   : > { %p11_p4 = scmp.ge.s32.totalorder %s14_s15, 4  }
  0x1f   :  { %13 = sbr.rel (!%p11_p4) target bundleno = 1 (0x1), region = 69 }

</bundles_post_ra>
